<compile_context>
chip_gen: v6e
topology: v6e:2x2x1
jax: 0.10.0
libtpu: 0.0.40
codegen_flags: <defaults>
</compile_context>

<pallas_src>
import functools
import math

import jax
import jax.numpy as jnp
from jax.experimental import pallas as pl
from jax.experimental.pallas import tpu as pltpu


def _round_up(x, m):
    return ((x + m - 1) // m) * m


def _inverse_sigmoid(x, eps=1e-3):
    # NOTE: easycv/DAB-DETR uses eps=1e-3; some repos use 1e-5.
    x = jnp.clip(x, 0.0, 1.0)
    x1 = jnp.clip(x, eps, None)
    x2 = jnp.clip(1.0 - x, eps, None)
    return jnp.log(x1 / x2)


def _choose_tiling(n_rows, max_tile_rows):
    """Pick (tile_rows, n_tiles): tiles as large as the cap allows (the kernel
    is otherwise per-grid-step-overhead bound), an EVEN tile count >= 2 so both
    v7x TensorCores are busy, tile a multiple of 16 (bf16 sublane packing), and
    minimal row padding."""
    max_tile_rows = max(16, _round_up(max_tile_rows, 16))
    n_tiles = max(2, pl.cdiv(n_rows, max_tile_rows))
    if n_tiles % 2:
        n_tiles += 1
    tile_rows = _round_up(pl.cdiv(n_rows, n_tiles), 16)
    return tile_rows, n_tiles


def _head_kernel(hs_ref, ref_ref, wf_ref, bf_ref, w2_ref, b2_ref,
                 w3_ref, b3_ref, out_ref, *, d, eps):
    """Fused DAB-DETR head for one row tile.

    hs_ref : (TR, D)          f32   decoder features (bf16 cast happens here)
    ref_ref: (TR, 4)          f32   sigmoid-space anchor boxes
    wf_ref : (D, D + Nout)    bf16  [bbox layer-1 | lane-padded class_embed]
    bf_ref : (1, D + Nout)    f32   fused bias row
    w2_ref : (D, D)    bf16   b2_ref: (1, D)    f32
    w3_ref : (D, Nout) bf16   b3_ref: (1, Nout) f32   (real w3/b3 in lanes [0:4))
    out_ref: (TR, Nout) f32   lane-dense output slab:
             lanes [0:4)   -> sigmoid boxes (cx, cy, w, h)
             lanes [4:4+C) -> class logits
             other lanes   -> finite don't-care values (sliced away outside)
    """
    cdt = wf_ref.dtype
    hs = hs_ref[...].astype(cdt)                    # f32 -> bf16 cast in VMEM

    # One wide MXU pass computes bbox-MLP layer-1 AND class_embed together.
    z = jnp.dot(hs, wf_ref[...], preferred_element_type=jnp.float32) + bf_ref[...]
    h = jnp.maximum(z[:, :d], 0.0).astype(cdt)      # (TR, D)   relu(layer-1)
    cls_wide = z[:, d:]                             # (TR, Nout) f32, logits at [4:4+C)

    # bbox MLP layers 2 and 3 (layer 3 lane-padded: real w3 in lanes [0:4)).
    h = jnp.maximum(
        jnp.dot(h, w2_ref[...], preferred_element_type=jnp.float32) + b2_ref[...],
        0.0).astype(cdt)
    tmp = jnp.dot(h, w3_ref[...], preferred_element_type=jnp.float32) + b3_ref[...]

    # sigmoid(tmp + inverse_sigmoid(r)) == 1 / (1 + ((1-r)/r) * exp(-tmp)),
    # with the same eps clipping as inverse_sigmoid (no EUP log needed).
    col = jax.lax.broadcasted_iota(jnp.int32, tmp.shape, dimension=1)
    ref = ref_ref[...]
    r_wide = jnp.full(tmp.shape, 0.5, jnp.float32)
    for j in range(4):                 # place the 4 anchor cols into lanes [0:4)
        r_wide = jnp.where(col == j, ref[:, j:j + 1], r_wide)
    r_wide = jnp.clip(r_wide, 0.0, 1.0)
    ratio = jnp.maximum(1.0 - r_wide, eps) * pl.reciprocal(
        jnp.maximum(r_wide, eps), approx=True)
    box_wide = pl.reciprocal(1.0 + ratio * jnp.exp(-tmp), approx=True)

    # Single full-width unmasked store (no masked 4-lane second store).
    out_ref[...] = jnp.where(col < 4, box_wide, cls_wide).astype(out_ref.dtype)


def prepare_dab_detr_head_params(params, *, compute_dtype=jnp.bfloat16):
    """Build kernel-ready fused / lane-padded weights ONCE at parameter-load
    time (hoisted out of the per-call forward path)."""
    f32 = jnp.float32
    d = params["w1"].shape[0]
    c = params["wc"].shape[1]
    n_out = _round_up(c + 4, 128)          # lane-dense output slab width

    # Output slab layout: lanes [0:4) = boxes, lanes [4:4+C) = class logits.
    wc_slab = jnp.zeros((d, n_out), f32).at[:, 4:4 + c].set(params["wc"].astype(f32))
    bc_slab = jnp.zeros((1, n_out), f32).at[:, 4:4 + c].set(
        params["bc"].reshape(1, c).astype(f32))
    wf = jnp.concatenate([params["w1"].astype(f32), wc_slab], axis=1)
    bf = jnp.concatenate([params["b1"].reshape(1, d).astype(f32), bc_slab], axis=1)

    w3_slab = jnp.zeros((d, n_out), f32).at[:, 0:4].set(params["w3"].astype(f32))
    b3_slab = jnp.zeros((1, n_out), f32).at[:, 0:4].set(
        params["b3"].reshape(1, 4).astype(f32))

    return {
        "wf": wf.astype(compute_dtype), "bf": bf,
        "w2": params["w2"].astype(compute_dtype),
        "b2": params["b2"].reshape(1, d).astype(f32),
        "w3": w3_slab.astype(compute_dtype), "b3": b3_slab,
        "embed_dims": d, "num_classes": c, "n_out": n_out,
    }


def dab_detr_head_forward(hs, reference, prep, *, max_tile_rows=1024):
    """Pallas implementation of DABDETRHead.forward (post-transformer part).

    hs        : [L, B, Q, D] float32 decoder outputs
    reference : [L, B, Q, 4] float32 sigmoid-space anchors
    prep      : dict from prepare_dab_detr_head_params
    returns dict with 'pred_logits', 'pred_boxes', 'aux_outputs'
    """
    L, B, Q, D = hs.shape
    assert D == prep["embed_dims"]
    C, n_out = prep["num_classes"], prep["n_out"]
    R = L * B * Q

    tile_rows, n_tiles = _choose_tiling(R, max_tile_rows)
    r_pad = tile_rows * n_tiles

    hs_flat = hs.reshape(R, D)                       # contiguous -> free reshape
    ref_flat = reference.reshape(R, 4).astype(jnp.float32)
    if r_pad != R:                                   # rare: tiling minimises padding
        hs_flat = jnp.pad(hs_flat, ((0, r_pad - R), (0, 0)))
        ref_flat = jnp.pad(ref_flat, ((0, r_pad - R), (0, 0)), constant_values=0.5)

    row_spec = lambda w: pl.BlockSpec((tile_rows, w), lambda i: (i, 0))
    full_spec = lambda a: pl.BlockSpec(a.shape, lambda i: (0,) * a.ndim)

    out_flat = pl.pallas_call(
        functools.partial(_head_kernel, d=D, eps=1e-3),
        out_shape=jax.ShapeDtypeStruct((r_pad, n_out), jnp.float32),
        grid=(n_tiles,),
        in_specs=[
            row_spec(D),          # hs (f32 in HBM, cast to bf16 in-kernel)
            row_spec(4),          # reference anchors
            full_spec(prep["wf"]), full_spec(prep["bf"]),
            full_spec(prep["w2"]), full_spec(prep["b2"]),
            full_spec(prep["w3"]), full_spec(prep["b3"]),
        ],
        out_specs=row_spec(n_out),
        compiler_params=pltpu.CompilerParams(
            dimension_semantics=("parallel",)),
    )(hs_flat, ref_flat, prep["wf"], prep["bf"],
      prep["w2"], prep["b2"], prep["w3"], prep["b3"])

    out_flat = out_flat[:R]
    outputs_coord = out_flat[:, 0:4].reshape(L, B, Q, 4)
    outputs_class = out_flat[:, 4:4 + C].reshape(L, B, Q, C)

    return {
        "pred_logits": outputs_class[-1],
        "pred_boxes": outputs_coord[-1],
        "aux_outputs": [
            {"pred_logits": a, "pred_boxes": b}
            for a, b in zip(outputs_class[:-1], outputs_coord[:-1])
        ],
    }


def _reference_forward(hs, reference, params, compute_dtype=jnp.bfloat16):
    """Pure-JAX reference with the same precision scheme as the kernel
    (bf16 MXU operands, f32 accumulation and biases, exact sigmoid/log)."""
    f32 = jnp.float32
    cdt = compute_dtype
    x = hs.astype(cdt)
    cls = jnp.dot(x, params["wc"].astype(cdt),
                  preferred_element_type=f32) + params["bc"]
    h = jnp.maximum(jnp.dot(x, params["w1"].astype(cdt),
                            preferred_element_type=f32) + params["b1"], 0.0)
    h = h.astype(cdt)
    h = jnp.maximum(jnp.dot(h, params["w2"].astype(cdt),
                            preferred_element_type=f32) + params["b2"], 0.0)
    h = h.astype(cdt)
    tmp = jnp.dot(h, params["w3"].astype(cdt),
                  preferred_element_type=f32) + params["b3"]
    box = jax.nn.sigmoid(tmp + _inverse_sigmoid(reference.astype(f32)))
    return cls, box


def _init_params(key, embed_dims, num_classes):
    """Deterministic synthetic parameter init (nn.Linear weights stored
    transposed so the kernel computes x @ W)."""
    ks = jax.random.split(key, 6)
    d = embed_dims

    def lin(k, fan_in, fan_out):
        return (jax.random.normal(k, (fan_in, fan_out), jnp.float32)
                / math.sqrt(fan_in))

    prior_prob = 0.01
    bias_value = -math.log((1.0 - prior_prob) / prior_prob)  # init_weights()

    return {
        "wc": lin(ks[0], d, num_classes),
        "bc": jnp.full((1, num_classes), bias_value, jnp.float32),
        "w1": lin(ks[1], d, d),
        "b1": jax.random.normal(ks[2], (1, d), jnp.float32) * 0.02,
        "w2": lin(ks[3], d, d),
        "b2": jax.random.normal(ks[4], (1, d), jnp.float32) * 0.02,
        # last MLP layer given a small nonzero init so the kernel's matmul path
        # is actually exercised (init_weights() would zero it).
        "w3": lin(ks[5], d, 4) * 0.1,
        "b3": jnp.zeros((1, 4), jnp.float32),
    }


if __name__ == "__main__":
    # DAB-DETR-like (small) shapes: 6 decoder layers, batch 2, 64 queries,
    # embed_dims 128, 16 classes, query_dim 4.  R = 768 rows -> 2 tiles of 384
    # rows (even tile count -> both v7x TensorCores busy, zero row padding).
    L, B, Q, D, C = 6, 2, 64, 128, 16

    key = jax.random.PRNGKey(0)
    k_hs, k_ref, k_par = jax.random.split(key, 3)

    hs = jax.random.normal(k_hs, (L, B, Q, D), jnp.float32)
    reference = jax.nn.sigmoid(jax.random.normal(k_ref, (L, B, Q, 4), jnp.float32))
    params = _init_params(k_par, D, C)

    prep = prepare_dab_detr_head_params(params)      # hoisted, done once
    out = dab_detr_head_forward(hs, reference, prep)
    jax.block_until_ready(out)

    # sanity check against the pure-JAX reference (same bf16/f32 scheme)
    cls_ref, box_ref = _reference_forward(hs, reference, params)
    assert out["pred_logits"].shape == (B, Q, C)
    assert out["pred_boxes"].shape == (B, Q, 4)
    assert jnp.allclose(out["pred_logits"], cls_ref[-1], atol=1e-2, rtol=1e-2)
    assert jnp.allclose(out["pred_boxes"], box_ref[-1], atol=1e-2, rtol=1e-2)
    assert len(out["aux_outputs"]) == L - 1
    assert jnp.allclose(out["aux_outputs"][0]["pred_logits"], cls_ref[0],
                        atol=1e-2, rtol=1e-2)
    assert jnp.allclose(out["aux_outputs"][0]["pred_boxes"], box_ref[0],
                        atol=1e-2, rtol=1e-2)

    print("KERNEL_OK")
</pallas_src>

<mosaic_0001>
module attributes {stable_mosaic.version = 11 : i64} {
  func.func @_head_kernel(%arg0: i32, %arg1: memref<384x128xf32, #tpu.memory_space<vmem>>, %arg2: memref<384x4xf32, #tpu.memory_space<vmem>>, %arg3: memref<128x256xbf16, #tpu.memory_space<vmem>>, %arg4: memref<1x256xf32, #tpu.memory_space<vmem>>, %arg5: memref<128x128xbf16, #tpu.memory_space<vmem>>, %arg6: memref<1x128xf32, #tpu.memory_space<vmem>>, %arg7: memref<128x128xbf16, #tpu.memory_space<vmem>>, %arg8: memref<1x128xf32, #tpu.memory_space<vmem>>, %arg9: memref<384x128xf32, #tpu.memory_space<vmem>>) attributes {dimension_semantics = [#tpu.dimension_semantics<parallel>], iteration_bounds = array<i64: 2>, scalar_prefetch = 0 : i64, scratch_operands = 0 : i64, tpu.core_type = #tpu.core_type<tc>, window_params = [{transform_indices = @transform_0, window_bounds = array<i64: 384, 128>}, {transform_indices = @transform_1, window_bounds = array<i64: 384, 4>}, {pipeline_mode = #tpu.pipeline_mode<synchronous>, transform_indices = @transform_2, window_bounds = array<i64: 128, 256>}, {pipeline_mode = #tpu.pipeline_mode<synchronous>, transform_indices = @transform_3, window_bounds = array<i64: 1, 256>}, {pipeline_mode = #tpu.pipeline_mode<synchronous>, transform_indices = @transform_4, window_bounds = array<i64: 128, 128>}, {pipeline_mode = #tpu.pipeline_mode<synchronous>, transform_indices = @transform_5, window_bounds = array<i64: 1, 128>}, {pipeline_mode = #tpu.pipeline_mode<synchronous>, transform_indices = @transform_6, window_bounds = array<i64: 128, 128>}, {pipeline_mode = #tpu.pipeline_mode<synchronous>, transform_indices = @transform_7, window_bounds = array<i64: 1, 128>}, {transform_indices = @transform_8, window_bounds = array<i64: 384, 128>}]} {
    %c0 = arith.constant 0 : index
    %c0_0 = arith.constant 0 : index
    %0 = vector.load %arg1[%c0, %c0_0] : memref<384x128xf32, #tpu.memory_space<vmem>>, vector<384x128xf32>
    %1 = arith.truncf %0 : vector<384x128xf32> to vector<384x128xbf16>
    %c0_1 = arith.constant 0 : index
    %c0_2 = arith.constant 0 : index
    %2 = vector.load %arg3[%c0_1, %c0_2] : memref<128x256xbf16, #tpu.memory_space<vmem>>, vector<128x256xbf16>
    %cst = arith.constant dense<0.000000e+00> : vector<384x256xf32>
    %3 = tpu.matmul %1, %2, %cst {dimension_numbers = #tpu.dot_dimension_numbers<[1], [0], [0], [1], [0, 0, 1, 1], [], []>} : vector<384x128xbf16>, vector<128x256xbf16>, vector<384x256xf32> -> vector<384x256xf32>
    %c0_3 = arith.constant 0 : index
    %c0_4 = arith.constant 0 : index
    %4 = vector.load %arg4[%c0_3, %c0_4] : memref<1x256xf32, #tpu.memory_space<vmem>>, vector<1x256xf32>
    %5 = vector.broadcast %4 : vector<1x256xf32> to vector<384x256xf32>
    %6 = arith.addf %3, %5 : vector<384x256xf32>
    %7 = vector.extract_strided_slice %6 {offsets = [0, 0], sizes = [384, 128], strides = [1, 1]} : vector<384x256xf32> to vector<384x128xf32>
    %cst_5 = arith.constant 0.000000e+00 : f32
    %8 = vector.broadcast %cst_5 : f32 to vector<384x128xf32>
    %9 = arith.maximumf %7, %8 : vector<384x128xf32>
    %10 = arith.truncf %9 : vector<384x128xf32> to vector<384x128xbf16>
    %11 = vector.extract_strided_slice %6 {offsets = [0, 128], sizes = [384, 128], strides = [1, 1]} : vector<384x256xf32> to vector<384x128xf32>
    %c0_6 = arith.constant 0 : index
    %c0_7 = arith.constant 0 : index
    %12 = vector.load %arg5[%c0_6, %c0_7] : memref<128x128xbf16, #tpu.memory_space<vmem>>, vector<128x128xbf16>
    %cst_8 = arith.constant dense<0.000000e+00> : vector<384x128xf32>
    %13 = tpu.matmul %10, %12, %cst_8 {dimension_numbers = #tpu.dot_dimension_numbers<[1], [0], [0], [1], [0, 0, 1, 1], [], []>} : vector<384x128xbf16>, vector<128x128xbf16>, vector<384x128xf32> -> vector<384x128xf32>
    %c0_9 = arith.constant 0 : index
    %c0_10 = arith.constant 0 : index
    %14 = vector.load %arg6[%c0_9, %c0_10] : memref<1x128xf32, #tpu.memory_space<vmem>>, vector<1x128xf32>
    %15 = vector.broadcast %14 : vector<1x128xf32> to vector<384x128xf32>
    %16 = arith.addf %13, %15 : vector<384x128xf32>
    %cst_11 = arith.constant 0.000000e+00 : f32
    %17 = vector.broadcast %cst_11 : f32 to vector<384x128xf32>
    %18 = arith.maximumf %16, %17 : vector<384x128xf32>
    %19 = arith.truncf %18 : vector<384x128xf32> to vector<384x128xbf16>
    %c0_12 = arith.constant 0 : index
    %c0_13 = arith.constant 0 : index
    %20 = vector.load %arg7[%c0_12, %c0_13] : memref<128x128xbf16, #tpu.memory_space<vmem>>, vector<128x128xbf16>
    %cst_14 = arith.constant dense<0.000000e+00> : vector<384x128xf32>
    %21 = tpu.matmul %19, %20, %cst_14 {dimension_numbers = #tpu.dot_dimension_numbers<[1], [0], [0], [1], [0, 0, 1, 1], [], []>} : vector<384x128xbf16>, vector<128x128xbf16>, vector<384x128xf32> -> vector<384x128xf32>
    %c0_15 = arith.constant 0 : index
    %c0_16 = arith.constant 0 : index
    %22 = vector.load %arg8[%c0_15, %c0_16] : memref<1x128xf32, #tpu.memory_space<vmem>>, vector<1x128xf32>
    %23 = vector.broadcast %22 : vector<1x128xf32> to vector<384x128xf32>
    %24 = arith.addf %21, %23 : vector<384x128xf32>
    %25 = tpu.iota {dimensions = array<i32: 1>} : vector<384x128xi32>
    %c0_17 = arith.constant 0 : index
    %c0_18 = arith.constant 0 : index
    %26 = vector.load %arg2[%c0_17, %c0_18] : memref<384x4xf32, #tpu.memory_space<vmem>>, vector<384x4xf32>
    %cst_19 = arith.constant 5.000000e-01 : f32
    %27 = vector.broadcast %cst_19 : f32 to vector<384x128xf32>
    %c0_i32 = arith.constant 0 : i32
    %28 = vector.broadcast %c0_i32 : i32 to vector<384x128xi32>
    %29 = arith.cmpi eq, %25, %28 : vector<384x128xi32>
    %30 = vector.extract_strided_slice %26 {offsets = [0, 0], sizes = [384, 1], strides = [1, 1]} : vector<384x4xf32> to vector<384x1xf32>
    %31 = vector.shape_cast %30 : vector<384x1xf32> to vector<384x1xf32>
    %32 = vector.broadcast %31 : vector<384x1xf32> to vector<384x128xf32>
    %33 = arith.select %29, %32, %27 : vector<384x128xi1>, vector<384x128xf32>
    %c1_i32 = arith.constant 1 : i32
    %34 = vector.broadcast %c1_i32 : i32 to vector<384x128xi32>
    %35 = arith.cmpi eq, %25, %34 : vector<384x128xi32>
    %36 = vector.extract_strided_slice %26 {offsets = [0, 1], sizes = [384, 1], strides = [1, 1]} : vector<384x4xf32> to vector<384x1xf32>
    %37 = vector.shape_cast %36 : vector<384x1xf32> to vector<384x1xf32>
    %38 = vector.broadcast %37 : vector<384x1xf32> to vector<384x128xf32>
    %39 = arith.select %35, %38, %33 : vector<384x128xi1>, vector<384x128xf32>
    %c2_i32 = arith.constant 2 : i32
    %40 = vector.broadcast %c2_i32 : i32 to vector<384x128xi32>
    %41 = arith.cmpi eq, %25, %40 : vector<384x128xi32>
    %42 = vector.extract_strided_slice %26 {offsets = [0, 2], sizes = [384, 1], strides = [1, 1]} : vector<384x4xf32> to vector<384x1xf32>
    %43 = vector.shape_cast %42 : vector<384x1xf32> to vector<384x1xf32>
    %44 = vector.broadcast %43 : vector<384x1xf32> to vector<384x128xf32>
    %45 = arith.select %41, %44, %39 : vector<384x128xi1>, vector<384x128xf32>
    %c3_i32 = arith.constant 3 : i32
    %46 = vector.broadcast %c3_i32 : i32 to vector<384x128xi32>
    %47 = arith.cmpi eq, %25, %46 : vector<384x128xi32>
    %48 = vector.extract_strided_slice %26 {offsets = [0, 3], sizes = [384, 1], strides = [1, 1]} : vector<384x4xf32> to vector<384x1xf32>
    %49 = vector.shape_cast %48 : vector<384x1xf32> to vector<384x1xf32>
    %50 = vector.broadcast %49 : vector<384x1xf32> to vector<384x128xf32>
    %51 = arith.select %47, %50, %45 : vector<384x128xi1>, vector<384x128xf32>
    %cst_20 = arith.constant 0.000000e+00 : f32
    %cst_21 = arith.constant 1.000000e+00 : f32
    %52 = vector.broadcast %cst_20 : f32 to vector<384x128xf32>
    %53 = arith.maximumf %52, %51 : vector<384x128xf32>
    %54 = vector.broadcast %cst_21 : f32 to vector<384x128xf32>
    %55 = arith.minimumf %54, %53 : vector<384x128xf32>
    %cst_22 = arith.constant 1.000000e+00 : f32
    %56 = vector.broadcast %cst_22 : f32 to vector<384x128xf32>
    %57 = arith.subf %56, %55 : vector<384x128xf32>
    %cst_23 = arith.constant 1.000000e-03 : f32
    %58 = vector.broadcast %cst_23 : f32 to vector<384x128xf32>
    %59 = arith.maximumf %57, %58 : vector<384x128xf32>
    %cst_24 = arith.constant 1.000000e-03 : f32
    %60 = vector.broadcast %cst_24 : f32 to vector<384x128xf32>
    %61 = arith.maximumf %55, %60 : vector<384x128xf32>
    %62 = tpu.reciprocal %61 {approx = true} : vector<384x128xf32> -> vector<384x128xf32>
    %63 = arith.mulf %59, %62 : vector<384x128xf32>
    %cst_25 = arith.constant 0.000000e+00 : f32
    %64 = vector.broadcast %cst_25 : f32 to vector<384x128xf32>
    %65 = arith.subf %64, %24 : vector<384x128xf32>
    %66 = math.exp %65 : vector<384x128xf32>
    %67 = arith.mulf %63, %66 : vector<384x128xf32>
    %cst_26 = arith.constant 1.000000e+00 : f32
    %68 = vector.broadcast %cst_26 : f32 to vector<384x128xf32>
    %69 = arith.addf %68, %67 : vector<384x128xf32>
    %70 = tpu.reciprocal %69 {approx = true} : vector<384x128xf32> -> vector<384x128xf32>
    %c4_i32 = arith.constant 4 : i32
    %71 = vector.broadcast %c4_i32 : i32 to vector<384x128xi32>
    %72 = arith.cmpi slt, %25, %71 : vector<384x128xi32>
    %73 = arith.select %72, %70, %11 : vector<384x128xi1>, vector<384x128xf32>
    %c0_27 = arith.constant 0 : index
    %c0_28 = arith.constant 0 : index
    %74 = vector.load %arg9[%c0_27, %c0_28] : memref<384x128xf32, #tpu.memory_space<vmem>>, vector<384x128xf32>
    tpu.vector_store %arg9[%c0_27, %c0_28], %73 {strides = array<i32>} : memref<384x128xf32, #tpu.memory_space<vmem>>, vector<384x128xf32>,
    return
  }
  func.func @transform_0(%arg0: i32) -> (i32, i32) {
    %c0_i32 = arith.constant 0 : i32
    %c0_i32_0 = arith.constant 0 : i32
    return %arg0, %c0_i32 : i32, i32
  }
  func.func @transform_1(%arg0: i32) -> (i32, i32) {
    %c0_i32 = arith.constant 0 : i32
    %c0_i32_0 = arith.constant 0 : i32
    return %arg0, %c0_i32 : i32, i32
  }
  func.func @transform_2(%arg0: i32) -> (i32, i32) {
    %c0_i32 = arith.constant 0 : i32
    %c0_i32_0 = arith.constant 0 : i32
    %c0_i32_1 = arith.constant 0 : i32
    return %c0_i32, %c0_i32_0 : i32, i32
  }
  func.func @transform_3(%arg0: i32) -> (i32, i32) {
    %c0_i32 = arith.constant 0 : i32
    %c0_i32_0 = arith.constant 0 : i32
    %c0_i32_1 = arith.constant 0 : i32
    return %c0_i32, %c0_i32_0 : i32, i32
  }
  func.func @transform_4(%arg0: i32) -> (i32, i32) {
    %c0_i32 = arith.constant 0 : i32
    %c0_i32_0 = arith.constant 0 : i32
    %c0_i32_1 = arith.constant 0 : i32
    return %c0_i32, %c0_i32_0 : i32, i32
  }
  func.func @transform_5(%arg0: i32) -> (i32, i32) {
    %c0_i32 = arith.constant 0 : i32
    %c0_i32_0 = arith.constant 0 : i32
    %c0_i32_1 = arith.constant 0 : i32
    return %c0_i32, %c0_i32_0 : i32, i32
  }
  func.func @transform_6(%arg0: i32) -> (i32, i32) {
    %c0_i32 = arith.constant 0 : i32
    %c0_i32_0 = arith.constant 0 : i32
    %c0_i32_1 = arith.constant 0 : i32
    return %c0_i32, %c0_i32_0 : i32, i32
  }
  func.func @transform_7(%arg0: i32) -> (i32, i32) {
    %c0_i32 = arith.constant 0 : i32
    %c0_i32_0 = arith.constant 0 : i32
    %c0_i32_1 = arith.constant 0 : i32
    return %c0_i32, %c0_i32_0 : i32, i32
  }
  func.func @transform_8(%arg0: i32) -> (i32, i32) {
    %c0_i32 = arith.constant 0 : i32
    %c0_i32_0 = arith.constant 0 : i32
    return %arg0, %c0_i32 : i32, i32
  }
}

</mosaic_0001>

<bundles_post_ra>
// kernel: tpu_custom_call.1
= control target key start
LH: loop header
LB: loop body
LE: loop exit
PB: predicated region body
PF: predicated region fallthrough
CT: control target
= control target key end

     0   :  { %13 = vsyncpa [#allocation3], 0  ;;  %s7087_s0 = inlined_call_operand.vmem [shape: f32[768,128], index: 0, kind: input, shape index: {}]   ;;  %s7088_s1 = inlined_call_operand.vmem [shape: f32[768,4], index: 1, kind: input, shape index: {}]   ;;  %s7089_s2 = inlined_call_operand.hbm [shape: bf16[128,256], index: 2, kind: input, shape index: {}]   ;;  %s7090_s3 = inlined_call_operand.vmem [shape: f32[1,256], index: 3, kind: input, shape index: {}]   ;;  %s7091_s4 = inlined_call_operand.hbm [shape: bf16[128,128], index: 4, kind: input, shape index: {}]   ;;  %s7092_s5 = inlined_call_operand.vmem [shape: f32[1,128], index: 5, kind: input, shape index: {}]   ;;  %s7093_s6 = inlined_call_operand.hbm [shape: bf16[128,128], index: 6, kind: input, shape index: {}]   ;;  %s7094_s7 = inlined_call_operand.vmem [shape: f32[1,128], index: 7, kind: input, shape index: {}]   ;;  %s7095_s8 = inlined_call_operand.hbm [shape: f32[768,128], index: 8, kind: output, shape index: {}]  }
   0x1   :  { %14 = vsyncpa [#allocation6], 0 }
   0x2   :  { %15 = vsyncpa [#allocation4], 0 }
   0x3   :  { %17 = vsyncpa [#allocation4 + $0x1], 0  ;;  %s4380_s27 = smov 0   ;;  %s4382_s28 = smov 0  }
   0x4   :  { %s4384_s29 = smov 0   ;;  %s4386_s30 = smov 0  }
   0x5 LB: > { %s4401_s9 = sadd.s32 4294967295, %s4319_s30   ;;  %s3465_s10 = sadd.s32 4294967294, %s4319_s30   ;;  %s4319_s30 = sphi %s4386_s30, %s7517_s30   ;;  %s4315_s29 = sphi %s4384_s29, %s7516_s29   ;;  %s4311_s28 = sphi %s4382_s28, %s7515_s28   ;;  %s4307_s27 = sphi %s4380_s27, %s7514_s27  }
   0x6   : > { %s4405_s11 = sadd.s32 1, %s4319_s30   ;;  %s208_s12 = sadd.s32 1, %s4315_s29 }
   0x7   : > { %s205_s13 = ssub.s32 %s4319_s30, %s4405_s11  ;;  %p218_p0 = scmp.ne.s32.totalorder %s4315_s29, %s4311_s28 }
   0x8   : > { %p206_p1 = scmp.eq.s32.totalorder %s205_s13, 0  ;;  %p219_p2 = scmp.eq.s32.totalorder %s4401_s9, 1 }
   0x9   : > { %p224_p3 = scmp.ne.s32.totalorder %s4311_s28, %s4307_s27  ;;  %p225_p4 = scmp.eq.s32.totalorder %s3465_s10, 1 }
   0xa   : > { %s4416_s14 = scalar_select %p206_p1, %s4315_s29, %s208_s12  }
   0xb   : > { %p4418_p5 = por %p219_p2, %p218_p0  ;;  %p4422_p6 = por %p225_p4, %p224_p3 }
   0xc   : > { %p3466_p7 = scmp.ge.s32.totalorder %s4319_s30, 1  ;;  %p232_p8 = scmp.lt.s32.totalorder %s4319_s30, 3 }
   0xd   : > { %p3736_p9 = scmp.eq.s32.totalorder %s4401_s9, 0  ;;  %s4321_s18 = smov [#allocation5]  }
   0xe   : > { %p4429_p10 = pnand %p3466_p7, %p232_p8  ;;  %s260_s19 = sshll.u32 %s4321_s18, 4  ;;  %s261_s19 = int_to_ptr.vmem [resolvable:$true] %s260_s19 }
   0xf   : > { %s4322_s21 = smov [#allocation2]   ;;  %s4184_s23 = scalar_lea.vmem %s261_s19, 1024 }
  0x10   : > { %p3722_p11 = pneg %p4429_p10  ;;  %s244_s22 = sshll.u32 %s4322_s21, 4  ;;  %s245_s22 = int_to_ptr.vmem [resolvable:$true] %s244_s22 }
  0x11   : > { %p4185_p0 = scmp.ne.s32.totalorder %s261_s19, %s4184_s23  ;;  %p4192_p3 = scmp.lt.s32.totalorder %s261_s19, %s261_s19 }
  0x12   : > { %p4437_p12 = pnand %p3736_p9, %p3722_p11  ;;  %p4193_p4 = scmp.lt.s32.totalorder %s4184_s23, %s4184_s23 }
  0x14   : > { %p4175_p13 = pneg %p4437_p12  ;;  %p4194_p7 = por %p4193_p4, %p4192_p3 }
  0x16   : > { %p4187_p1 = pnand %p4185_p0, %p4175_p13 }
  0x18   : > { %p4188_p2 = pneg %p4187_p1 }
  0x1a   : > { %p4195_p8 = pnand %p4194_p7, %p4188_p2 }
  0x1c   : > { %4198 = shalt.err (!%p4195_p8)
}
  0x1d   : > { %s4323_s24 = smov 64   ;;  %s4324_s25 = smov 4  }
  0x1e   : > { %3728 = dma.hbm_to_vmem [thread:$0]  (!%p4437_p12), %s7091_s4, 1024, %s261_s19, [#allocation6], %s4323_s24, %s4323_s24, %s4324_s25  }
  0x1f   : > { %s4210_s12 = scalar_lea.vmem %s245_s22, 2048  ;;  %p4218_p2 = scmp.lt.s32.totalorder %s245_s22, %s245_s22 }
  0x20   : > { %p4211_p11 = scmp.ne.s32.totalorder %s245_s22, %s4210_s12  ;;  %p4219_p3 = scmp.lt.s32.totalorder %s4210_s12, %s4210_s12 }
  0x22   : > { %p4213_p0 = pnand %p4211_p11, %p4175_p13  ;;  %p4220_p4 = por %p4219_p3, %p4218_p2 }
  0x24   : > { %p4214_p1 = pneg %p4213_p0 }
  0x26   : > { %p4221_p7 = pnand %p4220_p4, %p4214_p1 }
  0x28   : > { %4224 = shalt.err (!%p4221_p7)
}
  0x29   : > { %s4325_s13 = smov 128   ;;  %s4326_s18 = smov 8  }
  0x2a   : > { %3725 = dma.hbm_to_vmem [thread:$0]  (!%p4437_p12), %s7089_s2, 2048, %s245_s22, [#allocation3], %s4325_s13, %s4325_s13, %s4326_s18  }
  0x2b   : > { %s4327_s19 = smov [#allocation7]  }
  0x2c   : > { %s276_s26 = sshll.u32 %s4327_s19, 4  ;;  %s277_s26 = int_to_ptr.vmem [resolvable:$true] %s276_s26 }
  0x2d   : > { %s4236_s10 = scalar_lea.vmem %s277_s26, 1024  ;;  %p4244_p1 = scmp.lt.s32.totalorder %s277_s26, %s277_s26 }
  0x2e   : > { %p4237_p8 = scmp.ne.s32.totalorder %s277_s26, %s4236_s10  ;;  %p4245_p2 = scmp.lt.s32.totalorder %s4236_s10, %s4236_s10 }
  0x30   : > { %p4239_p11 = pnand %p4237_p8, %p4175_p13  ;;  %p4246_p3 = por %p4245_p2, %p4244_p1 }
  0x32   : > { %p4240_p0 = pneg %p4239_p11 }
  0x34   : > { %p4247_p4 = pnand %p4246_p3, %p4240_p0 }
  0x36   : > { %4250 = shalt.err (!%p4247_p4)
}
  0x37   : > { %3731 = dma.hbm_to_vmem [thread:$0]  (!%p4437_p12), %s7093_s6, 1024, %s277_s26, [#allocation6], %s4323_s24, %s4323_s24, %s4324_s25  }
  0x38   : > { %313 = sbr.rel (%p4429_p10) target bundleno = 957 (0x3bd), region = 52 }
  0x3d   : > { %4294 = dma.done.wait (%p3736_p9), [#allocation3], 2048  }
  0x3e   : > { %4296 = vsyncadd (%p3736_p9), [#allocation3], 4294965248 }
  0x3f   : > { %4298 = dma.done.wait (%p3736_p9), [#allocation6], 2048  }
  0x40   : > { %4300 = vsyncadd (%p3736_p9), [#allocation6], 4294965248  ;;  %s360_s20 = smul.u32 48, %s4401_s9  ;;  %v7097_v0 = vmov 0   ;;  %v3796_v1 = vld [vmem:[#allocation2 + $0x74] ss:$8 sps:$4 sm:$0xff]  }
  0x41   : > { %3789 = vset.pattern.permute.xlu1 %v7097_v0  ;;  %3788 = vset.pattern.permute.xlu0 %v7097_v0  ;;  %v3798_v4 = vld [vmem:[#allocation2 + $0x70] ss:$8 sps:$4 sm:$0xff]   ;;  %v3799_v7 = vld [vmem:[#allocation2 + $0x64] ss:$8 sps:$4 sm:$0xff]   ;;  %v3801_v8 = vld [vmem:[#allocation2 + $0x60] ss:$8 sps:$4 sm:$0xff]  }
  0x42   : > { %p361_p10 = scmp.lt.s32.totalorder %s360_s20, 95  ;;  %586 = vmatprep.mubr.bf16.mxu0 %v7097_v0  ;;  %554 = vmatprep.subr.bf16.mxu0 %v3796_v1  ;;  %v3802_v9 = vld [vmem:[#allocation2 + $0x54] ss:$8 sps:$4 sm:$0xff]   ;;  %v3804_v12 = vld [vmem:[#allocation2 + $0x50] ss:$8 sps:$4 sm:$0xff]   ;;  %s3514_s21 = smul.u32 6144, %s4401_s9 }
  0x43   : > { %555 = vmatpush1.bf16.msra.mxu0 %v3798_v4  ;;  %v3805_v13 = vld [vmem:[#allocation2 + $0x44] ss:$8 sps:$4 sm:$0xff]   ;;  %v3807_v16 = vld [vmem:[#allocation2 + $0x40] ss:$8 sps:$4 sm:$0xff]   ;;  %v3808_v17 = vld [vmem:[#allocation2 + $0x34] ss:$8 sps:$4 sm:$0xff]  }
  0x44   : > { %s7519_s20 = smov (!%p361_p10, %s360_s20), 95  ;;  %556 = vmatprep.subr.bf16.mxu0 %v3799_v7  ;;  %v3810_v20 = vld [vmem:[#allocation2 + $0x30] ss:$8 sps:$4 sm:$0xff]   ;;  %v3811_v21 = vld [vmem:[#allocation2 + $0x24] ss:$8 sps:$4 sm:$0xff]   ;;  %s7038_s10 = scalar_lea.hbm %s7095_s8, %s3514_s21 }
  0x45   : > { %s3475_s17 = sshll.u32 %s7519_s20, 3  ;;  %v3813_v24 = vld [vmem:[#allocation2 + $0x20] ss:$8 sps:$4 sm:$0xff]   ;;  %v3814_v25 = vld [vmem:[#allocation2 + $0x14] ss:$8 sps:$4 sm:$0xff]   ;;  %s4332_s12 = smov [#allocation8]  }
  0x46   : > { %s4495_s13 = scalar_lea.vmem %s7088_s1, %s3475_s17  ;;  %v3816_v28 = vld [vmem:[#allocation2 + $0x10] ss:$8 sps:$4 sm:$0xff]   ;;  %v3817_v29 = vld [vmem:[#allocation2 + $0x4] ss:$8 sps:$4 sm:$0xff]   ;;  %s4556_s23 = scalar_lea.vmem %s7087_s0, %s3475_s17  ;;  %v3819_v32 = vld [vmem:[#allocation2] ss:$8 sps:$4 sm:$0xff]  }
  0x47   : > { %v4498_v2 = vld [vmem:[%s4495_s13 + $0x10] sm:$0xff]  ;;  %v4501_v3 = vld [vmem:[%s4495_s13] sm:$0xff]  ;;  %v4506_v5 = vld [vmem:[%s4495_s13 + $0x18] sm:$0xff]  ;;  %557 = vmatpush1.bf16.msra.mxu0 %v3801_v8  ;;  %s357_s17 = sand.u32 1, %s4311_s28   ;;  %s4255_s20 = sshll.u32 %s4332_s12, 4  ;;  %s4256_s20 = int_to_ptr.vmem [resolvable:$false] %s4255_s20 }
  0x48   : > { %1626 = vperm.xlu1 %3789, %v4498_v2   ;;  %1616 = vperm.xlu0 %3788, %v4501_v3   ;;  %v4509_v6 = vld [vmem:[%s4495_s13 + $0x8] sm:$0xff]  ;;  %v4517_v11 = vld [vmem:[%s4495_s13 + $0x20] sm:$0xff]  ;;  %v4522_v14 = vld [vmem:[%s4495_s13 + $0x38] sm:$0xff]  ;;  %s6409_s24 = smul.u32 384, %s357_s17  ;;  %s7047_s9 = scalar_lea.sflag [#allocation4], %s357_s17 }
  0x49   : > { %v4514_v10 = vld [vmem:[%s4495_s13 + $0x28] sm:$0xff]  ;;  %558 = vmatprep.subr.bf16.mxu0 %v3802_v9  ;;  %v4525_v15 = vld [vmem:[%s4495_s13 + $0x30] sm:$0xff]  ;;  %v4533_v19 = vld [vmem:[%s4495_s13 + $0x40] sm:$0xff] }
  0x4a   : > { %v4530_v18 = vld [vmem:[%s4495_s13 + $0x48] sm:$0xff]  ;;  %v4538_v22 = vld [vmem:[%s4495_s13 + $0x58] sm:$0xff]  ;;  %v4541_v23 = vld [vmem:[%s4495_s13 + $0x50] sm:$0xff]  ;;  %s6444_s25 = scalar_lea.vmem [#allocation8], %s6409_s24  ;;  %s4257_s24 = scalar_lea.vmem %s4256_s20, 12288 }
  0x4b   : > { %559 = vmatpush1.bf16.msra.mxu0 %v3804_v12  ;;  %v4546_v26 = vld [vmem:[%s4495_s13 + $0x68] sm:$0xff]  ;;  %v4549_v27 = vld [vmem:[%s4495_s13 + $0x60] sm:$0xff]  ;;  %v4561_v30 = vld [vmem:[%s4495_s13 + $0x78] sm:$0xff] }
  0x4c   : > { %1631 = vperm.xlu1 %3789, %v4506_v5   ;;  %1621 = vperm.xlu0 %3788, %v4509_v6   ;;  %v4564_v31 = vld [vmem:[%s4495_s13 + $0x70] sm:$0xff]  ;;  %v374_v33 = vld [vmem:[%s4556_s23] sm:$0xff]  ;;  %v375_v34 = vld [vmem:[%s4556_s23 + $0x8] sm:$0xff] }
  0x4d   : > { %560 = vmatprep.subr.bf16.mxu0 %v3805_v13  ;;  %v4571_v35 = vld [vmem:[%s4495_s13 + $0x88] sm:$0xff]  ;;  %v4574_v36 = vld [vmem:[%s4495_s13 + $0x80] sm:$0xff]  ;;  %v422_v37 = vpack.c.bf16 %v375_v34, %v374_v33  ;;  %v4579_v38 = vld [vmem:[%s4495_s13 + $0x98] sm:$0xff] }
  0x4e   : > { %v4582_v39 = vld [vmem:[%s4495_s13 + $0x90] sm:$0xff]  ;;  %v377_v41 = vld [vmem:[%s4556_s23 + $0x18] sm:$0xff]  ;;  %v4588_v42 = vld [vmem:[%s4495_s13 + $0xa8] sm:$0xff] }
  0x4f   : > { %561 = vmatpush1.bf16.msra.mxu0 %v3807_v16  ;;  %v376_v40 = vld [vmem:[%s4556_s23 + $0x10] sm:$0xff]  ;;  %v4591_v43 = vld [vmem:[%s4495_s13 + $0xa0] sm:$0xff]  ;;  %v4596_v45 = vld [vmem:[%s4495_s13 + $0xb8] sm:$0xff] }
  0x50   : > { %1641 = vperm.xlu1 %3789, %v4514_v10   ;;  %1636 = vperm.xlu0 %3788, %v4517_v11   ;;  %v423_v44 = vpack.c.bf16 %v377_v41, %v376_v40  ;;  %v4599_v46 = vld [vmem:[%s4495_s13 + $0xb0] sm:$0xff]  ;;  %v378_v47 = vld [vmem:[%s4556_s23 + $0x20] sm:$0xff]  ;;  %v379_v48 = vld [vmem:[%s4556_s23 + $0x28] sm:$0xff] }
  0x51   : > { %562 = vmatprep.subr.bf16.mxu0 %v3808_v17  ;;  %v4607_v49 = vld [vmem:[%s4495_s13 + $0xc8] sm:$0xff]  ;;  %v4610_v50 = vld [vmem:[%s4495_s13 + $0xc0] sm:$0xff]  ;;  %v424_v51 = vpack.c.bf16 %v379_v48, %v378_v47  ;;  %v4617_v52 = vld [vmem:[%s4495_s13 + $0xd8] sm:$0xff] }
  0x52   : > { %v4620_v53 = vld [vmem:[%s4495_s13 + $0xd0] sm:$0xff]  ;;  %v381_v55 = vld [vmem:[%s4556_s23 + $0x38] sm:$0xff]  ;;  %v4628_v56 = vld [vmem:[%s4495_s13 + $0xe8] sm:$0xff] }
  0x53   : > { %563 = vmatpush1.bf16.msra.mxu0 %v3810_v20  ;;  %v380_v54 = vld [vmem:[%s4556_s23 + $0x30] sm:$0xff]  ;;  %v4631_v57 = vld [vmem:[%s4495_s13 + $0xe0] sm:$0xff]  ;;  %v4636_v59 = vld [vmem:[%s4495_s13 + $0xf8] sm:$0xff] }
  0x54   : > { %1651 = vperm.xlu1 %3789, %v4522_v14   ;;  %1646 = vperm.xlu0 %3788, %v4525_v15   ;;  %v425_v58 = vpack.c.bf16 %v381_v55, %v380_v54  ;;  %v4639_v60 = vld [vmem:[%s4495_s13 + $0xf0] sm:$0xff]  ;;  %v382_v61 = vld [vmem:[%s4556_s23 + $0x40] sm:$0xff]  ;;  %v383_v62 = vld [vmem:[%s4556_s23 + $0x48] sm:$0xff] }
  0x55   : > { %564 = vmatprep.subr.bf16.mxu0 %v3811_v21  ;;  %v4647_v63 = vld [vmem:[%s4495_s13 + $0x108] sm:$0xff]  ;;  %v4650_v1 = vld [vmem:[%s4495_s13 + $0x100] sm:$0xff]  ;;  %v426_v4 = vpack.c.bf16 %v383_v62, %v382_v61  ;;  %v4655_v7 = vld [vmem:[%s4495_s13 + $0x118] sm:$0xff]  ;;  %v7096_v62 = vlaneseq }
  0x56   : > { %v4658_v8 = vld [vmem:[%s4495_s13 + $0x110] sm:$0xff]  ;;  %v385_v12 = vld [vmem:[%s4556_s23 + $0x58] sm:$0xff]  ;;  %v4666_v13 = vld [vmem:[%s4495_s13 + $0x128] sm:$0xff] }
  0x57   : > { %565 = vmatpush1.bf16.msra.mxu0 %v3813_v24  ;;  %v384_v9 = vld [vmem:[%s4556_s23 + $0x50] sm:$0xff]  ;;  %v4669_v16 = vld [vmem:[%s4495_s13 + $0x120] sm:$0xff]  ;;  %v4674_v20 = vld [vmem:[%s4495_s13 + $0x138] sm:$0xff] }
  0x58   : > { %1661 = vperm.xlu1 %3789, %v4530_v18   ;;  %1656 = vperm.xlu0 %3788, %v4533_v19   ;;  %v427_v17 = vpack.c.bf16 %v385_v12, %v384_v9  ;;  %v4677_v21 = vld [vmem:[%s4495_s13 + $0x130] sm:$0xff]  ;;  %v386_v24 = vld [vmem:[%s4556_s23 + $0x60] sm:$0xff]  ;;  %v4693_v33 = vld [vmem:[%s4495_s13 + $0x158] sm:$0xff] }
  0x59   : > { %566 = vmatprep.subr.bf16.mxu0 %v3814_v25  ;;  %v387_v25 = vld [vmem:[%s4556_s23 + $0x68] sm:$0xff]  ;;  %v4696_v34 = vld [vmem:[%s4495_s13 + $0x150] sm:$0xff]  ;;  %v389_v40 = vld [vmem:[%s4556_s23 + $0x78] sm:$0xff] }
  0x5a   : > { %v3820_v41 = vld [vmem:[#allocation5 + $0x38] sm:$0xff]   ;;  %v4707_v47 = vld [vmem:[%s4495_s13 + $0x160] sm:$0xff]  ;;  %v4715_v55 = vld [vmem:[%s4495_s13 + $0x170] sm:$0xff] }
  0x5b   : > { %567 = vmatpush1.bf16.msra.mxu0 %v3816_v28  ;;  %v4685_v28 = vld [vmem:[%s4495_s13 + $0x148] sm:$0xff]  ;;  %3579 = vmatprep.subr.bf16.mxu1 %v3820_v41  ;;  %v4712_v54 = vld [vmem:[%s4495_s13 + $0x178] sm:$0xff]  ;;  %v3823_v12 = vld [vmem:[#allocation5 + $0x20] sm:$0xff]  }
  0x5c   : > { %1671 = vperm.xlu1 %3789, %v4538_v22   ;;  %1666 = vperm.xlu0 %3788, %v4541_v23   ;;  %v391_v61 = vld [vmem:[%s4556_s23 + $0x88] sm:$0xff] }
  0x5d   : > { %568 = vmatprep.subr.bf16.mxu0 %v3817_v29  ;;  %v4688_v29 = vld [vmem:[%s4495_s13 + $0x140] sm:$0xff]  ;;  %3580 = vmatpush3.bf16.msra.mxu1 %v3820_v41 }
  0x5f   : > { %569 = vmatpush1.bf16.msra.mxu0 %v3819_v32  ;;  %v428_v32 = vpack.c.bf16 %v387_v25, %v386_v24  ;;  %v4329_v24 = vmov 1  }
  0x60   : > { %1681 = vperm.xlu1 %3789, %v4546_v26   ;;  %1676 = vperm.xlu0 %3788, %v4549_v27  }
  0x62   : > { %587 = vmatmul.mubr.bf16.vlgmr.msra.gmra.mxu0 %v422_v37  ;;  %v388_v37 = vld [vmem:[%s4556_s23 + $0x70] sm:$0xff] }
  0x63   : > { %596 = vmatprep.mubr.bf16.mxu0 %v7097_v0  ;;  %v429_v48 = vpack.c.bf16 %v389_v40, %v388_v37  ;;  %v392_v37 = vld [vmem:[%s4556_s23 + $0x90] sm:$0xff]  ;;  %v393_v40 = vld [vmem:[%s4556_s23 + $0x98] sm:$0xff] }
  0x64   : > { %1691 = vperm.xlu1 %3789, %v4561_v30   ;;  %1686 = vperm.xlu0 %3788, %v4564_v31  }
  0x68   : > { %1701 = vperm.xlu1 %3789, %v4571_v35   ;;  %1696 = vperm.xlu0 %3788, %v4574_v36  }
  0x6a   : > { %597 = vmatmul.mubr.bf16.gmra.mxu0 %v423_v44  ;;  %v4704_v44 = vld [vmem:[%s4495_s13 + $0x168] sm:$0xff] }
  0x6b   : > { %606 = vmatprep.mubr.bf16.mxu0 %v7097_v0 }
  0x6c   : > { %1711 = vperm.xlu1 %3789, %v4579_v38   ;;  %1706 = vperm.xlu0 %3788, %v4582_v39  }
  0x70   : > { %1721 = vperm.xlu1 %3789, %v4588_v42   ;;  %1716 = vperm.xlu0 %3788, %v4591_v43  }
  0x72   : > { %607 = vmatmul.mubr.bf16.gmra.mxu0 %v424_v51  ;;  %v3821_v51 = vld [vmem:[#allocation5 + $0x30] sm:$0xff]  }
  0x73   : > { %616 = vmatprep.mubr.bf16.mxu0 %v7097_v0  ;;  %3581 = vmatprep.subr.bf16.mxu1 %v3821_v51 }
  0x74   : > { %1731 = vperm.xlu1 %3789, %v4596_v45   ;;  %1726 = vperm.xlu0 %3788, %v4599_v46  }
  0x75   : > { %3582 = vmatpush3.bf16.msra.mxu1 %v3821_v51  ;;  %v431_v51 = vpack.c.bf16 %v393_v40, %v392_v37  ;;  %v397_v37 = vld [vmem:[%s4556_s23 + $0xb8] sm:$0xff] }
  0x78   : > { %1741 = vperm.xlu1 %3789, %v4607_v49   ;;  %1736 = vperm.xlu0 %3788, %v4610_v50  }
  0x7a   : > { %617 = vmatmul.mubr.bf16.gmra.mxu0 %v425_v58  ;;  %v390_v58 = vld [vmem:[%s4556_s23 + $0x80] sm:$0xff] }
  0x7b   : > { %626 = vmatprep.mubr.bf16.mxu0 %v7097_v0  ;;  %v430_v9 = vpack.c.bf16 %v391_v61, %v390_v58  ;;  %v3825_v58 = vld [vmem:[#allocation5 + $0x10] sm:$0xff]   ;;  %v394_v61 = vld [vmem:[%s4556_s23 + $0xa0] sm:$0xff] }
  0x7c   : > { %1751 = vperm.xlu1 %3789, %v4617_v52   ;;  %1746 = vperm.xlu0 %3788, %v4620_v53  }
  0x80   : > { %1761 = vperm.xlu1 %3789, %v4628_v56   ;;  %1756 = vperm.xlu0 %3788, %v4631_v57  }
  0x82   : > { %627 = vmatmul.mubr.bf16.gmra.mxu0 %v426_v4  ;;  %v3822_v4 = vld [vmem:[#allocation5 + $0x28] sm:$0xff]  }
  0x83   : > { %636 = vmatprep.mubr.bf16.mxu0 %v7097_v0  ;;  %3583 = vmatprep.subr.bf16.mxu1 %v3822_v4 }
  0x84   : > { %1771 = vperm.xlu1 %3789, %v4636_v59   ;;  %1766 = vperm.xlu0 %3788, %v4639_v60  }
  0x85   : > { %3584 = vmatpush3.bf16.msra.mxu1 %v3822_v4  ;;  %v395_v4 = vld [vmem:[%s4556_s23 + $0xa8] sm:$0xff] }
  0x86   : > { %3585 = vmatprep.subr.bf16.mxu1 %v3823_v12 }
  0x88   : > { %1781 = vperm.xlu1 %3789, %v4647_v63   ;;  %1776 = vperm.xlu0 %3788, %v4650_v1  }
  0x89   : > { %3586 = vmatpush3.bf16.msra.mxu1 %v3823_v12  ;;  %v432_v12 = vpack.c.bf16 %v395_v4, %v394_v61  ;;  %v399_v61 = vld [vmem:[%s4556_s23 + $0xc8] sm:$0xff] }
  0x8a   : > { %637 = vmatmul.mubr.bf16.gmra.mxu0 %v427_v17  ;;  %v4723_v17 = vshrl.u32 %v7096_v62, 7 }
  0x8b   : > { %646 = vmatprep.mubr.bf16.mxu0 %v7097_v0 }
  0x8c   : > { %1791 = vperm.xlu1 %3789, %v4655_v7   ;;  %1786 = vperm.xlu0 %3788, %v4658_v8   ;;  %v470_v25 = vsub.s32 1, %v4723_v17 }
  0x90   : > { %1801 = vperm.xlu1 %3789, %v4666_v13   ;;  %1796 = vperm.xlu0 %3788, %v4669_v16  }
  0x92   : > { %647 = vmatmul.mubr.bf16.gmra.mxu0 %v428_v32  ;;  %v4731_v32 = vld [vmem:[%s7090_s3] sm:$0x3] }
  0x93   : > { %656 = vmatprep.mubr.bf16.mxu0 %v7097_v0  ;;  %v4737_v41 = vrot.slane %v4731_v32, %v470_v25  ;;  %v396_v25 = vld [vmem:[%s4556_s23 + $0xb0] sm:$0xff] }
  0x94   : > { %1811 = vperm.xlu1 %3789, %v4674_v20   ;;  %1806 = vperm.xlu0 %3788, %v4677_v21   ;;  %v433_v40 = vpack.c.bf16 %v397_v37, %v396_v25  ;;  %v400_v37 = vld [vmem:[%s4556_s23 + $0xd0] sm:$0xff] }
  0x95   : > { %7105 = vst [vmem:[#allocation12_spill] sm:$0xff] %v4737_v41  ;;  %v7112_v41 = vmov 0  }
  0x98   : > { %1821 = vperm.xlu1 %3789, %v4685_v28   ;;  %1816 = vperm.xlu0 %3788, %v4688_v29  }
  0x9a   : > { %657 = vmatmul.mubr.bf16.gmra.mxu0 %v429_v48  ;;  %v3824_v48 = vld [vmem:[#allocation5 + $0x18] sm:$0xff]  }
  0x9b   : > { %666 = vmatprep.mubr.bf16.mxu0 %v7097_v0  ;;  %3587 = vmatprep.subr.bf16.mxu1 %v3824_v48 }
  0x9c   : > { %1831 = vperm.xlu1 %3789, %v4693_v33   ;;  %1826 = vperm.xlu0 %3788, %v4696_v34  }
  0x9d   : > { %3588 = vmatpush3.bf16.msra.mxu1 %v3824_v48 }
  0x9e   : > { %3589 = vmatprep.subr.bf16.mxu1 %v3825_v58 }
  0xa0   : > { %1841 = vperm.xlu1 %3789, %v4704_v44   ;;  %1836 = vperm.xlu0 %3788, %v4707_v47  }
  0xa1   : > { %3590 = vmatpush3.bf16.msra.mxu1 %v3825_v58  ;;  %v398_v58 = vld [vmem:[%s4556_s23 + $0xc0] sm:$0xff] }
  0xa2   : > { %667 = vmatmul.mubr.bf16.gmra.mxu0 %v430_v9  ;;  %v3826_v9 = vld [vmem:[#allocation5 + $0x8] sm:$0xff]   ;;  %v434_v4 = vpack.c.bf16 %v399_v61, %v398_v58 }
  0xa3   : > { %676 = vmatprep.mubr.bf16.mxu0 %v7097_v0  ;;  %3591 = vmatprep.subr.bf16.mxu1 %v3826_v9 }
  0xa4   : > { %1851 = vperm.xlu1 %3789, %v4712_v54   ;;  %1846 = vperm.xlu0 %3788, %v4715_v55  }
  0xa5   : > { %3592 = vmatpush3.bf16.msra.mxu1 %v3826_v9 }
  0xa8   : > { %3791 = vset.pattern.permute.xlu1 %v4329_v24  ;;  %3790 = vset.pattern.permute.xlu0 %v4329_v24  ;;  %v3827_v24 = vld [vmem:[#allocation5] sm:$0xff]  }
  0xa9   : > { %1908 = vperm.xlu1 %3791, %v4509_v6   ;;  %1904 = vperm.xlu0 %3790, %v4501_v3  }
  0xaa   : > { %677 = vmatmul.mubr.bf16.gmra.mxu0 %v431_v51  ;;  %3593 = vmatprep.subr.bf16.mxu1 %v3827_v24 }
  0xab   : > { %686 = vmatprep.mubr.bf16.mxu0 %v7097_v0  ;;  %3594 = vmatpush3.bf16.msra.mxu1 %v3827_v24 }
  0xad   : > { %1912 = vperm.xlu1 %3791, %v4498_v2   ;;  %1916 = vperm.xlu0 %3790, %v4506_v5  }
  0xb1   : > { %1920 = vperm.xlu1 %3791, %v4517_v11   ;;  %1924 = vperm.xlu0 %3790, %v4514_v10  }
  0xb2   : > { %687 = vmatmul.mubr.bf16.gmra.mxu0 %v432_v12 }
  0xb3   : > { %696 = vmatprep.mubr.bf16.mxu0 %v7097_v0 }
  0xb5   : > { %1928 = vperm.xlu1 %3791, %v4525_v15   ;;  %1932 = vperm.xlu0 %3790, %v4522_v14  }
  0xb9   : > { %1936 = vperm.xlu1 %3791, %v4533_v19   ;;  %1940 = vperm.xlu0 %3790, %v4530_v18  }
  0xba   : > { %697 = vmatmul.mubr.bf16.gmra.mxu0 %v433_v40  ;;  %v401_v40 = vld [vmem:[%s4556_s23 + $0xd8] sm:$0xff] }
  0xbb   : > { %706 = vmatprep.mubr.bf16.mxu0 %v7097_v0  ;;  %v435_v58 = vpack.c.bf16 %v401_v40, %v400_v37 }
  0xbd   : > { %1944 = vperm.xlu1 %3791, %v4541_v23   ;;  %1948 = vperm.xlu0 %3790, %v4538_v22  }
  0xc1   : > { %1952 = vperm.xlu1 %3791, %v4549_v27   ;;  %1956 = vperm.xlu0 %3790, %v4546_v26  }
  0xc2   : > { %707 = vmatmul.mubr.bf16.gmra.mxu0 %v434_v4 }
  0xc3   : > { %v4757_v48 = vpop.permute.xlu1 %1626  ;;  %v4759_v51 = vpop.permute.xlu0 %1616  ;;  %716 = vmatprep.mubr.bf16.mxu0 %v7097_v0 }
  0xc5   : > { %1960 = vperm.xlu1 %3791, %v4564_v31   ;;  %1964 = vperm.xlu0 %3790, %v4561_v30  }
  0xc7   : > { %v4766_v9 = vpop.permute.xlu1 %1631  ;;  %v4768_v12 = vpop.permute.xlu0 %1621 }
  0xc9   : > { %1968 = vperm.xlu1 %3791, %v4574_v36   ;;  %1972 = vperm.xlu0 %3790, %v4571_v35  }
  0xca   : > { %717 = vmatmul.mubr.bf16.gmra.mxu0 %v435_v58 }
  0xcb   : > { %v4772_v24 = vpop.permute.xlu1 %1641  ;;  %v4774_v25 = vpop.permute.xlu0 %1636  ;;  %726 = vmatprep.mubr.bf16.mxu0 %v7112_v41 }
  0xcc   : > { %7106 = vst [vmem:[#allocation13_spill] sm:$0xff] %v4772_v24  ;;  %7107 = vst [vmem:[#allocation14_spill] sm:$0xff] %v4774_v25  ;;  %v402_v25 = vld [vmem:[%s4556_s23 + $0xe0] sm:$0xff]  ;;  %v403_v24 = vld [vmem:[%s4556_s23 + $0xe8] sm:$0xff] }
  0xcd   : > { %1976 = vperm.xlu1 %3791, %v4582_v39   ;;  %1980 = vperm.xlu0 %3790, %v4579_v38   ;;  %v436_v37 = vpack.c.bf16 %v403_v24, %v402_v25 }
  0xcf   : > { %v4781_v61 = vpop.permute.xlu1 %1651  ;;  %v4783_v62 = vpop.permute.xlu0 %1646 }
  0xd0   : > { %7108 = vst [vmem:[#allocation15_spill] sm:$0xff] %v4781_v61  ;;  %7109 = vst [vmem:[#allocation16_spill] sm:$0xff] %v4783_v62  ;;  %v405_v61 = vld [vmem:[%s4556_s23 + $0xf8] sm:$0xff] }
  0xd1   : > { %1984 = vperm.xlu1 %3791, %v4591_v43   ;;  %1988 = vperm.xlu0 %3790, %v4588_v42  }
  0xd2   : > { %727 = vmatmul.mubr.bf16.gmra.mxu0 %v436_v37 }
  0xd3   : > { %v4787_v4 = vpop.permute.xlu1 %1661  ;;  %v4789_v0 = vpop.permute.xlu0 %1656  ;;  %736 = vmatprep.mubr.bf16.mxu0 %v7112_v41 }
  0xd4   : > { %7110 = vst [vmem:[#allocation17_spill] sm:$0xff] %v4787_v4  ;;  %7111 = vst [vmem:[#allocation18_spill] sm:$0xff] %v4789_v0  ;;  %v404_v4 = vld [vmem:[%s4556_s23 + $0xf0] sm:$0xff] }
  0xd5   : > { %1992 = vperm.xlu1 %3791, %v4599_v46   ;;  %1996 = vperm.xlu0 %3790, %v4596_v45   ;;  %v437_v24 = vpack.c.bf16 %v405_v61, %v404_v4 }
  0xd7   : > { %v4796_v40 = vpop.permute.xlu1 %1671  ;;  %v4798_v62 = vpop.permute.xlu0 %1666 }
  0xd8   : > { %7113 = vst [vmem:[#allocation19_spill] sm:$0xff] %v4796_v40  ;;  %7114 = vst [vmem:[#allocation20_spill] sm:$0xff] %v4798_v62  ;;  %v409_v40 = vld [vmem:[%s4556_s23 + $0x118] sm:$0xff] }
  0xd9   : > { %2000 = vperm.xlu1 %3791, %v4610_v50   ;;  %2004 = vperm.xlu0 %3790, %v4607_v49  }
  0xda   : > { %737 = vmatmul.mubr.bf16.gmra.mxu0 %v437_v24 }
  0xdb   : > { %v4802_v58 = vpop.permute.xlu1 %1681  ;;  %v4804_v0 = vpop.permute.xlu0 %1676  ;;  %746 = vmatprep.mubr.bf16.mxu0 %v7112_v41 }
  0xdc   : > { %7115 = vst [vmem:[#allocation21_spill] sm:$0xff] %v4802_v58  ;;  %7116 = vst [vmem:[#allocation22_spill] sm:$0xff] %v4804_v0  ;;  %v406_v0 = vld [vmem:[%s4556_s23 + $0x100] sm:$0xff]  ;;  %v407_v58 = vld [vmem:[%s4556_s23 + $0x108] sm:$0xff] }
  0xdd   : > { %2008 = vperm.xlu1 %3791, %v4620_v53   ;;  %2012 = vperm.xlu0 %3790, %v4617_v52   ;;  %v438_v4 = vpack.c.bf16 %v407_v58, %v406_v0 }
  0xdf   : > { %v4811_v25 = vpop.permute.xlu1 %1691  ;;  %v4813_v62 = vpop.permute.xlu0 %1686 }
  0xe0   : > { %7117 = vst [vmem:[#allocation23_spill] sm:$0xff] %v4811_v25  ;;  %7118 = vst [vmem:[#allocation24_spill] sm:$0xff] %v4813_v62  ;;  %v408_v25 = vld [vmem:[%s4556_s23 + $0x110] sm:$0xff] }
  0xe1   : > { %2016 = vperm.xlu1 %3791, %v4631_v57   ;;  %2020 = vperm.xlu0 %3790, %v4628_v56   ;;  %v439_v0 = vpack.c.bf16 %v409_v40, %v408_v25 }
  0xe2   : > { %747 = vmatmul.mubr.bf16.gmra.mxu0 %v438_v4 }
  0xe3   : > { %v4817_v37 = vpop.permute.xlu1 %1701  ;;  %v4824_v61 = vpop.permute.xlu0 %1696  ;;  %756 = vmatprep.mubr.bf16.mxu0 %v7112_v41 }
  0xe4   : > { %7119 = vst [vmem:[#allocation25_spill] sm:$0xff] %v4817_v37  ;;  %7120 = vst [vmem:[#allocation26_spill] sm:$0xff] %v4824_v61 }
  0xe5   : > { %2024 = vperm.xlu1 %3791, %v4639_v60   ;;  %2028 = vperm.xlu0 %3790, %v4636_v59  }
  0xe7   : > { %v4826_v62 = vpop.permute.xlu1 %1711  ;;  %v4830_v24 = vpop.permute.xlu0 %1706 }
  0xe8   : > { %7121 = vst [vmem:[#allocation27_spill] sm:$0xff] %v4826_v62  ;;  %7122 = vst [vmem:[#allocation28_spill] sm:$0xff] %v4830_v24  ;;  %v411_v24 = vld [vmem:[%s4556_s23 + $0x128] sm:$0xff] }
  0xe9   : > { %2032 = vperm.xlu1 %3791, %v4650_v1   ;;  %2036 = vperm.xlu0 %3790, %v4647_v63  }
  0xea   : > { %757 = vmatmul.mubr.bf16.gmra.mxu0 %v439_v0 }
  0xeb   : > { %v4832_v37 = vpop.permute.xlu1 %1721  ;;  %v4841_v62 = vpop.permute.xlu0 %1716  ;;  %766 = vmatprep.mubr.bf16.mxu0 %v7112_v41 }
  0xec   : > { %7123 = vst [vmem:[#allocation29_spill] sm:$0xff] %v4832_v37  ;;  %7125 = vst [vmem:[#allocation31_spill] sm:$0xff] %v4841_v62  ;;  %v410_v37 = vld [vmem:[%s4556_s23 + $0x120] sm:$0xff]  ;;  %v413_v62 = vld [vmem:[%s4556_s23 + $0x138] sm:$0xff] }
  0xed   : > { %2040 = vperm.xlu1 %3791, %v4658_v8   ;;  %2044 = vperm.xlu0 %3790, %v4655_v7   ;;  %v440_v40 = vpack.c.bf16 %v411_v24, %v410_v37 }
  0xef   : > { %v4839_v58 = vpop.permute.xlu1 %1731  ;;  %v4852_v25 = vpop.permute.xlu0 %1726 }
  0xf0   : > { %7124 = vst [vmem:[#allocation30_spill] sm:$0xff] %v4839_v58 }
  0xf1   : > { %2048 = vperm.xlu1 %3791, %v4669_v16   ;;  %2052 = vperm.xlu0 %3790, %v4666_v13  }
  0xf2   : > { %767 = vmatmul.mubr.bf16.gmra.mxu0 %v440_v40 }
  0xf3   : > { %v4845_v4 = vpop.permute.xlu1 %1741  ;;  %776 = vmatprep.mubr.bf16.mxu0 %v7112_v41  ;;  %v4863_v61 = vpop.permute.xlu0 %1736 }
  0xf4   : > { %7126 = vst [vmem:[#allocation32_spill] sm:$0xff] %v4845_v4  ;;  %v412_v4 = vld [vmem:[%s4556_s23 + $0x130] sm:$0xff]  ;;  %7129 = vst [vmem:[#allocation35_spill] sm:$0xff] %v4863_v61  ;;  %v415_v61 = vld [vmem:[%s4556_s23 + $0x148] sm:$0xff] }
  0xf5   : > { %2056 = vperm.xlu1 %3791, %v4677_v21   ;;  %2060 = vperm.xlu0 %3790, %v4674_v20   ;;  %v441_v37 = vpack.c.bf16 %v413_v62, %v412_v4 }
  0xf7   : > { %v4854_v58 = vpop.permute.xlu1 %1751  ;;  %v4871_v40 = vpop.permute.xlu0 %1746 }
  0xf8   : > { %7127 = vst [vmem:[#allocation33_spill] sm:$0xff] %v4854_v58  ;;  %7131 = vst [vmem:[#allocation37_spill] sm:$0xff] %v4871_v40  ;;  %v414_v58 = vld [vmem:[%s4556_s23 + $0x140] sm:$0xff]  ;;  %v416_v40 = vld [vmem:[%s4556_s23 + $0x150] sm:$0xff] }
  0xf9   : > { %2064 = vperm.xlu1 %3791, %v4688_v29   ;;  %2068 = vperm.xlu0 %3790, %v4685_v28   ;;  %v442_v62 = vpack.c.bf16 %v415_v61, %v414_v58  ;;  %v417_v61 = vld [vmem:[%s4556_s23 + $0x158] sm:$0xff] }
  0xfa   : > { %777 = vmatmul.mubr.bf16.gmra.mxu0 %v441_v37  ;;  %v4330_v37 = vmov 2   ;;  %v443_v58 = vpack.c.bf16 %v417_v61, %v416_v40  ;;  %v420_v61 = vld [vmem:[%s4556_s23 + $0x170] sm:$0xff] }
  0xfb   : > { %v4858_v0 = vpop.permute.xlu1 %1761  ;;  %786 = vmatprep.mubr.bf16.mxu0 %v7112_v41 }
  0xfc   : > { %7128 = vst [vmem:[#allocation34_spill] sm:$0xff] %v4858_v0 }
  0xfd   : > { %2072 = vperm.xlu1 %3791, %v4696_v34   ;;  %2076 = vperm.xlu0 %3790, %v4693_v33  }
  0xff   : > { %v4867_v24 = vpop.permute.xlu1 %1771 }
 0x100   : > { %7130 = vst [vmem:[#allocation36_spill] sm:$0xff] %v4867_v24  ;;  %v4882_v24 = vpop.permute.xlu0 %1756 }
 0x101   : > { %2080 = vperm.xlu1 %3791, %v4707_v47   ;;  %2084 = vperm.xlu0 %3790, %v4704_v44  }
 0x102   : > { %787 = vmatmul.mubr.bf16.gmra.mxu0 %v442_v62 }
 0x103   : > { %v4873_v0 = vpop.permute.xlu1 %1781  ;;  %796 = vmatprep.mubr.bf16.mxu0 %v7112_v41 }
 0x104   : > { %7132 = vst [vmem:[#allocation38_spill] sm:$0xff] %v4873_v0 }
 0x105   : > { %2088 = vperm.xlu1 %3791, %v4715_v55   ;;  %2092 = vperm.xlu0 %3790, %v4712_v54  }
 0x107   : > { %v4880_v4 = vpop.permute.xlu1 %1791 }
 0x108   : > { %7133 = vst [vmem:[#allocation39_spill] sm:$0xff] %v4880_v4  ;;  %v4892_v4 = vpop.permute.xlu0 %1766 }
 0x109   : > { %3792 = vset.pattern.permute.xlu1 %v4330_v37  ;;  %3793 = vset.pattern.permute.xlu0 %v4330_v37 }
 0x10a   : > { %2145 = vperm.xlu1 %3792, %v4501_v3   ;;  %2149 = vperm.xlu0 %3793, %v4509_v6   ;;  %v418_v6 = vld [vmem:[%s4556_s23 + $0x160] sm:$0xff] }
 0x10b   : > { %v4886_v0 = vpop.permute.xlu1 %1801  ;;  %797 = vmatmul.mubr.bf16.gmra.mxu0 %v443_v58  ;;  %v421_v58 = vld [vmem:[%s4556_s23 + $0x178] sm:$0xff] }
 0x10c   : > { %806 = vmatprep.mubr.bf16.mxu0 %v7112_v41  ;;  %v4904_v40 = vpop.permute.xlu0 %1776 }
 0x10e   : > { %2153 = vperm.xlu1 %3792, %v4498_v2   ;;  %2161 = vperm.xlu0 %3793, %v4517_v11   ;;  %v419_v2 = vld [vmem:[%s4556_s23 + $0x168] sm:$0xff]  ;;  %s3360_s23 = sshll.u32 %s6444_s25, 4  ;;  %s7040_s23 = int_to_ptr.vmem [resolvable:$true] %s3360_s23 }
 0x10f   : > { %v4895_v62 = vpop.permute.xlu1 %1811  ;;  %v444_v11 = vpack.c.bf16 %v419_v2, %v418_v6  ;;  %s4251_s22 = scalar_lea.vmem %s7040_s23, 6144  ;;  %p4258_p7 = scmp.lt.s32.totalorder %s7040_s23, %s4256_s20 }
 0x110   : > { %p4252_p9 = scmp.ne.s32.totalorder %s7040_s23, %s4251_s22  ;;  %p4259_p8 = scmp.lt.s32.totalorder %s4257_s24, %s4251_s22 }
 0x112   : > { %2157 = vperm.xlu1 %3792, %v4506_v5   ;;  %2169 = vperm.xlu0 %3793, %v4525_v15   ;;  %v4911_v5 = vpop.permute.xlu0 %1786  ;;  %p4253_p12 = pnand %p4252_p9, %p4418_p5  ;;  %p4260_p11 = por %p4259_p8, %p4258_p7 }
 0x113   : > { %v4899_v3 = vpop.permute.xlu1 %1821  ;;  %807 = vmatmul.mubr.bf16.gmra.mxu0 %v444_v11 }
 0x114   : > { %816 = vmatprep.mubr.bf16.mxu0 %v7112_v41  ;;  %p4254_p13 = pneg %p4253_p12 }
 0x116   : > { %2165 = vperm.xlu1 %3792, %v4514_v10   ;;  %2177 = vperm.xlu0 %3793, %v4533_v19   ;;  %v445_v10 = vpack.c.bf16 %v421_v58, %v420_v61  ;;  %v4923_v6 = vpop.permute.xlu0 %1796  ;;  %p4261_p0 = pnand %p4260_p11, %p4254_p13 }
 0x117   : > { %v4908_v37 = vpop.permute.xlu1 %1831 }
 0x11a   : > { %2173 = vperm.xlu1 %3792, %v4522_v14   ;;  %2185 = vperm.xlu0 %3793, %v4541_v23   ;;  %v466_v23 = vsub.s32 0, %v4723_v17  ;;  %v4931_v41 = vpop.permute.xlu0 %1806 }
 0x11b   : > { %v4914_v15 = vpop.permute.xlu1 %1841  ;;  %817 = vmatmul.mubr.bf16.gmra.mxu0 %v445_v10 }
 0x11e   : > { %2181 = vperm.xlu1 %3792, %v4530_v18   ;;  %2193 = vperm.xlu0 %3793, %v4549_v27   ;;  %v4935_v18 = vrot.slane %v4731_v32, %v466_v23 }
 0x11f   : > { %v4921_v19 = vpop.permute.xlu1 %1851 }
 0x122   : > { %2189 = vperm.xlu1 %3792, %v4538_v22   ;;  %2201 = vperm.xlu0 %3793, %v4564_v31   ;;  %v588_v2 = vpop.f32.mrf.mxu0 }
 0x123   : > { %v589_v31 = vadd.f32 %v588_v2, %v4935_v18 }
 0x124   : > { %v4927_v14 = vpop.permute.xlu1 %1908  ;;  %v4941_v22 = vpop.f32.mrf.mxu0 }
 0x126   : > { %2197 = vperm.xlu1 %3792, %v4546_v26   ;;  %2209 = vperm.xlu0 %3793, %v4574_v36   ;;  %v4946_v26 = vpop.permute.xlu0 %1816  ;;  %v592_v11 = vpop.f32.mrf.mxu0 }
 0x127   : > { %v593_v36 = vadd.f32 %v592_v11, %v4935_v18 }
 0x128   : > { %v4937_v27 = vpop.permute.xlu1 %1912  ;;  %v4951_v32 = vpop.f32.mrf.mxu0 }
 0x129   : > { %v828_v61 = vmax.f32 %v593_v36, 0.0 }
 0x12a   : > { %2205 = vperm.xlu1 %3792, %v4561_v30   ;;  %2217 = vperm.xlu0 %3793, %v4582_v39   ;;  %v827_v30 = vmax.f32 %v589_v31, 0.0  ;;  %v598_v58 = vpop.f32.mrf.mxu0  ;;  %v4956_v23 = vpop.permute.xlu0 %1826 }
 0x12c   : > { %v4944_v17 = vpop.permute.xlu1 %1920  ;;  %v875_v10 = vpack.c.bf16 %v828_v61, %v827_v30  ;;  %v4959_v2 = vpop.f32.mrf.mxu0 }
 0x12d   : > { %7134 = vst [vmem:[#allocation40_spill] sm:$0xff] %v4959_v2 }
 0x12e   : > { %2213 = vperm.xlu1 %3792, %v4571_v35   ;;  %2225 = vperm.xlu0 %3793, %v4591_v43   ;;  %v599_v35 = vadd.f32 %v598_v58, %v4935_v18  ;;  %v602_v11 = vpop.f32.mrf.mxu0 }
 0x12f   : > { %3595 = vmatprep.mubr.bf16.mxu1 %v875_v10  ;;  %v603_v31 = vadd.f32 %v602_v11, %v4935_v18 }
 0x130   : > { %v4953_v39 = vpop.permute.xlu1 %1928  ;;  %v829_v36 = vmax.f32 %v599_v35, 0.0 }
 0x131   : > { %v830_v30 = vmax.f32 %v603_v31, 0.0 }
 0x132   : > { %2221 = vperm.xlu1 %3792, %v4579_v38   ;;  %2233 = vperm.xlu0 %3793, %v4599_v46   ;;  %v4967_v38 = vpop.f32.mrf.mxu0  ;;  %v4971_v46 = vpop.permute.xlu0 %1836 }
 0x133   : > { %v876_v58 = vpack.c.bf16 %v830_v30, %v829_v36 }
 0x134   : > { %v4962_v43 = vpop.permute.xlu1 %1936  ;;  %v608_v2 = vpop.f32.mrf.mxu0 }
 0x135   : > { %3596 = vmatmul.mubr.bf16.vlgmr.msra.gmra.mxu1 %v876_v58 }
 0x136   : > { %2229 = vperm.xlu1 %3792, %v4588_v42   ;;  %2241 = vperm.xlu0 %3793, %v4610_v50   ;;  %v4975_v10 = vpop.f32.mrf.mxu0  ;;  %v609_v42 = vadd.f32 %v608_v2, %v4935_v18  ;;  %v4982_v31 = vpop.permute.xlu0 %1846 }
 0x137   : > { %7135 = vst [vmem:[#allocation41_spill] sm:$0xff] %v4975_v10 }
 0x138   : > { %v4969_v61 = vpop.permute.xlu1 %1944  ;;  %v612_v11 = vpop.f32.mrf.mxu0 }
 0x139   : > { %v613_v35 = vadd.f32 %v612_v11, %v4935_v18 }
 0x13a   : > { %2237 = vperm.xlu1 %3792, %v4596_v45   ;;  %2249 = vperm.xlu0 %3793, %v4620_v53   ;;  %v4985_v36 = vpop.f32.mrf.mxu0  ;;  %v831_v45 = vmax.f32 %v609_v42, 0.0 }
 0x13b   : > { %7136 = vst [vmem:[#allocation42_spill] sm:$0xff] %v4985_v36  ;;  %v832_v53 = vmax.f32 %v613_v35, 0.0 }
 0x13c   : > { %v4978_v50 = vpop.permute.xlu1 %1952  ;;  %v618_v10 = vpop.f32.mrf.mxu0 }
 0x13d   : > { %v877_v2 = vpack.c.bf16 %v832_v53, %v831_v45 }
 0x13e   : > { %2245 = vperm.xlu1 %3792, %v4607_v49   ;;  %2257 = vperm.xlu0 %3793, %v4631_v57   ;;  %v4991_v58 = vpop.f32.mrf.mxu0  ;;  %v619_v49 = vadd.f32 %v618_v10, %v4935_v18  ;;  %v4996_v57 = vpop.permute.xlu0 %1904 }
 0x13f   : > { %7137 = vst [vmem:[#allocation43_spill] sm:$0xff] %v4991_v58  ;;  %3599 = vmatprep.mubr.bf16.mxu1 %v877_v2 }
 0x140   : > { %v4987_v30 = vpop.permute.xlu1 %1960  ;;  %v622_v36 = vpop.f32.mrf.mxu0 }
 0x141   : > { %v623_v42 = vadd.f32 %v622_v36, %v4935_v18 }
 0x142   : > { %2253 = vperm.xlu1 %3792, %v4617_v52   ;;  %2265 = vperm.xlu0 %3793, %v4639_v60   ;;  %v5001_v35 = vpop.f32.mrf.mxu0  ;;  %v833_v52 = vmax.f32 %v619_v49, 0.0  ;;  %v5006_v2 = vpop.permute.xlu0 %1916 }
 0x143   : > { %7139 = vst [vmem:[#allocation45_spill] sm:$0xff] %v5001_v35  ;;  %v834_v60 = vmax.f32 %v623_v42, 0.0  ;;  %v7268_v35 = vld [vmem:[#allocation25_spill] sm:$0xff] }
 0x144   : > { %v4994_v11 = vpop.permute.xlu1 %1968  ;;  %v628_v53 = vpop.f32.mrf.mxu0 }
 0x145   : > { %7138 = vst [vmem:[#allocation44_spill] sm:$0xff] %v4994_v11  ;;  %v878_v10 = vpack.c.bf16 %v834_v60, %v833_v52 }
 0x146   : > { %2261 = vperm.xlu1 %3792, %v4628_v56   ;;  %2273 = vperm.xlu0 %3793, %v4650_v1   ;;  %v5009_v11 = vpop.f32.mrf.mxu0  ;;  %v629_v56 = vadd.f32 %v628_v53, %v4935_v18 }
 0x147   : > { %7141 = vst [vmem:[#allocation47_spill] sm:$0xff] %v5009_v11  ;;  %3600 = vmatmul.mubr.bf16.gmra.mxu1 %v878_v10 }
 0x148   : > { %v5003_v45 = vpop.permute.xlu1 %1976  ;;  %v632_v36 = vpop.f32.mrf.mxu0 }
 0x149   : > { %7140 = vst [vmem:[#allocation46_spill] sm:$0xff] %v5003_v45  ;;  %v633_v49 = vadd.f32 %v632_v36, %v4935_v18 }
 0x14a   : > { %2269 = vperm.xlu1 %3792, %v4636_v59   ;;  %2281 = vperm.xlu0 %3793, %v4658_v8   ;;  %v5017_v42 = vpop.f32.mrf.mxu0  ;;  %v835_v59 = vmax.f32 %v629_v56, 0.0  ;;  %v5021_v8 = vpop.permute.xlu0 %1924 }
 0x14b   : > { %7143 = vst [vmem:[#allocation49_spill] sm:$0xff] %v5017_v42  ;;  %v836_v52 = vmax.f32 %v633_v49, 0.0 }
 0x14c   : > { %v5012_v1 = vpop.permute.xlu1 %1984  ;;  %v638_v11 = vpop.f32.mrf.mxu0 }
 0x14d   : > { %7142 = vst [vmem:[#allocation48_spill] sm:$0xff] %v5012_v1  ;;  %v879_v53 = vpack.c.bf16 %v836_v52, %v835_v59 }
 0x14e   : > { %2277 = vperm.xlu1 %3792, %v4647_v63   ;;  %2289 = vperm.xlu0 %3793, %v4669_v16   ;;  %v5025_v10 = vpop.f32.mrf.mxu0  ;;  %v639_v63 = vadd.f32 %v638_v11, %v4935_v18  ;;  %v5032_v49 = vpop.permute.xlu0 %1932 }
 0x14f   : > { %7145 = vst [vmem:[#allocation51_spill] sm:$0xff] %v5025_v10  ;;  %3603 = vmatprep.mubr.bf16.mxu1 %v879_v53 }
 0x150   : > { %v5019_v60 = vpop.permute.xlu1 %1992  ;;  %v642_v36 = vpop.f32.mrf.mxu0 }
 0x151   : > { %7144 = vst [vmem:[#allocation50_spill] sm:$0xff] %v5019_v60  ;;  %v643_v56 = vadd.f32 %v642_v36, %v4935_v18  ;;  %v4171_v60 = vld [vmem:[%s4495_s13 + $0x170] sm:$0xff] }
 0x152   : > { %2285 = vperm.xlu1 %3792, %v4655_v7   ;;  %2297 = vperm.xlu0 %3793, %v4677_v21   ;;  %v5035_v59 = vpop.f32.mrf.mxu0  ;;  %v837_v7 = vmax.f32 %v639_v63, 0.0 }
 0x153   : > { %7147 = vst [vmem:[#allocation53_spill] sm:$0xff] %v5035_v59  ;;  %v838_v21 = vmax.f32 %v643_v56, 0.0 }
 0x154   : > { %v5028_v16 = vpop.permute.xlu1 %2000  ;;  %v648_v10 = vpop.f32.mrf.mxu0 }
 0x155   : > { %7146 = vst [vmem:[#allocation52_spill] sm:$0xff] %v5028_v16  ;;  %v880_v11 = vpack.c.bf16 %v838_v21, %v837_v7  ;;  %v4140_v16 = vld [vmem:[%s4495_s13 + $0x70] sm:$0xff] }
 0x156   : > { %2293 = vperm.xlu1 %3792, %v4666_v13   ;;  %2305 = vperm.xlu0 %3793, %v4688_v29   ;;  %v5041_v53 = vpop.f32.mrf.mxu0  ;;  %v649_v13 = vadd.f32 %v648_v10, %v4935_v18  ;;  %v5046_v29 = vpop.permute.xlu0 %1940 }
 0x157   : > { %7149 = vst [vmem:[#allocation55_spill] sm:$0xff] %v5041_v53  ;;  %3604 = vmatmul.mubr.bf16.gmra.mxu1 %v880_v11  ;;  %v4133_v53 = vld [vmem:[%s4495_s13 + $0x58] sm:$0xff] }
 0x158   : > { %v5037_v52 = vpop.permute.xlu1 %2008  ;;  %v652_v59 = vpop.f32.mrf.mxu0 }
 0x159   : > { %7148 = vst [vmem:[#allocation54_spill] sm:$0xff] %v5037_v52  ;;  %v653_v63 = vadd.f32 %v652_v59, %v4935_v18 }
 0x15a   : > { %2301 = vperm.xlu1 %3792, %v4674_v20   ;;  %2313 = vperm.xlu0 %3793, %v4696_v34   ;;  %v5051_v56 = vpop.f32.mrf.mxu0  ;;  %v839_v20 = vmax.f32 %v649_v13, 0.0  ;;  %v5056_v11 = vpop.permute.xlu0 %1948 }
 0x15b   : > { %7151 = vst [vmem:[#allocation57_spill] sm:$0xff] %v5051_v56  ;;  %v840_v34 = vmax.f32 %v653_v63, 0.0 }
 0x15c   : > { %v5044_v36 = vpop.permute.xlu1 %2016  ;;  %v658_v21 = vpop.f32.mrf.mxu0 }
 0x15d   : > { %7150 = vst [vmem:[#allocation56_spill] sm:$0xff] %v5044_v36  ;;  %v881_v10 = vpack.c.bf16 %v840_v34, %v839_v20  ;;  %v4331_v20 = vmov 3   ;;  %v4129_v36 = vld [vmem:[%s4495_s13 + $0x38] sm:$0xff] }
 0x15e   : > { %2309 = vperm.xlu1 %3792, %v4685_v28   ;;  %2321 = vperm.xlu0 %3793, %v4707_v47   ;;  %v5059_v59 = vpop.f32.mrf.mxu0  ;;  %v659_v28 = vadd.f32 %v658_v21, %v4935_v18  ;;  %v5071_v21 = vpop.permute.xlu0 %1956 }
 0x15f   : > { %7153 = vst [vmem:[#allocation59_spill] sm:$0xff] %v5059_v59  ;;  %3607 = vmatprep.mubr.bf16.mxu1 %v881_v10 }
 0x160   : > { %v5053_v7 = vpop.permute.xlu1 %2024  ;;  %v662_v13 = vpop.f32.mrf.mxu0  ;;  %v841_v34 = vmax.f32 %v659_v28, 0.0 }
 0x161   : > { %7152 = vst [vmem:[#allocation58_spill] sm:$0xff] %v5053_v7  ;;  %v663_v63 = vadd.f32 %v662_v13, %v4935_v18  ;;  %v3828_v13 = vld [vmem:[#allocation7 + $0x38] sm:$0xff]  }
 0x162   : > { %2317 = vperm.xlu1 %3792, %v4693_v33   ;;  %2329 = vperm.xlu0 %3793, %v4715_v55   ;;  %v5066_v33 = vpop.f32.mrf.mxu0  ;;  %v4124_v55 = vld [vmem:[%s4495_s13] sm:$0xff] }
 0x163   : > { %7155 = vst [vmem:[#allocation61_spill] sm:$0xff] %v5066_v33  ;;  %v842_v7 = vmax.f32 %v663_v63, 0.0  ;;  %3643 = vmatprep.subr.bf16.mxu1 %v3828_v13  ;;  %v4128_v33 = vld [vmem:[%s4495_s13 + $0x10] sm:$0xff] }
 0x164   : > { %v5062_v47 = vpop.permute.xlu1 %2032  ;;  %3644 = vmatpush3.bf16.msra.mxu1 %v3828_v13 }
 0x165   : > { %7154 = vst [vmem:[#allocation60_spill] sm:$0xff] %v5062_v47  ;;  %v882_v10 = vpack.c.bf16 %v842_v7, %v841_v34  ;;  %v668_v47 = vpop.f32.mrf.mxu0  ;;  %v3829_v7 = vld [vmem:[#allocation7 + $0x30] sm:$0xff]   ;;  %v5080_v34 = vpop.permute.xlu0 %1964 }
 0x166   : > { %2325 = vperm.xlu1 %3792, %v4704_v44   ;;  %3794 = vset.pattern.permute.xlu0 %v4331_v20  ;;  %v4125_v44 = vld [vmem:[%s4495_s13 + $0x18] sm:$0xff]  ;;  %v669_v63 = vadd.f32 %v668_v47, %v4935_v18  ;;  %7159 = vst [vmem:[#allocation65_spill] sm:$0xff] %v5080_v34  ;;  %v7274_v34 = vld [vmem:[#allocation28_spill] sm:$0xff] }
 0x167   : > { %2386 = vperm.xlu0 %3794, %v4124_v55   ;;  %v5075_v56 = vpop.f32.mrf.mxu0  ;;  %3608 = vmatmul.mubr.bf16.gmra.mxu1 %v882_v10 }
 0x168   : > { %v5069_v59 = vpop.permute.xlu1 %2040  ;;  %7157 = vst [vmem:[#allocation63_spill] sm:$0xff] %v5075_v56  ;;  %3645 = vmatprep.subr.bf16.mxu1 %v3829_v7  ;;  %v843_v47 = vmax.f32 %v669_v63, 0.0 }
 0x169   : > { %7156 = vst [vmem:[#allocation62_spill] sm:$0xff] %v5069_v59  ;;  %v672_v55 = vpop.f32.mrf.mxu0  ;;  %v4126_v59 = vld [vmem:[%s4495_s13 + $0x8] sm:$0xff]  ;;  %3646 = vmatpush3.bf16.msra.mxu1 %v3829_v7  ;;  %v3831_v7 = vld [vmem:[#allocation7 + $0x20] sm:$0xff]  }
 0x16a   : > { %2333 = vperm.xlu1 %3792, %v4712_v54   ;;  %v673_v54 = vadd.f32 %v672_v55, %v4935_v18  ;;  %v3830_v55 = vld [vmem:[#allocation7 + $0x28] sm:$0xff]  }
 0x16b   : > { %2398 = vperm.xlu0 %3794, %v4125_v44   ;;  %v4127_v44 = vld [vmem:[%s4495_s13 + $0x28] sm:$0xff]  ;;  %v5085_v10 = vpop.f32.mrf.mxu0  ;;  %3647 = vmatprep.subr.bf16.mxu1 %v3830_v55 }
 0x16c   : > { %v5077_v28 = vpop.permute.xlu1 %2048  ;;  %7160 = vst [vmem:[#allocation66_spill] sm:$0xff] %v5085_v10  ;;  %v844_v56 = vmax.f32 %v673_v54, 0.0  ;;  %v5095_v10 = vpop.permute.xlu0 %1972 }
 0x16d   : > { %7158 = vst [vmem:[#allocation64_spill] sm:$0xff] %v5077_v28  ;;  %7164 = vst [vmem:[#allocation70_spill] sm:$0xff] %v5095_v10  ;;  %3648 = vmatpush3.bf16.msra.mxu1 %v3830_v55 }
 0x16e   : > { %3795 = vset.pattern.permute.xlu1 %v4331_v20  ;;  %v678_v20 = vpop.f32.mrf.mxu0  ;;  %v883_v13 = vpack.c.bf16 %v844_v56, %v843_v47  ;;  %3649 = vmatprep.subr.bf16.mxu1 %v3831_v7 }
 0x16f   : > { %2390 = vperm.xlu1 %3795, %v4126_v59   ;;  %2406 = vperm.xlu0 %3794, %v4127_v44  }
 0x170   : > { %v5087_v28 = vpop.permute.xlu1 %2056  ;;  %v5091_v59 = vpop.f32.mrf.mxu0  ;;  %3611 = vmatprep.mubr.bf16.mxu1 %v883_v13 }
 0x171   : > { %7161 = vst [vmem:[#allocation67_spill] sm:$0xff] %v5087_v28  ;;  %7162 = vst [vmem:[#allocation68_spill] sm:$0xff] %v5091_v59  ;;  %v679_v28 = vadd.f32 %v678_v20, %v4935_v18  ;;  %3650 = vmatpush3.bf16.msra.mxu1 %v3831_v7  ;;  %v5105_v13 = vpop.permute.xlu0 %1980 }
 0x172   : > { %v682_v63 = vpop.f32.mrf.mxu0  ;;  %7167 = vst [vmem:[#allocation73_spill] sm:$0xff] %v5105_v13 }
 0x173   : > { %2394 = vperm.xlu1 %3795, %v4128_v33   ;;  %2414 = vperm.xlu0 %3794, %v4129_v36   ;;  %v683_v56 = vadd.f32 %v682_v63, %v4935_v18  ;;  %v4130_v33 = vld [vmem:[%s4495_s13 + $0x20] sm:$0xff]  ;;  %v4131_v36 = vld [vmem:[%s4495_s13 + $0x48] sm:$0xff]  ;;  %v4132_v63 = vld [vmem:[%s4495_s13 + $0x30] sm:$0xff] }
 0x174   : > { %v5093_v44 = vpop.permute.xlu1 %2064  ;;  %v5101_v54 = vpop.f32.mrf.mxu0 }
 0x175   : > { %7163 = vst [vmem:[#allocation69_spill] sm:$0xff] %v5093_v44  ;;  %7165 = vst [vmem:[#allocation71_spill] sm:$0xff] %v5101_v54  ;;  %v845_v44 = vmax.f32 %v679_v28, 0.0  ;;  %v846_v59 = vmax.f32 %v683_v56, 0.0 }
 0x176   : > { %v688_v20 = vpop.f32.mrf.mxu0 }
 0x177   : > { %2402 = vperm.xlu1 %3795, %v4130_v33   ;;  %2422 = vperm.xlu0 %3794, %v4131_v36   ;;  %v884_v55 = vpack.c.bf16 %v846_v59, %v845_v44  ;;  %v3832_v33 = vld [vmem:[#allocation7 + $0x18] sm:$0xff]   ;;  %v689_v28 = vadd.f32 %v688_v20, %v4935_v18  ;;  %v4134_v59 = vld [vmem:[%s4495_s13 + $0x40] sm:$0xff]  ;;  %v4135_v44 = vld [vmem:[%s4495_s13 + $0x68] sm:$0xff]  ;;  %v5121_v20 = vpop.permute.xlu0 %1988 }
 0x178   : > { %v5103_v47 = vpop.permute.xlu1 %2072  ;;  %v5109_v36 = vpop.f32.mrf.mxu0  ;;  %3651 = vmatprep.subr.bf16.mxu1 %v3832_v33  ;;  %7172 = vst [vmem:[#allocation78_spill] sm:$0xff] %v5121_v20 }
 0x179   : > { %7166 = vst [vmem:[#allocation72_spill] sm:$0xff] %v5103_v47  ;;  %7168 = vst [vmem:[#allocation74_spill] sm:$0xff] %v5109_v36  ;;  %3612 = vmatmul.mubr.bf16.gmra.mxu1 %v884_v55  ;;  %v847_v36 = vmax.f32 %v689_v28, 0.0  ;;  %v3833_v47 = vld [vmem:[#allocation7 + $0x10] sm:$0xff]  }
 0x17a   : > { %v692_v56 = vpop.f32.mrf.mxu0  ;;  %3652 = vmatpush3.bf16.msra.mxu1 %v3832_v33  ;;  %v4136_v33 = vld [vmem:[%s4495_s13 + $0x50] sm:$0xff] }
 0x17b   : > { %2410 = vperm.xlu1 %3795, %v4132_v63   ;;  %2430 = vperm.xlu0 %3794, %v4133_v53   ;;  %v693_v7 = vadd.f32 %v692_v56, %v4935_v18  ;;  %v4137_v56 = vld [vmem:[%s4495_s13 + $0x78] sm:$0xff] }
 0x17c   : > { %v5111_v54 = vpop.permute.xlu1 %2080  ;;  %v5117_v63 = vpop.f32.mrf.mxu0  ;;  %3653 = vmatprep.subr.bf16.mxu1 %v3833_v47 }
 0x17d   : > { %7169 = vst [vmem:[#allocation75_spill] sm:$0xff] %v5111_v54  ;;  %7170 = vst [vmem:[#allocation76_spill] sm:$0xff] %v5117_v63  ;;  %v848_v54 = vmax.f32 %v693_v7, 0.0  ;;  %v4138_v63 = vld [vmem:[%s4495_s13 + $0x60] sm:$0xff] }
 0x17e   : > { %v698_v55 = vpop.f32.mrf.mxu0  ;;  %3654 = vmatpush3.bf16.msra.mxu1 %v3833_v47 }
 0x17f   : > { %2418 = vperm.xlu1 %3795, %v4134_v59   ;;  %2438 = vperm.xlu0 %3794, %v4135_v44   ;;  %v885_v52 = vpack.c.bf16 %v848_v54, %v847_v36  ;;  %v699_v44 = vadd.f32 %v698_v55, %v4935_v18  ;;  %v5132_v54 = vpop.permute.xlu0 %1996  ;;  %v4139_v36 = vld [vmem:[%s4495_s13 + $0x88] sm:$0xff] }
 0x180   : > { %v5119_v53 = vpop.permute.xlu1 %2088  ;;  %v5125_v59 = vpop.f32.mrf.mxu0  ;;  %7175 = vst [vmem:[#allocation81_spill] sm:$0xff] %v5132_v54 }
 0x181   : > { %7171 = vst [vmem:[#allocation77_spill] sm:$0xff] %v5119_v53  ;;  %7173 = vst [vmem:[#allocation79_spill] sm:$0xff] %v5125_v59  ;;  %3615 = vmatprep.mubr.bf16.mxu1 %v885_v52  ;;  %v849_v47 = vmax.f32 %v699_v44, 0.0 }
 0x182   : > { %v702_v7 = vpop.f32.mrf.mxu0 }
 0x183   : > { %2426 = vperm.xlu1 %3795, %v4136_v33   ;;  %2446 = vperm.xlu0 %3794, %v4137_v56   ;;  %v703_v53 = vadd.f32 %v702_v7, %v4935_v18  ;;  %v3834_v56 = vld [vmem:[#allocation7 + $0x8] sm:$0xff]  }
 0x184   : > { %v5135_v33 = vpop.f32.mrf.mxu0  ;;  %3655 = vmatprep.subr.bf16.mxu1 %v3834_v56 }
 0x185   : > { %v5128_v28 = vpop.permute.xlu1 %2145  ;;  %7176 = vst [vmem:[#allocation82_spill] sm:$0xff] %v5135_v33  ;;  %v850_v59 = vmax.f32 %v703_v53, 0.0  ;;  %3656 = vmatpush3.bf16.msra.mxu1 %v3834_v56  ;;  %v5146_v53 = vpop.permute.xlu0 %2004  ;;  %v4143_v56 = vld [vmem:[%s4495_s13 + $0xa8] sm:$0xff] }
 0x186   : > { %7174 = vst [vmem:[#allocation80_spill] sm:$0xff] %v5128_v28  ;;  %v708_v52 = vpop.f32.mrf.mxu0  ;;  %7180 = vst [vmem:[#allocation86_spill] sm:$0xff] %v5146_v53  ;;  %v4144_v53 = vld [vmem:[%s4495_s13 + $0x90] sm:$0xff] }
 0x187   : > { %2434 = vperm.xlu1 %3795, %v4138_v63   ;;  %2454 = vperm.xlu0 %3794, %v4139_v36   ;;  %v886_v28 = vpack.c.bf16 %v850_v59, %v849_v47  ;;  %v4141_v63 = vld [vmem:[%s4495_s13 + $0x98] sm:$0xff]  ;;  %v3835_v36 = vld [vmem:[#allocation7] sm:$0xff]   ;;  %v709_v33 = vadd.f32 %v708_v52, %v4935_v18 }
 0x188   : > { %v5141_v7 = vpop.f32.mrf.mxu0  ;;  %3657 = vmatprep.subr.bf16.mxu1 %v3835_v36  ;;  %v4142_v59 = vld [vmem:[%s4495_s13 + $0x80] sm:$0xff] }
 0x189   : > { %v5137_v55 = vpop.permute.xlu1 %2153  ;;  %7178 = vst [vmem:[#allocation84_spill] sm:$0xff] %v5141_v7  ;;  %3616 = vmatmul.mubr.bf16.gmra.mxu1 %v886_v28  ;;  %v5156_v54 = vpop.permute.xlu0 %2012 }
 0x18a   : > { %7177 = vst [vmem:[#allocation83_spill] sm:$0xff] %v5137_v55  ;;  %v712_v55 = vpop.f32.mrf.mxu0  ;;  %3658 = vmatpush3.bf16.msra.mxu1 %v3835_v36  ;;  %7183 = vst [vmem:[#allocation89_spill] sm:$0xff] %v5156_v54  ;;  %v4149_v54 = vld [vmem:[%s4495_s13 + $0xd8] sm:$0xff] }
 0x18b   : > { %2442 = vperm.xlu1 %3795, %v4140_v16   ;;  %2462 = vperm.xlu0 %3794, %v4141_v63   ;;  %v713_v16 = vadd.f32 %v712_v55, %v4935_v18  ;;  %v851_v63 = vmax.f32 %v709_v33, 0.0  ;;  %v4145_v55 = vld [vmem:[%s4495_s13 + $0xb8] sm:$0xff] }
 0x18c   : > { %v5151_v47 = vpop.f32.mrf.mxu0 }
 0x18d   : > { %v5144_v44 = vpop.permute.xlu1 %2157  ;;  %7181 = vst [vmem:[#allocation87_spill] sm:$0xff] %v5151_v47  ;;  %v852_v28 = vmax.f32 %v713_v16, 0.0  ;;  %v4148_v47 = vld [vmem:[%s4495_s13 + $0xb0] sm:$0xff] }
 0x18e   : > { %7179 = vst [vmem:[#allocation85_spill] sm:$0xff] %v5144_v44  ;;  %v718_v7 = vpop.f32.mrf.mxu0 }
 0x18f   : > { %2450 = vperm.xlu1 %3795, %v4142_v59   ;;  %2470 = vperm.xlu0 %3794, %v4143_v56   ;;  %v887_v44 = vpack.c.bf16 %v852_v28, %v851_v63  ;;  %v719_v36 = vadd.f32 %v718_v7, %v4935_v18  ;;  %v4147_v63 = vld [vmem:[%s4495_s13 + $0xc8] sm:$0xff]  ;;  %v5171_v7 = vpop.permute.xlu0 %2020 }
 0x190   : > { %v5159_v59 = vpop.f32.mrf.mxu0  ;;  %7188 = vst [vmem:[#allocation94_spill] sm:$0xff] %v5171_v7  ;;  %v4153_v7 = vld [vmem:[%s4495_s13 + $0xf8] sm:$0xff] }
 0x191   : > { %v5153_v52 = vpop.permute.xlu1 %2165  ;;  %7184 = vst [vmem:[#allocation90_spill] sm:$0xff] %v5159_v59  ;;  %3619 = vmatprep.mubr.bf16.mxu1 %v887_v44  ;;  %v853_v28 = vmax.f32 %v719_v36, 0.0 }
 0x192   : > { %7182 = vst [vmem:[#allocation88_spill] sm:$0xff] %v5153_v52  ;;  %v722_v16 = vpop.f32.mrf.mxu0  ;;  %v4146_v52 = vld [vmem:[%s4495_s13 + $0xa0] sm:$0xff] }
 0x193   : > { %2458 = vperm.xlu1 %3795, %v4144_v53   ;;  %2478 = vperm.xlu0 %3794, %v4145_v55   ;;  %v723_v56 = vadd.f32 %v722_v16, %v4935_v18 }
 0x194   : > { %v5167_v53 = vpop.f32.mrf.mxu0 }
 0x195   : > { %v5162_v33 = vpop.permute.xlu1 %2173  ;;  %7186 = vst [vmem:[#allocation92_spill] sm:$0xff] %v5167_v53  ;;  %v854_v55 = vmax.f32 %v723_v56, 0.0  ;;  %v5182_v53 = vpop.permute.xlu0 %2028 }
 0x196   : > { %7185 = vst [vmem:[#allocation91_spill] sm:$0xff] %v5162_v33  ;;  %v728_v44 = vpop.f32.mrf.mxu0  ;;  %7191 = vst [vmem:[#allocation97_spill] sm:$0xff] %v5182_v53  ;;  %v4157_v53 = vld [vmem:[%s4495_s13 + $0x118] sm:$0xff] }
 0x197   : > { %2466 = vperm.xlu1 %3795, %v4146_v52   ;;  %2486 = vperm.xlu0 %3794, %v4147_v63   ;;  %v888_v33 = vpack.c.bf16 %v854_v55, %v853_v28  ;;  %v729_v52 = vadd.f32 %v728_v44, %v4935_v18  ;;  %v4151_v28 = vld [vmem:[%s4495_s13 + $0xe8] sm:$0xff] }
 0x198   : > { %v5175_v16 = vpop.f32.mrf.mxu0 }
 0x199   : > { %v5169_v59 = vpop.permute.xlu1 %2181  ;;  %7189 = vst [vmem:[#allocation95_spill] sm:$0xff] %v5175_v16  ;;  %3620 = vmatmul.mubr.bf16.gmra.mxu1 %v888_v33  ;;  %v4152_v16 = vld [vmem:[%s4495_s13 + $0xd0] sm:$0xff] }
 0x19a   : > { %7187 = vst [vmem:[#allocation93_spill] sm:$0xff] %v5169_v59  ;;  %v732_v56 = vpop.f32.mrf.mxu0  ;;  %v4150_v59 = vld [vmem:[%s4495_s13 + $0xc0] sm:$0xff] }
 0x19b   : > { %2474 = vperm.xlu1 %3795, %v4148_v47   ;;  %2494 = vperm.xlu0 %3794, %v4149_v54   ;;  %v733_v63 = vadd.f32 %v732_v56, %v4935_v18  ;;  %v855_v54 = vmax.f32 %v729_v52, 0.0  ;;  %v5196_v52 = vpop.permute.xlu0 %2036 }
 0x19c   : > { %v5185_v47 = vpop.f32.mrf.mxu0  ;;  %7196 = vst [vmem:[#allocation102_spill] sm:$0xff] %v5196_v52 }
 0x19d   : > { %v5178_v36 = vpop.permute.xlu1 %2189  ;;  %7192 = vst [vmem:[#allocation98_spill] sm:$0xff] %v5185_v47  ;;  %v856_v55 = vmax.f32 %v733_v63, 0.0  ;;  %v4154_v47 = vld [vmem:[%s4495_s13 + $0xe0] sm:$0xff] }
 0x19e   : > { %7190 = vst [vmem:[#allocation96_spill] sm:$0xff] %v5178_v36  ;;  %v738_v33 = vpop.f32.mrf.mxu0 }
 0x19f   : > { %2482 = vperm.xlu1 %3795, %v4150_v59   ;;  %2502 = vperm.xlu0 %3794, %v4151_v28   ;;  %v889_v36 = vpack.c.bf16 %v856_v55, %v855_v54  ;;  %v739_v59 = vadd.f32 %v738_v33, %v4935_v18  ;;  %v4155_v54 = vld [vmem:[%s4495_s13 + $0x108] sm:$0xff]  ;;  %v5206_v52 = vpop.permute.xlu0 %2044 }
 0x1a0   : > { %v5191_v56 = vpop.f32.mrf.mxu0  ;;  %7199 = vst [vmem:[#allocation105_spill] sm:$0xff] %v5206_v52  ;;  %v4161_v52 = vld [vmem:[%s4495_s13 + $0x138] sm:$0xff] }
 0x1a1   : > { %v5187_v44 = vpop.permute.xlu1 %2197  ;;  %7194 = vst [vmem:[#allocation100_spill] sm:$0xff] %v5191_v56  ;;  %3623 = vmatprep.mubr.bf16.mxu1 %v889_v36  ;;  %v4156_v56 = vld [vmem:[%s4495_s13 + $0xf0] sm:$0xff] }
 0x1a2   : > { %7193 = vst [vmem:[#allocation99_spill] sm:$0xff] %v5187_v44  ;;  %v742_v63 = vpop.f32.mrf.mxu0 }
 0x1a3   : > { %2490 = vperm.xlu1 %3795, %v4152_v16   ;;  %2510 = vperm.xlu0 %3794, %v4153_v7   ;;  %v743_v44 = vadd.f32 %v742_v63, %v4935_v18  ;;  %v857_v7 = vmax.f32 %v739_v59, 0.0 }
 0x1a4   : > { %v5201_v16 = vpop.f32.mrf.mxu0 }
 0x1a5   : > { %v5194_v28 = vpop.permute.xlu1 %2205  ;;  %7197 = vst [vmem:[#allocation103_spill] sm:$0xff] %v5201_v16  ;;  %v858_v55 = vmax.f32 %v743_v44, 0.0  ;;  %v4160_v16 = vld [vmem:[%s4495_s13 + $0x110] sm:$0xff] }
 0x1a6   : > { %7195 = vst [vmem:[#allocation101_spill] sm:$0xff] %v5194_v28  ;;  %v748_v36 = vpop.f32.mrf.mxu0 }
 0x1a7   : > { %2498 = vperm.xlu1 %3795, %v4154_v47   ;;  %2518 = vperm.xlu0 %3794, %v4155_v54   ;;  %v890_v28 = vpack.c.bf16 %v858_v55, %v857_v7  ;;  %v749_v47 = vadd.f32 %v748_v36, %v4935_v18  ;;  %v4159_v7 = vld [vmem:[%s4495_s13 + $0x128] sm:$0xff]  ;;  %v5221_v36 = vpop.permute.xlu0 %2052 }
 0x1a8   : > { %v5209_v63 = vpop.f32.mrf.mxu0  ;;  %7204 = vst [vmem:[#allocation110_spill] sm:$0xff] %v5221_v36  ;;  %v4165_v36 = vld [vmem:[%s4495_s13 + $0x158] sm:$0xff] }
 0x1a9   : > { %v5203_v33 = vpop.permute.xlu1 %2213  ;;  %7200 = vst [vmem:[#allocation106_spill] sm:$0xff] %v5209_v63  ;;  %3624 = vmatmul.mubr.bf16.gmra.mxu1 %v890_v28  ;;  %v859_v55 = vmax.f32 %v749_v47, 0.0 }
 0x1aa   : > { %7198 = vst [vmem:[#allocation104_spill] sm:$0xff] %v5203_v33  ;;  %v752_v44 = vpop.f32.mrf.mxu0  ;;  %v4158_v33 = vld [vmem:[%s4495_s13 + $0x100] sm:$0xff] }
 0x1ab   : > { %2506 = vperm.xlu1 %3795, %v4156_v56   ;;  %2526 = vperm.xlu0 %3794, %v4157_v53   ;;  %v753_v54 = vadd.f32 %v752_v44, %v4935_v18 }
 0x1ac   : > { %v5217_v56 = vpop.f32.mrf.mxu0 }
 0x1ad   : > { %v5212_v59 = vpop.permute.xlu1 %2221  ;;  %7202 = vst [vmem:[#allocation108_spill] sm:$0xff] %v5217_v56  ;;  %v860_v53 = vmax.f32 %v753_v54, 0.0  ;;  %v5232_v56 = vpop.permute.xlu0 %2060 }
 0x1ae   : > { %7201 = vst [vmem:[#allocation107_spill] sm:$0xff] %v5212_v59  ;;  %v758_v28 = vpop.f32.mrf.mxu0  ;;  %7207 = vst [vmem:[#allocation113_spill] sm:$0xff] %v5232_v56  ;;  %v4169_v56 = vld [vmem:[%s4495_s13 + $0x178] sm:$0xff] }
 0x1af   : > { %2514 = vperm.xlu1 %3795, %v4158_v33   ;;  %2534 = vperm.xlu0 %3794, %v4159_v7   ;;  %v891_v59 = vpack.c.bf16 %v860_v53, %v859_v55  ;;  %v759_v33 = vadd.f32 %v758_v28, %v4935_v18  ;;  %v4163_v55 = vld [vmem:[%s4495_s13 + $0x148] sm:$0xff] }
 0x1b0   : > { %v5225_v44 = vpop.f32.mrf.mxu0 }
 0x1b1   : > { %v5219_v63 = vpop.permute.xlu1 %2229  ;;  %7205 = vst [vmem:[#allocation111_spill] sm:$0xff] %v5225_v44  ;;  %3627 = vmatprep.mubr.bf16.mxu1 %v891_v59  ;;  %v4164_v44 = vld [vmem:[%s4495_s13 + $0x130] sm:$0xff] }
 0x1b2   : > { %7203 = vst [vmem:[#allocation109_spill] sm:$0xff] %v5219_v63  ;;  %v762_v54 = vpop.f32.mrf.mxu0  ;;  %v4162_v63 = vld [vmem:[%s4495_s13 + $0x120] sm:$0xff] }
 0x1b3   : > { %2522 = vperm.xlu1 %3795, %v4160_v16   ;;  %2542 = vperm.xlu0 %3794, %v4161_v52   ;;  %v763_v7 = vadd.f32 %v762_v54, %v4935_v18  ;;  %v861_v52 = vmax.f32 %v759_v33, 0.0  ;;  %v5246_v33 = vpop.permute.xlu0 %2068 }
 0x1b4   : > { %v5235_v16 = vpop.f32.mrf.mxu0  ;;  %7212 = vst [vmem:[#allocation118_spill] sm:$0xff] %v5246_v33 }
 0x1b5   : > { %v5228_v47 = vpop.permute.xlu1 %2237  ;;  %7208 = vst [vmem:[#allocation114_spill] sm:$0xff] %v5235_v16  ;;  %v862_v53 = vmax.f32 %v763_v7, 0.0 }
 0x1b6   : > { %7206 = vst [vmem:[#allocation112_spill] sm:$0xff] %v5228_v47  ;;  %v768_v59 = vpop.f32.mrf.mxu0 }
 0x1b7   : > { %2530 = vperm.xlu1 %3795, %v4162_v63   ;;  %2550 = vperm.xlu0 %3794, %v4163_v55   ;;  %v892_v47 = vpack.c.bf16 %v862_v53, %v861_v52  ;;  %v769_v63 = vadd.f32 %v768_v59, %v4935_v18  ;;  %v4167_v52 = vld [vmem:[%s4495_s13 + $0x168] sm:$0xff]  ;;  %v5256_v33 = vpop.permute.xlu0 %2076 }
 0x1b8   : > { %v5241_v54 = vpop.f32.mrf.mxu0  ;;  %7215 = vst [vmem:[#allocation121_spill] sm:$0xff] %v5256_v33 }
 0x1b9   : > { %v5237_v28 = vpop.permute.xlu1 %2245  ;;  %7210 = vst [vmem:[#allocation116_spill] sm:$0xff] %v5241_v54  ;;  %3628 = vmatmul.mubr.bf16.gmra.mxu1 %v892_v47 }
 0x1ba   : > { %7209 = vst [vmem:[#allocation115_spill] sm:$0xff] %v5237_v28  ;;  %v772_v7 = vpop.f32.mrf.mxu0  ;;  %v4166_v28 = vld [vmem:[%s4495_s13 + $0x140] sm:$0xff] }
 0x1bb   : > { %2538 = vperm.xlu1 %3795, %v4164_v44   ;;  %2558 = vperm.xlu0 %3794, %v4165_v36   ;;  %v773_v16 = vadd.f32 %v772_v7, %v4935_v18  ;;  %v863_v36 = vmax.f32 %v769_v63, 0.0 }
 0x1bc   : > { %v5251_v44 = vpop.f32.mrf.mxu0 }
 0x1bd   : > { %v5244_v55 = vpop.permute.xlu1 %2253  ;;  %7213 = vst [vmem:[#allocation119_spill] sm:$0xff] %v5251_v44  ;;  %v864_v53 = vmax.f32 %v773_v16, 0.0  ;;  %v4170_v44 = vld [vmem:[%s4495_s13 + $0x160] sm:$0xff] }
 0x1be   : > { %7211 = vst [vmem:[#allocation117_spill] sm:$0xff] %v5244_v55  ;;  %v778_v47 = vpop.f32.mrf.mxu0  ;;  %v4168_v55 = vld [vmem:[%s4495_s13 + $0x150] sm:$0xff] }
 0x1bf   : > { %2546 = vperm.xlu1 %3795, %v4166_v28   ;;  %2566 = vperm.xlu0 %3794, %v4167_v52   ;;  %v893_v54 = vpack.c.bf16 %v864_v53, %v863_v36  ;;  %v779_v28 = vadd.f32 %v778_v47, %v4935_v18 }
 0x1c0   : > { %v5259_v7 = vpop.f32.mrf.mxu0 }
 0x1c1   : > { %v5253_v59 = vpop.permute.xlu1 %2261  ;;  %7216 = vst [vmem:[#allocation122_spill] sm:$0xff] %v5259_v7  ;;  %3631 = vmatprep.mubr.bf16.mxu1 %v893_v54 }
 0x1c2   : > { %7214 = vst [vmem:[#allocation120_spill] sm:$0xff] %v5253_v59  ;;  %v782_v63 = vpop.f32.mrf.mxu0 }
 0x1c3   : > { %2554 = vperm.xlu1 %3795, %v4168_v55   ;;  %2574 = vperm.xlu0 %3794, %v4169_v56   ;;  %v783_v16 = vadd.f32 %v782_v63, %v4935_v18  ;;  %v865_v55 = vmax.f32 %v779_v28, 0.0 }
 0x1c4   : > { %v5266_v36 = vpop.f32.mrf.mxu0 }
 0x1c5   : > { %v5262_v52 = vpop.permute.xlu1 %2269  ;;  %7218 = vst [vmem:[#allocation124_spill] sm:$0xff] %v5266_v36  ;;  %v866_v53 = vmax.f32 %v783_v16, 0.0 }
 0x1c6   : > { %7217 = vst [vmem:[#allocation123_spill] sm:$0xff] %v5262_v52  ;;  %v788_v33 = vpop.f32.mrf.mxu0 }
 0x1c7   : > { %2562 = vperm.xlu1 %3795, %v4170_v44   ;;  %v894_v56 = vpack.c.bf16 %v866_v53, %v865_v55  ;;  %v789_v54 = vadd.f32 %v788_v33, %v4935_v18 }
 0x1c8   : > { %v5271_v7 = vpop.f32.mrf.mxu0 }
 0x1c9   : > { %v5268_v59 = vpop.permute.xlu1 %2277  ;;  %7220 = vst [vmem:[#allocation126_spill] sm:$0xff] %v5271_v7  ;;  %3632 = vmatmul.mubr.bf16.gmra.mxu1 %v894_v56  ;;  %v867_v28 = vmax.f32 %v789_v54, 0.0  ;;  %v7226_v7 = vlaneseq }
 0x1ca   : > { %7219 = vst [vmem:[#allocation125_spill] sm:$0xff] %v5268_v59  ;;  %v792_v63 = vpop.f32.mrf.mxu0 }
 0x1cb   : > { %2570 = vperm.xlu1 %3795, %v4171_v60   ;;  %v793_v44 = vadd.f32 %v792_v63, %v4935_v18 }
 0x1cc   : > { %v5277_v52 = vpop.f32.mrf.mxu0 }
 0x1cd   : > { %v5274_v47 = vpop.permute.xlu1 %2285  ;;  %7222 = vst [vmem:[#allocation128_spill] sm:$0xff] %v5277_v52  ;;  %v868_v16 = vmax.f32 %v793_v44, 0.0 }
 0x1ce   : > { %7221 = vst [vmem:[#allocation127_spill] sm:$0xff] %v5274_v47  ;;  %v798_v59 = vpop.f32.mrf.mxu0  ;;  %v5287_v47 = vand.u32 127, %v7226_v7 }
 0x1cf   : > { %v895_v55 = vpack.c.bf16 %v868_v16, %v867_v28  ;;  %v799_v60 = vadd.f32 %v798_v59, %v4935_v18 }
 0x1d0   : > { %v5281_v53 = vpop.f32.mrf.mxu0  ;;  %vm1613_vm0 = vcmp.eq.s32.totalorder %v5287_v47, 0  ;;  %vm1902_vm1 = vcmp.eq.s32.totalorder %v5287_v47, 1  ;;  %vm2143_vm2 = vcmp.eq.s32.totalorder %v5287_v47, 2  ;;  %vm2384_vm3 = vcmp.eq.s32.totalorder %v5287_v47, 3 }
 0x1d1   : > { %v5279_v36 = vpop.permute.xlu1 %2293  ;;  %7224 = vst [vmem:[#allocation130_spill] sm:$0xff] %v5281_v53  ;;  %3635 = vmatprep.mubr.bf16.mxu1 %v895_v55  ;;  %v869_v54 = vmax.f32 %v799_v60, 0.0  ;;  %v1899_v59 = vsel %vm1613_vm0, %v4914_v15, 0.5  ;;  %v2085_v55 = vpop.permute.xlu0 %2084  ;;  %v1901_v15 = vsel %vm1613_vm0, %v4921_v19, 0.5  ;;  %vm3249_vm4 = vcmp.lt.s32.totalorder %v5287_v47, 4 }
 0x1d2   : > { %7223 = vst [vmem:[#allocation129_spill] sm:$0xff] %v5279_v36  ;;  %v802_v56 = vpop.f32.mrf.mxu0 }
 0x1d3   : > { %v803_v63 = vadd.f32 %v802_v56, %v4935_v18 }
 0x1d4   : > { %v5290_v52 = vpop.f32.mrf.mxu0 }
 0x1d5   : > { %v5284_v33 = vpop.permute.xlu1 %2301  ;;  %7227 = vst [vmem:[#allocation132_spill] sm:$0xff] %v5290_v52  ;;  %v870_v44 = vmax.f32 %v803_v63, 0.0  ;;  %v2140_v63 = vsel %vm1902_vm1, %v2085_v55, %v1899_v59  ;;  %v2093_v52 = vpop.permute.xlu0 %2092 }
 0x1d6   : > { %7225 = vst [vmem:[#allocation131_spill] sm:$0xff] %v5284_v33  ;;  %v808_v28 = vpop.f32.mrf.mxu0  ;;  %v2142_v59 = vsel %vm1902_vm1, %v2093_v52, %v1901_v15 }
 0x1d7   : > { %v896_v16 = vpack.c.bf16 %v870_v44, %v869_v54  ;;  %v809_v7 = vadd.f32 %v808_v28, %v4935_v18 }
 0x1d8   : > { %v5298_v53 = vpop.f32.mrf.mxu0 }
 0x1d9   : > { %v5292_v36 = vpop.permute.xlu1 %2309  ;;  %7229 = vst [vmem:[#allocation134_spill] sm:$0xff] %v5298_v53  ;;  %3636 = vmatmul.mubr.bf16.gmra.mxu1 %v896_v16  ;;  %v871_v28 = vmax.f32 %v809_v7, 0.0 }
 0x1da   : > { %7228 = vst [vmem:[#allocation133_spill] sm:$0xff] %v5292_v36  ;;  %v812_v60 = vpop.f32.mrf.mxu0 }
 0x1db   : > { %v813_v54 = vadd.f32 %v812_v60, %v4935_v18 }
 0x1dc   : > { %v5310_v44 = vpop.f32.mrf.mxu0 }
 0x1dd   : > { %v5301_v56 = vpop.permute.xlu1 %2317  ;;  %7231 = vst [vmem:[#allocation136_spill] sm:$0xff] %v5310_v44  ;;  %v872_v16 = vmax.f32 %v813_v54, 0.0 }
 0x1de   : > { %7230 = vst [vmem:[#allocation135_spill] sm:$0xff] %v5301_v56  ;;  %v818_v56 = vpop.f32.mrf.mxu0 }
 0x1df   : > { %v897_v55 = vpack.c.bf16 %v872_v16, %v871_v28  ;;  %v819_v19 = vadd.f32 %v818_v56, %v4935_v18  ;;  %v5330_v56 = vld [vmem:[%s7092_s5] ss:$0 sm:$0xff] }
 0x1e0   : > { %v5319_v60 = vpop.f32.mrf.mxu0 }
 0x1e1   : > { %v2326_v53 = vpop.permute.xlu1 %2325  ;;  %7233 = vst [vmem:[#allocation138_spill] sm:$0xff] %v5319_v60  ;;  %3639 = vmatprep.mubr.bf16.mxu1 %v897_v55  ;;  %v873_v42 = vmax.f32 %v819_v19, 0.0 }
 0x1e2   : > { %v5315_v36 = vsel %vm2143_vm2, %v2326_v53, %v2140_v63  ;;  %v822_v33 = vpop.f32.mrf.mxu0 }
 0x1e3   : > { %7232 = vst [vmem:[#allocation137_spill] sm:$0xff] %v5315_v36  ;;  %v823_v54 = vadd.f32 %v822_v33, %v4935_v18 }
 0x1e5   : > { %v2334_v44 = vpop.permute.xlu1 %2333  ;;  %v874_v53 = vmax.f32 %v823_v54, 0.0 }
 0x1e6   : > { %v5324_v7 = vsel %vm2143_vm2, %v2334_v44, %v2142_v59 }
 0x1e7   : > { %7234 = vst [vmem:[#allocation139_spill] sm:$0xff] %v5324_v7  ;;  %v898_v63 = vpack.c.bf16 %v874_v53, %v873_v42 }
 0x1e9   : > { %3640 = vmatmul.mubr.bf16.gmra.mxu1 %v898_v63 }
 0x1f5   : > { %v3597_v36 = vpop.f32.mrf.mxu1 }
 0x1f6   : > { %v1013_v59 = vadd.f32 %v3597_v36, %v5330_v56 }
 0x1f7   : > { %v1004_v52 = vpop.f32.mrf.mxu1 }
 0x1f8   : > { %v1005_v44 = vadd.f32 %v5330_v56, %v1004_v52  ;;  %v1197_v54 = vmax.f32 %v1013_v59, 0.0 }
 0x1f9   : > { %v3598_v15 = vpop.f32.mrf.mxu1 }
 0x1fa   : > { %v1016_v28 = vadd.f32 %v3598_v15, %v5330_v56  ;;  %v1195_v42 = vmax.f32 %v1005_v44, 0.0 }
 0x1fb   : > { %v1007_v16 = vpop.f32.mrf.mxu1 }
 0x1fc   : > { %v1008_v18 = vadd.f32 %v5330_v56, %v1007_v16  ;;  %v1198_v33 = vmax.f32 %v1016_v28, 0.0 }
 0x1fe   : > { %v1196_v55 = vmax.f32 %v1008_v18, 0.0  ;;  %v1244_v63 = vpack.c.bf16 %v1198_v33, %v1197_v54 }
 0x200   : > { %v1243_v53 = vpack.c.bf16 %v1196_v55, %v1195_v42 }
 0x202   : > { %3659 = vmatprep.mubr.bf16.mxu1 %v1243_v53 }
 0x203   : > { %3660 = vmatmul.mubr.bf16.vlgmr.msra.gmra.mxu1 %v1244_v63  ;;  %v5341_v63 = vpop.permute.xlu0 %2149 }
 0x204   : > { %7235 = vst [vmem:[#allocation140_spill] sm:$0xff] %v5341_v63 }
 0x207   : > { %v3601_v19 = vpop.f32.mrf.mxu1 }
 0x208   : > { %v1029_v36 = vadd.f32 %v3601_v19, %v5330_v56 }
 0x209   : > { %v1020_v60 = vpop.f32.mrf.mxu1 }
 0x20a   : > { %v1021_v52 = vadd.f32 %v5330_v56, %v1020_v60  ;;  %v1201_v59 = vmax.f32 %v1029_v36, 0.0 }
 0x20b   : > { %v3602_v7 = vpop.f32.mrf.mxu1 }
 0x20c   : > { %v1032_v15 = vadd.f32 %v3602_v7, %v5330_v56  ;;  %v1199_v44 = vmax.f32 %v1021_v52, 0.0 }
 0x20d   : > { %v1023_v20 = vpop.f32.mrf.mxu1 }
 0x20e   : > { %v1024_v16 = vadd.f32 %v5330_v56, %v1023_v20  ;;  %v1202_v28 = vmax.f32 %v1032_v15, 0.0 }
 0x210   : > { %v1200_v18 = vmax.f32 %v1024_v16, 0.0  ;;  %v1246_v33 = vpack.c.bf16 %v1202_v28, %v1201_v59 }
 0x212   : > { %v1245_v42 = vpack.c.bf16 %v1200_v18, %v1199_v44  ;;  %v5346_v44 = vpop.permute.xlu0 %2161 }
 0x213   : > { %7236 = vst [vmem:[#allocation141_spill] sm:$0xff] %v5346_v44 }
 0x214   : > { %3663 = vmatprep.mubr.bf16.mxu1 %v1245_v42 }
 0x215   : > { %3664 = vmatmul.mubr.bf16.gmra.mxu1 %v1246_v33 }
 0x216   : > { %v5348_v33 = vpop.permute.xlu0 %2169 }
 0x217   : > { %v3605_v1 = vpop.f32.mrf.mxu1  ;;  %7237 = vst [vmem:[#allocation142_spill] sm:$0xff] %v5348_v33 }
 0x218   : > { %v1045_v19 = vadd.f32 %v3605_v1, %v5330_v56 }
 0x219   : > { %v1036_v55 = vpop.f32.mrf.mxu1 }
 0x21a   : > { %v1037_v60 = vadd.f32 %v5330_v56, %v1036_v55  ;;  %v1205_v28 = vmax.f32 %v1045_v19, 0.0  ;;  %v5351_v63 = vpop.permute.xlu0 %2177 }
 0x21b   : > { %v3606_v54 = vpop.f32.mrf.mxu1  ;;  %7238 = vst [vmem:[#allocation143_spill] sm:$0xff] %v5351_v63 }
 0x21c   : > { %v1048_v7 = vadd.f32 %v3606_v54, %v5330_v56  ;;  %v1203_v52 = vmax.f32 %v1037_v60, 0.0 }
 0x21d   : > { %v1039_v53 = vpop.f32.mrf.mxu1 }
 0x21e   : > { %v1040_v20 = vadd.f32 %v5330_v56, %v1039_v53  ;;  %v1206_v15 = vmax.f32 %v1048_v7, 0.0 }
 0x220   : > { %v1204_v36 = vmax.f32 %v1040_v20, 0.0  ;;  %v1248_v59 = vpack.c.bf16 %v1206_v15, %v1205_v28 }
 0x222   : > { %v1247_v18 = vpack.c.bf16 %v1204_v36, %v1203_v52 }
 0x224   : > { %3667 = vmatprep.mubr.bf16.mxu1 %v1247_v18  ;;  %v5356_v18 = vpop.permute.xlu0 %2185 }
 0x225   : > { %3668 = vmatmul.mubr.bf16.gmra.mxu1 %v1248_v59  ;;  %7239 = vst [vmem:[#allocation144_spill] sm:$0xff] %v5356_v18 }
 0x227   : > { %v3609_v16 = vpop.f32.mrf.mxu1 }
 0x228   : > { %v1061_v60 = vadd.f32 %v3609_v16, %v5330_v56  ;;  %v5358_v63 = vpop.permute.xlu0 %2193 }
 0x229   : > { %v1052_v42 = vpop.f32.mrf.mxu1  ;;  %7240 = vst [vmem:[#allocation145_spill] sm:$0xff] %v5358_v63 }
 0x22a   : > { %v1053_v1 = vadd.f32 %v5330_v56, %v1052_v42  ;;  %v1209_v28 = vmax.f32 %v1061_v60, 0.0 }
 0x22b   : > { %v3610_v54 = vpop.f32.mrf.mxu1 }
 0x22c   : > { %v1064_v53 = vadd.f32 %v3610_v54, %v5330_v56  ;;  %v1207_v15 = vmax.f32 %v1053_v1, 0.0 }
 0x22d   : > { %v1055_v55 = vpop.f32.mrf.mxu1 }
 0x22e   : > { %v1056_v20 = vadd.f32 %v5330_v56, %v1055_v55  ;;  %v1210_v19 = vmax.f32 %v1064_v53, 0.0 }
 0x230   : > { %v1208_v52 = vmax.f32 %v1056_v20, 0.0  ;;  %v1250_v33 = vpack.c.bf16 %v1210_v19, %v1209_v28  ;;  %v5363_v20 = vpop.permute.xlu0 %2201 }
 0x231   : > { %7241 = vst [vmem:[#allocation146_spill] sm:$0xff] %v5363_v20 }
 0x232   : > { %v1249_v59 = vpack.c.bf16 %v1208_v52, %v1207_v15 }
 0x234   : > { %3671 = vmatprep.mubr.bf16.mxu1 %v1249_v59 }
 0x235   : > { %3672 = vmatmul.mubr.bf16.gmra.mxu1 %v1250_v33 }
 0x239   : > { %v3613_v7 = vpop.f32.mrf.mxu1 }
 0x23a   : > { %v1077_v1 = vadd.f32 %v3613_v7, %v5330_v56 }
 0x23b   : > { %v1068_v36 = vpop.f32.mrf.mxu1 }
 0x23c   : > { %v1069_v16 = vadd.f32 %v5330_v56, %v1068_v36  ;;  %v1213_v33 = vmax.f32 %v1077_v1, 0.0  ;;  %v5367_v36 = vpop.permute.xlu0 %2209 }
 0x23d   : > { %v3614_v54 = vpop.f32.mrf.mxu1  ;;  %7242 = vst [vmem:[#allocation147_spill] sm:$0xff] %v5367_v36 }
 0x23e   : > { %v1080_v55 = vadd.f32 %v3614_v54, %v5330_v56  ;;  %v1211_v52 = vmax.f32 %v1069_v16, 0.0 }
 0x23f   : > { %v1071_v42 = vpop.f32.mrf.mxu1 }
 0x240   : > { %v1072_v60 = vadd.f32 %v5330_v56, %v1071_v42  ;;  %v1214_v19 = vmax.f32 %v1080_v55, 0.0  ;;  %v5372_v45 = vpop.permute.xlu0 %2217 }
 0x241   : > { %7243 = vst [vmem:[#allocation148_spill] sm:$0xff] %v5372_v45 }
 0x242   : > { %v1212_v28 = vmax.f32 %v1072_v60, 0.0  ;;  %v1252_v18 = vpack.c.bf16 %v1214_v19, %v1213_v33 }
 0x244   : > { %v1251_v63 = vpack.c.bf16 %v1212_v28, %v1211_v52 }
 0x246   : > { %3675 = vmatprep.mubr.bf16.mxu1 %v1251_v63 }
 0x247   : > { %3676 = vmatmul.mubr.bf16.gmra.mxu1 %v1252_v18  ;;  %v5376_v18 = vpop.permute.xlu0 %2225 }
 0x248   : > { %7244 = vst [vmem:[#allocation149_spill] sm:$0xff] %v5376_v18  ;;  %v7265_v18 = vld [vmem:[#allocation23_spill] sm:$0xff] }
 0x249   : > { %v3617_v44 = vpop.f32.mrf.mxu1  ;;  %v5485_v45 = vsel %vm1613_vm0, %v7265_v18, 0.5  ;;  %v7272_v18 = vld [vmem:[#allocation27_spill] sm:$0xff] }
 0x24a   : > { %v1093_v42 = vadd.f32 %v3617_v44, %v5330_v56  ;;  %v5506_v58 = vsel %vm1613_vm0, %v7272_v18, 0.5 }
 0x24b   : > { %v1084_v53 = vpop.f32.mrf.mxu1 }
 0x24c   : > { %v1085_v13 = vadd.f32 %v5330_v56, %v1084_v53  ;;  %v1217_v1 = vmax.f32 %v1093_v42, 0.0 }
 0x24d   : > { %v3618_v15 = vpop.f32.mrf.mxu1 }
 0x24e   : > { %v1096_v54 = vadd.f32 %v3618_v15, %v5330_v56  ;;  %v1215_v20 = vmax.f32 %v1085_v13, 0.0 }
 0x24f   : > { %v1087_v59 = vpop.f32.mrf.mxu1 }
 0x250   : > { %v1088_v7 = vadd.f32 %v5330_v56, %v1087_v59  ;;  %v1218_v16 = vmax.f32 %v1096_v54, 0.0 }
 0x252   : > { %v1216_v55 = vmax.f32 %v1088_v7, 0.0  ;;  %v1254_v53 = vpack.c.bf16 %v1218_v16, %v1217_v1 }
 0x254   : > { %v1253_v60 = vpack.c.bf16 %v1216_v55, %v1215_v20  ;;  %v5380_v55 = vpop.permute.xlu0 %2233 }
 0x255   : > { %7245 = vst [vmem:[#allocation150_spill] sm:$0xff] %v5380_v55 }
 0x256   : > { %3679 = vmatprep.mubr.bf16.mxu1 %v1253_v60 }
 0x257   : > { %3680 = vmatmul.mubr.bf16.gmra.mxu1 %v1254_v53 }
 0x258   : > { %v5382_v1 = vpop.permute.xlu0 %2241 }
 0x259   : > { %v3621_v19 = vpop.f32.mrf.mxu1  ;;  %7246 = vst [vmem:[#allocation151_spill] sm:$0xff] %v5382_v1 }
 0x25a   : > { %v1109_v13 = vadd.f32 %v3621_v19, %v5330_v56 }
 0x25b   : > { %v1100_v52 = vpop.f32.mrf.mxu1 }
 0x25c   : > { %v1101_v15 = vadd.f32 %v5330_v56, %v1100_v52  ;;  %v1221_v7 = vmax.f32 %v1109_v13, 0.0 }
 0x25d   : > { %v3622_v63 = vpop.f32.mrf.mxu1 }
 0x25e   : > { %v1112_v28 = vadd.f32 %v3622_v63, %v5330_v56  ;;  %v1219_v59 = vmax.f32 %v1101_v15, 0.0 }
 0x25f   : > { %v1103_v44 = vpop.f32.mrf.mxu1 }
 0x260   : > { %v1104_v20 = vadd.f32 %v5330_v56, %v1103_v44  ;;  %v1222_v33 = vmax.f32 %v1112_v28, 0.0  ;;  %v5388_v44 = vpop.permute.xlu0 %2249 }
 0x261   : > { %7247 = vst [vmem:[#allocation152_spill] sm:$0xff] %v5388_v44 }
 0x262   : > { %v1220_v54 = vmax.f32 %v1104_v20, 0.0  ;;  %v1256_v16 = vpack.c.bf16 %v1222_v33, %v1221_v7 }
 0x264   : > { %v1255_v42 = vpack.c.bf16 %v1220_v54, %v1219_v59 }
 0x266   : > { %3683 = vmatprep.mubr.bf16.mxu1 %v1255_v42 }
 0x267   : > { %3684 = vmatmul.mubr.bf16.gmra.mxu1 %v1256_v16  ;;  %v5390_v16 = vpop.permute.xlu0 %2257 }
 0x268   : > { %7248 = vst [vmem:[#allocation153_spill] sm:$0xff] %v5390_v16 }
 0x269   : > { %v3625_v60 = vpop.f32.mrf.mxu1 }
 0x26a   : > { %v1125_v28 = vadd.f32 %v3625_v60, %v5330_v56 }
 0x26b   : > { %v1116_v53 = vpop.f32.mrf.mxu1 }
 0x26c   : > { %v1117_v19 = vadd.f32 %v5330_v56, %v1116_v53  ;;  %v1225_v54 = vmax.f32 %v1125_v28, 0.0 }
 0x26d   : > { %v3626_v52 = vpop.f32.mrf.mxu1 }
 0x26e   : > { %v1128_v63 = vadd.f32 %v3626_v52, %v5330_v56  ;;  %v1223_v33 = vmax.f32 %v1117_v19, 0.0  ;;  %v5392_v52 = vpop.permute.xlu0 %2265 }
 0x26f   : > { %v1119_v15 = vpop.f32.mrf.mxu1  ;;  %7249 = vst [vmem:[#allocation154_spill] sm:$0xff] %v5392_v52 }
 0x270   : > { %v1120_v13 = vadd.f32 %v5330_v56, %v1119_v15  ;;  %v1226_v20 = vmax.f32 %v1128_v63, 0.0 }
 0x272   : > { %v1224_v59 = vmax.f32 %v1120_v13, 0.0  ;;  %v1258_v42 = vpack.c.bf16 %v1226_v20, %v1225_v54 }
 0x274   : > { %v1257_v7 = vpack.c.bf16 %v1224_v59, %v1223_v33  ;;  %v5398_v59 = vpop.permute.xlu0 %2273 }
 0x275   : > { %7250 = vst [vmem:[#allocation155_spill] sm:$0xff] %v5398_v59  ;;  %v7264_v59 = vld [vmem:[#allocation22_spill] sm:$0xff] }
 0x276   : > { %3687 = vmatprep.mubr.bf16.mxu1 %v1257_v7 }
 0x277   : > { %3688 = vmatmul.mubr.bf16.gmra.mxu1 %v1258_v42 }
 0x278   : > { %v5400_v52 = vpop.permute.xlu0 %2281 }
 0x279   : > { %v3629_v53 = vpop.f32.mrf.mxu1  ;;  %7251 = vst [vmem:[#allocation156_spill] sm:$0xff] %v5400_v52 }
 0x27a   : > { %v1141_v63 = vadd.f32 %v3629_v53, %v5330_v56 }
 0x27b   : > { %v1132_v1 = vpop.f32.mrf.mxu1 }
 0x27c   : > { %v1133_v55 = vadd.f32 %v5330_v56, %v1132_v1  ;;  %v1229_v54 = vmax.f32 %v1141_v63, 0.0 }
 0x27d   : > { %v3630_v60 = vpop.f32.mrf.mxu1 }
 0x27e   : > { %v1144_v15 = vadd.f32 %v3630_v60, %v5330_v56  ;;  %v1227_v20 = vmax.f32 %v1133_v55, 0.0 }
 0x27f   : > { %v1135_v19 = vpop.f32.mrf.mxu1 }
 0x280   : > { %v1136_v28 = vadd.f32 %v5330_v56, %v1135_v19  ;;  %v1230_v13 = vmax.f32 %v1144_v15, 0.0  ;;  %v5404_v19 = vpop.permute.xlu0 %2289 }
 0x281   : > { %7252 = vst [vmem:[#allocation157_spill] sm:$0xff] %v5404_v19  ;;  %v7263_v19 = vld [vmem:[#allocation21_spill] sm:$0xff] }
 0x282   : > { %v1228_v33 = vmax.f32 %v1136_v28, 0.0  ;;  %v1260_v42 = vpack.c.bf16 %v1230_v13, %v1229_v54 }
 0x284   : > { %v1259_v7 = vpack.c.bf16 %v1228_v33, %v1227_v20 }
 0x286   : > { %3691 = vmatprep.mubr.bf16.mxu1 %v1259_v7  ;;  %v5408_v7 = vpop.permute.xlu0 %2297 }
 0x287   : > { %3692 = vmatmul.mubr.bf16.gmra.mxu1 %v1260_v42  ;;  %7253 = vst [vmem:[#allocation158_spill] sm:$0xff] %v5408_v7  ;;  %v7262_v7 = vld [vmem:[#allocation20_spill] sm:$0xff] }
 0x289   : > { %v3633_v1 = vpop.f32.mrf.mxu1 }
 0x28a   : > { %v1157_v55 = vadd.f32 %v3633_v1, %v5330_v56  ;;  %v5418_v1 = vsel %vm1613_vm0, %v4759_v51, 0.5 }
 0x28b   : > { %v1148_v16 = vpop.f32.mrf.mxu1 }
 0x28c   : > { %v1149_v53 = vadd.f32 %v5330_v56, %v1148_v16  ;;  %v1233_v33 = vmax.f32 %v1157_v55, 0.0 }
 0x28d   : > { %v3634_v60 = vpop.f32.mrf.mxu1 }
 0x28e   : > { %v1160_v44 = vadd.f32 %v3634_v60, %v5330_v56  ;;  %v1231_v13 = vmax.f32 %v1149_v53, 0.0  ;;  %v5413_v60 = vsel %vm1613_vm0, %v4757_v48, 0.5  ;;  %v5425_v53 = vpop.permute.xlu0 %2305 }
 0x28f   : > { %v1151_v15 = vpop.f32.mrf.mxu1  ;;  %7254 = vst [vmem:[#allocation159_spill] sm:$0xff] %v5425_v53 }
 0x290   : > { %v1152_v63 = vadd.f32 %v5330_v56, %v1151_v15  ;;  %v1234_v28 = vmax.f32 %v1160_v44, 0.0  ;;  %v5423_v44 = vsel %vm1613_vm0, %v4766_v9, 0.5  ;;  %v1855_v15 = vsel %vm1613_vm0, %v4768_v12, 0.5  ;;  %v7259_v12 = vld [vmem:[#allocation17_spill] sm:$0xff] }
 0x292   : > { %v1232_v20 = vmax.f32 %v1152_v63, 0.0  ;;  %v1262_v42 = vpack.c.bf16 %v1234_v28, %v1233_v33  ;;  %v7255_v63 = vld [vmem:[#allocation13_spill] sm:$0xff]  ;;  %v7256_v28 = vld [vmem:[#allocation14_spill] sm:$0xff] }
 0x293   : > { %v5433_v48 = vsel %vm1613_vm0, %v7255_v63, 0.5  ;;  %v5438_v51 = vsel %vm1613_vm0, %v7256_v28, 0.5  ;;  %v7261_v28 = vld [vmem:[#allocation19_spill] sm:$0xff]  ;;  %7266 = vst [vmem:[#allocation13_spill] sm:$0xff] %v5485_v45  ;;  %v7276_v45 = vld [vmem:[#allocation29_spill] sm:$0xff] }
 0x294   : > { %v1261_v54 = vpack.c.bf16 %v1232_v20, %v1231_v13  ;;  %v7257_v13 = vld [vmem:[#allocation15_spill] sm:$0xff]  ;;  %v7258_v20 = vld [vmem:[#allocation16_spill] sm:$0xff] }
 0x295   : > { %v5443_v9 = vsel %vm1613_vm0, %v7257_v13, 0.5  ;;  %v5448_v33 = vsel %vm1613_vm0, %v7258_v20, 0.5  ;;  %v5463_v13 = vsel %vm1613_vm0, %v7261_v28, 0.5  ;;  %v5468_v20 = vsel %vm1613_vm0, %v7262_v7, 0.5  ;;  %v7267_v7 = vld [vmem:[#allocation24_spill] sm:$0xff]  ;;  %7273 = vst [vmem:[#allocation16_spill] sm:$0xff] %v5506_v58 }
 0x296   : > { %3695 = vmatprep.mubr.bf16.mxu1 %v1261_v54  ;;  %v5453_v54 = vsel %vm1613_vm0, %v7259_v12, 0.5  ;;  %v5473_v12 = vsel %vm1613_vm0, %v7263_v19, 0.5  ;;  %v5480_v28 = vsel %vm1613_vm0, %v7264_v59, 0.5  ;;  %v5490_v36 = vsel %vm1613_vm0, %v7267_v7, 0.5  ;;  %v7270_v59 = vld [vmem:[#allocation26_spill] sm:$0xff] }
 0x297   : > { %3696 = vmatmul.mubr.bf16.gmra.mxu1 %v1262_v42  ;;  %v7260_v42 = vld [vmem:[#allocation18_spill] sm:$0xff]  ;;  %v5501_v10 = vsel %vm1613_vm0, %v7270_v59, 0.5 }
 0x298   : > { %v5458_v63 = vsel %vm1613_vm0, %v7260_v42, 0.5  ;;  %7271 = vst [vmem:[#allocation15_spill] sm:$0xff] %v5501_v10  ;;  %v5524_v10 = vpop.permute.xlu0 %2313  ;;  %v7281_v58 = vld [vmem:[#allocation30_spill] sm:$0xff] }
 0x299   : > { %v3637_v16 = vpop.f32.mrf.mxu1  ;;  %7280 = vst [vmem:[#allocation20_spill] sm:$0xff] %v5524_v10  ;;  %v7287_v10 = vld [vmem:[#allocation33_spill] sm:$0xff] }
 0x29a   : > { %v1173_v19 = vadd.f32 %v3637_v16, %v5330_v56  ;;  %v5512_v16 = vsel %vm1613_vm0, %v7274_v34, 0.5  ;;  %v5534_v34 = vsel %vm1613_vm0, %v4852_v25, 0.5  ;;  %v7288_v25 = vld [vmem:[#allocation37_spill] sm:$0xff] }
 0x29b   : > { %v1164_v55 = vpop.f32.mrf.mxu1  ;;  %7275 = vst [vmem:[#allocation17_spill] sm:$0xff] %v5512_v16  ;;  %v7283_v16 = vld [vmem:[#allocation32_spill] sm:$0xff] }
 0x29c   : > { %v1165_v52 = vadd.f32 %v5330_v56, %v1164_v55 }
 0x29d   : > { %v3638_v53 = vpop.f32.mrf.mxu1 }
 0x29e   : > { %v1176_v42 = vadd.f32 %v3638_v53, %v5330_v56  ;;  %v5496_v53 = vsel %vm1613_vm0, %v7268_v35, 0.5  ;;  %v5517_v35 = vsel %vm1613_vm0, %v7276_v45, 0.5  ;;  %v1235_v45 = vmax.f32 %v1165_v52, 0.0 }
 0x29f   : > { %v1167_v55 = vpop.f32.mrf.mxu1  ;;  %7269 = vst [vmem:[#allocation14_spill] sm:$0xff] %v5496_v53  ;;  %7277 = vst [vmem:[#allocation18_spill] sm:$0xff] %v5517_v35  ;;  %v7278_v53 = vld [vmem:[#allocation31_spill] sm:$0xff]  ;;  %v5554_v52 = vsel %vm1613_vm0, %v7288_v25, 0.5  ;;  %v7292_v25 = vld [vmem:[#allocation38_spill] sm:$0xff] }
 0x2a0   : > { %v1168_v7 = vadd.f32 %v5330_v56, %v1167_v55  ;;  %v5522_v59 = vsel %vm1613_vm0, %v7278_v53, 0.5  ;;  %v1238_v18 = vmax.f32 %v1176_v42, 0.0  ;;  %v5529_v55 = vsel %vm1613_vm0, %v7281_v58, 0.5 }
 0x2a1   : > { %7279 = vst [vmem:[#allocation19_spill] sm:$0xff] %v5522_v59  ;;  %7282 = vst [vmem:[#allocation21_spill] sm:$0xff] %v5529_v55  ;;  %v5539_v53 = vsel %vm1613_vm0, %v7283_v16, 0.5  ;;  %v7285_v59 = vld [vmem:[#allocation35_spill] sm:$0xff]  ;;  %v5549_v58 = vsel %vm1613_vm0, %v7287_v10, 0.5  ;;  %v1237_v55 = vmax.f32 %v1173_v19, 0.0 }
 0x2a2   : > { %v1236_v35 = vmax.f32 %v1168_v7, 0.0  ;;  %7284 = vst [vmem:[#allocation22_spill] sm:$0xff] %v5539_v53  ;;  %v5544_v42 = vsel %vm1613_vm0, %v7285_v59, 0.5  ;;  %v7289_v7 = vld [vmem:[#allocation34_spill] sm:$0xff]  ;;  %v5564_v59 = vsel %vm1613_vm0, %v4882_v24, 0.5  ;;  %v5574_v19 = vsel %vm1613_vm0, %v4892_v4, 0.5 }
 0x2a3   : > { %7286 = vst [vmem:[#allocation23_spill] sm:$0xff] %v5544_v42  ;;  %v5559_v16 = vsel %vm1613_vm0, %v7289_v7, 0.5  ;;  %v7291_v42 = vld [vmem:[#allocation36_spill] sm:$0xff]  ;;  %v5579_v7 = vsel %vm1613_vm0, %v7292_v25, 0.5  ;;  %v5584_v24 = vsel %vm1613_vm0, %v4904_v40, 0.5  ;;  %v5594_v4 = vsel %vm1613_vm0, %v4911_v5, 0.5 }
 0x2a4   : > { %7290 = vst [vmem:[#allocation24_spill] sm:$0xff] %v5559_v16  ;;  %v1263_v53 = vpack.c.bf16 %v1236_v35, %v1235_v45  ;;  %v5569_v10 = vsel %vm1613_vm0, %v7291_v42, 0.5  ;;  %v1264_v16 = vpack.c.bf16 %v1238_v18, %v1237_v55  ;;  %v7293_v35 = vld [vmem:[#allocation39_spill] sm:$0xff]  ;;  %v5599_v42 = vsel %vm1613_vm0, %v4886_v0, 0.5  ;;  %v5621_v55 = vpop.permute.xlu0 %2321  ;;  %v7309_v25 = vld [vmem:[#allocation44_spill] sm:$0xff] }
 0x2a5   : > { %v5589_v45 = vsel %vm1613_vm0, %v7293_v35, 0.5  ;;  %v5604_v40 = vsel %vm1613_vm0, %v4923_v6, 0.5  ;;  %v5609_v18 = vsel %vm1613_vm0, %v4895_v62, 0.5  ;;  %v5614_v5 = vsel %vm1613_vm0, %v4931_v41, 0.5  ;;  %7294 = vst [vmem:[#allocation25_spill] sm:$0xff] %v5621_v55  ;;  %v7321_v55 = vld [vmem:[#allocation48_spill] sm:$0xff] }
 0x2a6   : > { %3699 = vmatprep.mubr.bf16.mxu1 %v1263_v53  ;;  %v5619_v0 = vsel %vm1613_vm0, %v4899_v3, 0.5  ;;  %v5626_v6 = vsel %vm1613_vm0, %v4946_v26, 0.5  ;;  %v5631_v62 = vsel %vm1613_vm0, %v4908_v37, 0.5  ;;  %v5636_v41 = vsel %vm1613_vm0, %v4956_v23, 0.5 }
 0x2a7   : > { %3700 = vmatmul.mubr.bf16.gmra.mxu1 %v1264_v16  ;;  %v5641_v3 = vsel %vm1613_vm0, %v4971_v46, 0.5  ;;  %v5646_v26 = vsel %vm1613_vm0, %v4982_v31, 0.5  ;;  %v5651_v37 = vsel %vm1902_vm1, %v4927_v14, %v1855_v15  ;;  %v5657_v23 = vsel %vm1902_vm1, %v4996_v57, %v5418_v1  ;;  %v7295_v14 = vld [vmem:[#allocation12_spill] sm:$0xff]  ;;  %v7308_v16 = vld [vmem:[#allocation15_spill] sm:$0xff] }
 0x2a8   : > { %v5663_v46 = vsel %vm1902_vm1, %v4937_v27, %v5413_v60  ;;  %v5669_v31 = vsel %vm1902_vm1, %v5006_v2, %v5423_v44  ;;  %v5673_v15 = vadd.f32 %v4941_v22, %v7295_v14  ;;  %v5679_v57 = vsel %vm1902_vm1, %v4944_v17, %v5438_v51  ;;  %v7297_v60 = vld [vmem:[#allocation40_spill] sm:$0xff]  ;;  %v5751_v51 = vpop.permute.xlu0 %2329 }
 0x2a9   : > { %v3641_v53 = vpop.f32.mrf.mxu1  ;;  %v5685_v27 = vsel %vm1902_vm1, %v5021_v8, %v5433_v48  ;;  %v5689_v2 = vadd.f32 %v4951_v32, %v7295_v14  ;;  %v5695_v22 = vsel %vm1902_vm1, %v4953_v39, %v5448_v33  ;;  %v5701_v17 = vsel %vm1902_vm1, %v5032_v49, %v5443_v9  ;;  %v7299_v48 = vld [vmem:[#allocation41_spill] sm:$0xff]  ;;  %7301 = vst [vmem:[#allocation29_spill] sm:$0xff] %v5751_v51  ;;  %v7302_v9 = vld [vmem:[#allocation42_spill] sm:$0xff] }
 0x2aa   : > { %v5705_v8 = vadd.f32 %v7297_v60, %v7295_v14  ;;  %v5711_v32 = vsel %vm1902_vm1, %v4962_v43, %v5458_v63  ;;  %v5717_v39 = vsel %vm1902_vm1, %v5046_v29, %v5453_v54  ;;  %v5721_v49 = vadd.f32 %v4967_v38, %v7295_v14  ;;  %v7310_v60 = vld [vmem:[#allocation14_spill] sm:$0xff] }
 0x2ab   : > { %7296 = vst [vmem:[#allocation26_spill] sm:$0xff] %v5689_v2  ;;  %v1180_v1 = vpop.f32.mrf.mxu1  ;;  %v5727_v44 = vsel %vm1902_vm1, %v4969_v61, %v5468_v20  ;;  %v5733_v43 = vsel %vm1902_vm1, %v5056_v11, %v5463_v13  ;;  %v5737_v29 = vadd.f32 %v7299_v48, %v7295_v14  ;;  %v5743_v38 = vsel %vm1902_vm1, %v4978_v50, %v5480_v28  ;;  %v7304_v13 = vld [vmem:[#allocation13_spill] sm:$0xff] }
 0x2ac   : > { %7298 = vst [vmem:[#allocation27_spill] sm:$0xff] %v5721_v49  ;;  %v5749_v61 = vsel %vm1902_vm1, %v5071_v21, %v5473_v12  ;;  %v5755_v33 = vadd.f32 %v7302_v9, %v7295_v14  ;;  %v5761_v54 = vsel %vm1902_vm1, %v4987_v30, %v5490_v36  ;;  %v1181_v50 = vadd.f32 %v5330_v56, %v1180_v1  ;;  %v7305_v21 = vld [vmem:[#allocation65_spill] sm:$0xff]  ;;  %v7306_v12 = vld [vmem:[#allocation43_spill] sm:$0xff]  ;;  %v7311_v1 = vld [vmem:[#allocation70_spill] sm:$0xff] }
 0x2ad   : > { %7300 = vst [vmem:[#allocation28_spill] sm:$0xff] %v5737_v29  ;;  %v3642_v11 = vpop.f32.mrf.mxu1  ;;  %v5769_v20 = vsel %vm1902_vm1, %v7305_v21, %v7304_v13  ;;  %v5773_v28 = vadd.f32 %v7306_v12, %v7295_v14  ;;  %v5779_v30 = vsel %vm1902_vm1, %v7309_v25, %v7308_v16  ;;  %v1189_v36 = vadd.f32 %v3641_v53, %v5330_v56  ;;  %v7314_v13 = vld [vmem:[#allocation17_spill] sm:$0xff]  ;;  %v7315_v21 = vld [vmem:[#allocation46_spill] sm:$0xff]  ;;  %v7316_v53 = vld [vmem:[#allocation16_spill] sm:$0xff] }
 0x2ae   : > { %7303 = vst [vmem:[#allocation31_spill] sm:$0xff] %v5755_v33  ;;  %v1192_v63 = vadd.f32 %v3642_v11, %v5330_v56  ;;  %v5786_v48 = vsel %vm1902_vm1, %v7311_v1, %v7310_v60  ;;  %v7312_v11 = vld [vmem:[#allocation45_spill] sm:$0xff]  ;;  %v5796_v12 = vsel %vm1902_vm1, %v7315_v21, %v7314_v13  ;;  %v7318_v60 = vld [vmem:[#allocation47_spill] sm:$0xff]  ;;  %v7322_v21 = vld [vmem:[#allocation18_spill] sm:$0xff] }
 0x2af   : > { %7307 = vst [vmem:[#allocation30_spill] sm:$0xff] %v5773_v28  ;;  %v1183_v35 = vpop.f32.mrf.mxu1  ;;  %v5790_v9 = vadd.f32 %v7312_v11, %v7295_v14  ;;  %v7317_v25 = vld [vmem:[#allocation73_spill] sm:$0xff]  ;;  %v5807_v1 = vadd.f32 %v7318_v60, %v7295_v14  ;;  %v7320_v11 = vld [vmem:[#allocation19_spill] sm:$0xff] }
 0x2b0   : > { %v1184_v16 = vadd.f32 %v5330_v56, %v1183_v35  ;;  %v5803_v51 = vsel %vm1902_vm1, %v7317_v25, %v7316_v53  ;;  %v5813_v33 = vsel %vm1902_vm1, %v7321_v55, %v7320_v11  ;;  %v1242_v13 = vmax.f32 %v1192_v63, 0.0  ;;  %v7324_v35 = vld [vmem:[#allocation49_spill] sm:$0xff] }
 0x2b1   : > { %7313 = vst [vmem:[#allocation32_spill] sm:$0xff] %v5790_v9  ;;  %7319 = vst [vmem:[#allocation35_spill] sm:$0xff] %v5807_v1  ;;  %v7323_v9 = vld [vmem:[#allocation78_spill] sm:$0xff]  ;;  %v5823_v53 = vadd.f32 %v7324_v35, %v7295_v14  ;;  %v1239_v25 = vmax.f32 %v1181_v50, 0.0  ;;  %v7327_v55 = vld [vmem:[#allocation21_spill] sm:$0xff]  ;;  %v2387_v35 = vpop.permute.xlu0 %2386 }
 0x2b2   : > { %v5819_v56 = vsel %vm1902_vm1, %v7323_v9, %v7322_v21  ;;  %v1240_v60 = vmax.f32 %v1184_v16, 0.0  ;;  %v7326_v1 = vld [vmem:[#allocation50_spill] sm:$0xff]  ;;  %v7328_v63 = vld [vmem:[#allocation81_spill] sm:$0xff]  ;;  %v7329_v9 = vld [vmem:[#allocation51_spill] sm:$0xff] }
 0x2b3   : > { %7325 = vst [vmem:[#allocation33_spill] sm:$0xff] %v5823_v53  ;;  %v5829_v29 = vsel %vm1902_vm1, %v7326_v1, %v5534_v34  ;;  %v5835_v11 = vsel %vm1902_vm1, %v7328_v63, %v7327_v55  ;;  %v5839_v21 = vadd.f32 %v7329_v9, %v7295_v14  ;;  %v1241_v53 = vmax.f32 %v1189_v36, 0.0  ;;  %v7331_v50 = vld [vmem:[#allocation23_spill] sm:$0xff]  ;;  %v7332_v16 = vld [vmem:[#allocation52_spill] sm:$0xff]  ;;  %v7333_v34 = vld [vmem:[#allocation22_spill] sm:$0xff] }
 0x2b4   : > { %v5845_v28 = vsel %vm1902_vm1, %v7332_v16, %v7331_v50  ;;  %v7334_v1 = vld [vmem:[#allocation86_spill] sm:$0xff]  ;;  %v7335_v55 = vld [vmem:[#allocation53_spill] sm:$0xff]  ;;  %v1265_v9 = vpack.c.bf16 %v1240_v60, %v1239_v25  ;;  %v7340_v60 = vld [vmem:[#allocation24_spill] sm:$0xff] }
 0x2b5   : > { %7330 = vst [vmem:[#allocation37_spill] sm:$0xff] %v5839_v21  ;;  %v5851_v2 = vsel %vm1902_vm1, %v7334_v1, %v7333_v34  ;;  %v5855_v63 = vadd.f32 %v7335_v55, %v7295_v14  ;;  %v7336_v21 = vld [vmem:[#allocation54_spill] sm:$0xff]  ;;  %v7337_v50 = vld [vmem:[#allocation89_spill] sm:$0xff]  ;;  %v7338_v34 = vld [vmem:[#allocation55_spill] sm:$0xff]  ;;  %v1266_v49 = vpack.c.bf16 %v1242_v13, %v1241_v53 }
 0x2b6   : > { %v5861_v36 = vsel %vm1902_vm1, %v7336_v21, %v5554_v52  ;;  %v5867_v16 = vsel %vm1902_vm1, %v7337_v50, %v5549_v58  ;;  %v5871_v1 = vadd.f32 %v7338_v34, %v7295_v14  ;;  %v7339_v55 = vld [vmem:[#allocation56_spill] sm:$0xff]  ;;  %v7341_v52 = vld [vmem:[#allocation94_spill] sm:$0xff]  ;;  %v7342_v58 = vld [vmem:[#allocation57_spill] sm:$0xff]  ;;  %3703 = vmatprep.mubr.bf16.mxu1 %v1265_v9 }
 0x2b7   : > { %v5877_v25 = vsel %vm1902_vm1, %v7339_v55, %v5564_v59  ;;  %v5883_v21 = vsel %vm1902_vm1, %v7341_v52, %v7340_v60  ;;  %v5887_v50 = vadd.f32 %v7342_v58, %v7295_v14  ;;  %v7344_v34 = vld [vmem:[#allocation58_spill] sm:$0xff]  ;;  %v7345_v59 = vld [vmem:[#allocation97_spill] sm:$0xff]  ;;  %v7346_v55 = vld [vmem:[#allocation59_spill] sm:$0xff]  ;;  %3704 = vmatmul.mubr.bf16.gmra.mxu1 %v1266_v49 }
 0x2b8   : > { %v5893_v13 = vsel %vm1902_vm1, %v7344_v34, %v5574_v19  ;;  %v5899_v53 = vsel %vm1902_vm1, %v7345_v59, %v5569_v10  ;;  %v5903_v60 = vadd.f32 %v7346_v55, %v7295_v14  ;;  %v7347_v52 = vld [vmem:[#allocation60_spill] sm:$0xff]  ;;  %v7348_v19 = vld [vmem:[#allocation102_spill] sm:$0xff]  ;;  %v7349_v10 = vld [vmem:[#allocation61_spill] sm:$0xff] }
 0x2b9   : > { %7343 = vst [vmem:[#allocation34_spill] sm:$0xff] %v5887_v50  ;;  %v5909_v58 = vsel %vm1902_vm1, %v7347_v52, %v5584_v24  ;;  %v5915_v9 = vsel %vm1902_vm1, %v7348_v19, %v5579_v7  ;;  %v5919_v34 = vadd.f32 %v7349_v10, %v7295_v14  ;;  %v7351_v59 = vld [vmem:[#allocation62_spill] sm:$0xff]  ;;  %v7352_v24 = vld [vmem:[#allocation105_spill] sm:$0xff]  ;;  %v7353_v7 = vld [vmem:[#allocation63_spill] sm:$0xff]  ;;  %v2399_v50 = vpop.permute.xlu0 %2398 }
 0x2ba   : > { %v5925_v55 = vsel %vm1902_vm1, %v7351_v59, %v5594_v4  ;;  %v5931_v52 = vsel %vm1902_vm1, %v7352_v24, %v5589_v45  ;;  %v5936_v49 = vadd.f32 %v7353_v7, %v7295_v14  ;;  %v7355_v19 = vld [vmem:[#allocation64_spill] sm:$0xff]  ;;  %v7356_v4 = vld [vmem:[#allocation110_spill] sm:$0xff]  ;;  %v7359_v7 = vld [vmem:[#allocation67_spill] sm:$0xff] }
 0x2bb   : > { %7350 = vst [vmem:[#allocation36_spill] sm:$0xff] %v5919_v34  ;;  %v5942_v10 = vsel %vm1902_vm1, %v7355_v19, %v5604_v40  ;;  %v5948_v59 = vsel %vm1902_vm1, %v7356_v4, %v5599_v42  ;;  %v7357_v45 = vld [vmem:[#allocation66_spill] sm:$0xff]  ;;  %v7360_v40 = vld [vmem:[#allocation113_spill] sm:$0xff]  ;;  %v7362_v42 = vld [vmem:[#allocation68_spill] sm:$0xff] }
 0x2bc   : > { %7354 = vst [vmem:[#allocation38_spill] sm:$0xff] %v5936_v49  ;;  %v5952_v24 = vadd.f32 %v7357_v45, %v7295_v14  ;;  %v5958_v49 = vsel %vm1902_vm1, %v7359_v7, %v5614_v5  ;;  %v5964_v19 = vsel %vm1902_vm1, %v7360_v40, %v5609_v18  ;;  %v5968_v4 = vadd.f32 %v7362_v42, %v7295_v14  ;;  %v7364_v45 = vld [vmem:[#allocation69_spill] sm:$0xff]  ;;  %v7365_v34 = vld [vmem:[#allocation118_spill] sm:$0xff]  ;;  %v7367_v7 = vld [vmem:[#allocation71_spill] sm:$0xff] }
 0x2bd   : > { %7361 = vst [vmem:[#allocation40_spill] sm:$0xff] %v5964_v19  ;;  %v5980_v5 = vsel %vm1902_vm1, %v7365_v34, %v5619_v0  ;;  %v5984_v18 = vadd.f32 %v7367_v7, %v7295_v14  ;;  %v7369_v40 = vld [vmem:[#allocation72_spill] sm:$0xff]  ;;  %v7371_v19 = vld [vmem:[#allocation121_spill] sm:$0xff]  ;;  %v7373_v0 = vld [vmem:[#allocation74_spill] sm:$0xff] }
 0x2be   : > { %7358 = vst [vmem:[#allocation39_spill] sm:$0xff] %v5952_v24  ;;  %7363 = vst [vmem:[#allocation41_spill] sm:$0xff] %v5968_v4  ;;  %v5974_v24 = vsel %vm1902_vm1, %v7364_v45, %v5626_v6  ;;  %v5990_v42 = vsel %vm1902_vm1, %v7369_v40, %v5636_v41  ;;  %v5996_v6 = vsel %vm1902_vm1, %v7371_v19, %v5631_v62  ;;  %v2391_v45 = vpop.permute.xlu1 %2390  ;;  %v7375_v7 = vld [vmem:[#allocation75_spill] sm:$0xff]  ;;  %v7377_v41 = vld [vmem:[#allocation76_spill] sm:$0xff] }
 0x2bf   : > { %7366 = vst [vmem:[#allocation42_spill] sm:$0xff] %v5980_v5  ;;  %7368 = vst [vmem:[#allocation13_spill] sm:$0xff] %v5984_v18  ;;  %v6000_v34 = vadd.f32 %v7373_v0, %v7295_v14  ;;  %v6006_v5 = vsel %vm1902_vm1, %v7375_v7, %v5641_v3  ;;  %v6010_v40 = vadd.f32 %v7377_v41, %v7295_v14  ;;  %v7380_v19 = vld [vmem:[#allocation77_spill] sm:$0xff]  ;;  %v7384_v3 = vld [vmem:[#allocation140_spill] sm:$0xff] }
 0x2c0   : > { %7370 = vst [vmem:[#allocation65_spill] sm:$0xff] %v5990_v42  ;;  %7372 = vst [vmem:[#allocation43_spill] sm:$0xff] %v5996_v6  ;;  %v7379_v42 = vld [vmem:[#allocation80_spill] sm:$0xff]  ;;  %v6020_v0 = vsel %vm1902_vm1, %v7380_v19, %v5646_v26  ;;  %v7382_v6 = vld [vmem:[#allocation79_spill] sm:$0xff]  ;;  %v2337_v7 = vsel %vm2143_vm2, %v7384_v3, %v5651_v37 }
 0x2c1   : > { %7374 = vst [vmem:[#allocation15_spill] sm:$0xff] %v6000_v34  ;;  %7376 = vst [vmem:[#allocation44_spill] sm:$0xff] %v6006_v5  ;;  %v2336_v62 = vsel %vm2143_vm2, %v7379_v42, %v5657_v23  ;;  %v6024_v34 = vadd.f32 %v7382_v6, %v7295_v14  ;;  %v7385_v41 = vld [vmem:[#allocation85_spill] sm:$0xff]  ;;  %v7386_v42 = vld [vmem:[#allocation82_spill] sm:$0xff] }
 0x2c2   : > { %7378 = vst [vmem:[#allocation14_spill] sm:$0xff] %v6010_v40  ;;  %7381 = vst [vmem:[#allocation70_spill] sm:$0xff] %v6020_v0  ;;  %v2339_v23 = vsel %vm2143_vm2, %v7385_v41, %v5669_v31  ;;  %v6036_v5 = vadd.f32 %v7386_v42, %v7295_v14  ;;  %v7388_v26 = vld [vmem:[#allocation83_spill] sm:$0xff]  ;;  %v7389_v19 = vld [vmem:[#allocation141_spill] sm:$0xff] }
 0x2c3   : > { %7383 = vst [vmem:[#allocation45_spill] sm:$0xff] %v6024_v34  ;;  %v2338_v6 = vsel %vm2143_vm2, %v7388_v26, %v5663_v46  ;;  %v6046_v0 = vsel %vm2143_vm2, %v7389_v19, %v5679_v57  ;;  %v7390_v37 = vld [vmem:[#allocation84_spill] sm:$0xff]  ;;  %v7392_v31 = vld [vmem:[#allocation142_spill] sm:$0xff]  ;;  %v7393_v42 = vld [vmem:[#allocation87_spill] sm:$0xff]  ;;  %v2577_v26 = vsel %vm2384_vm3, %v2387_v35, %v2336_v62  ;;  %v2407_v19 = vpop.permute.xlu0 %2406  ;;  %v3661_v18 = vpop.f32.mrf.mxu1 }
 0x2c4   : > { %7387 = vst [vmem:[#allocation17_spill] sm:$0xff] %v6036_v5  ;;  %v6050_v3 = vadd.f32 %v7390_v37, %v7295_v14  ;;  %v6056_v41 = vsel %vm2143_vm2, %v7392_v31, %v5695_v22  ;;  %v6060_v40 = vadd.f32 %v7393_v42, %v7295_v14  ;;  %v7395_v46 = vld [vmem:[#allocation88_spill] sm:$0xff]  ;;  %v7396_v37 = vld [vmem:[#allocation143_spill] sm:$0xff]  ;;  %v7397_v22 = vld [vmem:[#allocation90_spill] sm:$0xff] }
 0x2c5   : > { %v2341_v57 = vsel %vm2143_vm2, %v7395_v46, %v5685_v27  ;;  %v6076_v31 = vadd.f32 %v7397_v22, %v7295_v14  ;;  %v7399_v42 = vld [vmem:[#allocation91_spill] sm:$0xff]  ;;  %v2580_v27 = vsel %vm2384_vm3, %v2399_v50, %v2339_v23  ;;  %v7400_v35 = vld [vmem:[#allocation144_spill] sm:$0xff]  ;;  %v2395_v23 = vpop.permute.xlu1 %2394 }
 0x2c6   : > { %7391 = vst [vmem:[#allocation46_spill] sm:$0xff] %v6050_v3  ;;  %7394 = vst [vmem:[#allocation16_spill] sm:$0xff] %v6060_v40  ;;  %v6072_v3 = vsel %vm2143_vm2, %v7396_v37, %v5711_v32  ;;  %v2343_v40 = vsel %vm2143_vm2, %v7399_v42, %v5701_v17  ;;  %v6088_v62 = vsel %vm2143_vm2, %v7400_v35, %v5727_v44  ;;  %v7401_v32 = vld [vmem:[#allocation92_spill] sm:$0xff]  ;;  %v7403_v37 = vld [vmem:[#allocation93_spill] sm:$0xff] }
 0x2c7   : > { %7398 = vst [vmem:[#allocation73_spill] sm:$0xff] %v6076_v31  ;;  %v6092_v46 = vadd.f32 %v7401_v32, %v7295_v14  ;;  %v6098_v22 = vsel %vm2143_vm2, %v7403_v37, %v5717_v39  ;;  %v7404_v17 = vld [vmem:[#allocation145_spill] sm:$0xff]  ;;  %v7405_v44 = vld [vmem:[#allocation95_spill] sm:$0xff]  ;;  %v7407_v35 = vld [vmem:[#allocation96_spill] sm:$0xff]  ;;  %v2579_v39 = vsel %vm2384_vm3, %v2395_v23, %v2338_v6  ;;  %v2578_v31 = vsel %vm2384_vm3, %v2391_v45, %v2337_v7 }
 0x2c8   : > { %v6104_v50 = vsel %vm2143_vm2, %v7404_v17, %v5743_v38  ;;  %v6108_v42 = vadd.f32 %v7405_v44, %v7295_v14  ;;  %v6114_v32 = vsel %vm2143_vm2, %v7407_v35, %v5733_v43  ;;  %v7408_v37 = vld [vmem:[#allocation146_spill] sm:$0xff]  ;;  %v7411_v43 = vld [vmem:[#allocation99_spill] sm:$0xff]  ;;  %v7413_v23 = vld [vmem:[#allocation100_spill] sm:$0xff] }
 0x2c9   : > { %7402 = vst [vmem:[#allocation47_spill] sm:$0xff] %v6092_v46  ;;  %v2625_v46 = vmax.f32 %v2577_v26, 0.0  ;;  %v6122_v38 = vsel %vm2143_vm2, %v7408_v37, %v5761_v54  ;;  %v7409_v17 = vld [vmem:[#allocation98_spill] sm:$0xff]  ;;  %v6134_v26 = vsel %vm2143_vm2, %v7411_v43, %v5749_v61  ;;  %v7412_v6 = vld [vmem:[#allocation147_spill] sm:$0xff]  ;;  %v6144_v35 = vadd.f32 %v7413_v23, %v7295_v14  ;;  %v7416_v7 = vld [vmem:[#allocation148_spill] sm:$0xff]  ;;  %v2415_v23 = vpop.permute.xlu0 %2414 }
 0x2ca   : > { %7406 = vst [vmem:[#allocation19_spill] sm:$0xff] %v6108_v42  ;;  %v6126_v44 = vadd.f32 %v7409_v17, %v7295_v14  ;;  %v2628_v42 = vmax.f32 %v2580_v27, 0.0  ;;  %v6140_v54 = vsel %vm2143_vm2, %v7412_v6, %v5779_v30  ;;  %v7415_v27 = vld [vmem:[#allocation101_spill] sm:$0xff]  ;;  %v6156_v61 = vsel %vm2143_vm2, %v7416_v7, %v5796_v12  ;;  %v7417_v37 = vld [vmem:[#allocation103_spill] sm:$0xff]  ;;  %v7419_v17 = vld [vmem:[#allocation104_spill] sm:$0xff] }
 0x2cb   : > { %7414 = vst [vmem:[#allocation18_spill] sm:$0xff] %v6144_v35  ;;  %v6150_v45 = vsel %vm2143_vm2, %v7415_v27, %v5769_v20  ;;  %v6160_v30 = vadd.f32 %v7417_v37, %v7295_v14  ;;  %v6166_v43 = vsel %vm2143_vm2, %v7419_v17, %v5786_v48  ;;  %v2627_v6 = vmax.f32 %v2579_v39, 0.0  ;;  %v7420_v20 = vld [vmem:[#allocation149_spill] sm:$0xff]  ;;  %v7421_v12 = vld [vmem:[#allocation106_spill] sm:$0xff] }
 0x2cc   : > { %7410 = vst [vmem:[#allocation48_spill] sm:$0xff] %v6126_v44  ;;  %v6172_v27 = vsel %vm2143_vm2, %v7420_v20, %v5813_v33  ;;  %v6176_v7 = vadd.f32 %v7421_v12, %v7295_v14  ;;  %v2673_v37 = vmin.f32 %v2625_v46, 1.0  ;;  %v2626_v44 = vmax.f32 %v2578_v31, 0.0  ;;  %v7424_v39 = vld [vmem:[#allocation150_spill] sm:$0xff]  ;;  %v7425_v33 = vld [vmem:[#allocation108_spill] sm:$0xff]  ;;  %v7427_v31 = vld [vmem:[#allocation109_spill] sm:$0xff] }
 0x2cd   : > { %7418 = vst [vmem:[#allocation78_spill] sm:$0xff] %v6160_v30  ;;  %v7423_v30 = vld [vmem:[#allocation107_spill] sm:$0xff]  ;;  %v6188_v17 = vsel %vm2143_vm2, %v7424_v39, %v5829_v29  ;;  %v6192_v20 = vadd.f32 %v7425_v33, %v7295_v14  ;;  %v2676_v12 = vmin.f32 %v2628_v42, 1.0  ;;  %v6198_v46 = vsel %vm2143_vm2, %v7427_v31, %v5819_v56  ;;  %v7431_v33 = vld [vmem:[#allocation112_spill] sm:$0xff] }
 0x2ce   : > { %7422 = vst [vmem:[#allocation49_spill] sm:$0xff] %v6176_v7  ;;  %v6182_v48 = vsel %vm2143_vm2, %v7423_v30, %v5803_v51  ;;  %v2403_v7 = vpop.permute.xlu1 %2402  ;;  %v7428_v51 = vld [vmem:[#allocation151_spill] sm:$0xff]  ;;  %v6214_v42 = vsel %vm2143_vm2, %v7431_v33, %v5835_v11  ;;  %v6234_v11 = vmin.f32 %v2627_v6, 1.0  ;;  %v7435_v33 = vld [vmem:[#allocation117_spill] sm:$0xff] }
 0x2cf   : > { %7426 = vst [vmem:[#allocation50_spill] sm:$0xff] %v6192_v20  ;;  %v6204_v30 = vsel %vm2143_vm2, %v7428_v51, %v5845_v28  ;;  %v7429_v29 = vld [vmem:[#allocation111_spill] sm:$0xff]  ;;  %v7432_v20 = vld [vmem:[#allocation152_spill] sm:$0xff]  ;;  %v7434_v51 = vld [vmem:[#allocation153_spill] sm:$0xff]  ;;  %v2724_v35 = vsub.f32 1.0, %v2676_v12 }
 0x2d0   : > { %v6208_v39 = vadd.f32 %v7429_v29, %v7295_v14  ;;  %v6220_v56 = vsel %vm2143_vm2, %v7432_v20, %v5861_v36  ;;  %v7433_v31 = vld [vmem:[#allocation115_spill] sm:$0xff]  ;;  %v6232_v29 = vsel %vm2143_vm2, %v7434_v51, %v5877_v25  ;;  %v6240_v36 = vsel %vm2143_vm2, %v7435_v33, %v5867_v16  ;;  %v7436_v20 = vld [vmem:[#allocation154_spill] sm:$0xff]  ;;  %v7437_v25 = vld [vmem:[#allocation120_spill] sm:$0xff] }
 0x2d1   : > { %v6226_v28 = vsel %vm2143_vm2, %v7433_v31, %v5851_v2  ;;  %v6246_v2 = vsel %vm2143_vm2, %v7436_v20, %v5893_v13  ;;  %v2817_v31 = vmax.f32 %v2673_v37, 0.001  ;;  %v6254_v6 = vsel %vm2143_vm2, %v7437_v25, %v5883_v21  ;;  %v7438_v51 = vld [vmem:[#allocation155_spill] sm:$0xff]  ;;  %v2423_v20 = vpop.permute.xlu0 %2422  ;;  %v7441_v21 = vld [vmem:[#allocation156_spill] sm:$0xff] }
 0x2d2   : > { %7430 = vst [vmem:[#allocation21_spill] sm:$0xff] %v6208_v39  ;;  %v6248_v39 = vmin.f32 %v2626_v44, 1.0  ;;  %v6260_v16 = vsel %vm2143_vm2, %v7438_v51, %v5909_v58  ;;  %v2820_v33 = vmax.f32 %v2676_v12, 0.001  ;;  %v2582_v13 = vsel %vm2384_vm3, %v2407_v19, %v2341_v57  ;;  %v7440_v44 = vld [vmem:[#allocation123_spill] sm:$0xff]  ;;  %v7442_v58 = vld [vmem:[#allocation125_spill] sm:$0xff] }
 0x2d3   : > { %7439 = vst [vmem:[#allocation81_spill] sm:$0xff] %v6260_v16  ;;  %v6268_v14 = vsel %vm2143_vm2, %v7440_v44, %v5899_v53  ;;  %v6274_v25 = vsel %vm2143_vm2, %v7441_v21, %v5925_v55  ;;  %v6280_v51 = vsel %vm2143_vm2, %v7442_v58, %v5915_v9  ;;  %v2721_v57 = vsub.f32 1.0, %v2673_v37  ;;  %v6285_v19 = vld [vmem:[%s7094_s7] ss:$0 sm:$0xff]  ;;  %v7443_v53 = vld [vmem:[#allocation157_spill] sm:$0xff]  ;;  %v7445_v55 = vld [vmem:[#allocation127_spill] sm:$0xff]  ;;  %v2411_v58 = vpop.permute.xlu1 %2410 }
 0x2d4   : > { %v6291_v44 = vsel %vm2143_vm2, %v7443_v53, %v5942_v10  ;;  %v6297_v21 = vsel %vm2143_vm2, %v7445_v55, %v5931_v52  ;;  %v2819_v9 = vmax.f32 %v6234_v11, 0.001  ;;  %v2584_v37 = vsel %vm2384_vm3, %v2415_v23, %v2343_v40  ;;  %v7446_v40 = vld [vmem:[#allocation158_spill] sm:$0xff]  ;;  %v7448_v12 = vld [vmem:[#allocation129_spill] sm:$0xff] }
 0x2d5   : > { %7444 = vst [vmem:[#allocation51_spill] sm:$0xff] %v6291_v44  ;;  %3836 = vrcp.f32 %v2817_v31  ;;  %v2818_v5 = vmax.f32 %v6248_v39, 0.001  ;;  %v2630_v34 = vmax.f32 %v2582_v13, 0.0  ;;  %v2581_v10 = vsel %vm2384_vm3, %v2403_v7, %v6046_v0  ;;  %v1372_v7 = vpop.f32.mrf.mxu1 }
 0x2d6   : > { %3838 = vrcp.f32 %v2820_v33  ;;  %v2586_v52 = vsel %vm2384_vm3, %v2423_v20, %v6098_v22  ;;  %v1381_v53 = vadd.f32 %v3661_v18, %v6285_v19  ;;  %v6314_v23 = vsel %vm2143_vm2, %v7446_v40, %v5958_v49  ;;  %v2431_v22 = vpop.permute.xlu0 %2430 }
 0x2d7   : > { %7447 = vst [vmem:[#allocation23_spill] sm:$0xff] %v6314_v23  ;;  %v6320_v31 = vsel %vm2143_vm2, %v7448_v12, %v5948_v59  ;;  %v6322_v33 = vmax.f32 %v2721_v57, 0.001  ;;  %v2632_v0 = vmax.f32 %v2584_v37, 0.0  ;;  %3840 = vrcp.f32 %v2819_v9  ;;  %v3662_v44 = vpop.f32.mrf.mxu1  ;;  %v2419_v12 = vpop.permute.xlu1 %2418 }
 0x2d8   : > { %7449 = vst [vmem:[#allocation52_spill] sm:$0xff] %v6320_v31  ;;  %v2583_v18 = vsel %vm2384_vm3, %v2411_v58, %v6056_v41  ;;  %v2963_v13 = vsub.f32 0.0, %v1381_v53  ;;  %v1373_v49 = vadd.f32 %v6285_v19, %v1372_v7  ;;  %v2772_v20 = vmax.f32 %v2724_v35, 0.001 }
 0x2d9   : > { %3842 = vrcp.f32 %v2818_v5  ;;  %v2629_v55 = vmax.f32 %v2581_v10, 0.0  ;;  %v2634_v40 = vmax.f32 %v2586_v52, 0.0  ;;  %v2678_v59 = vmin.f32 %v2630_v34, 1.0  ;;  %v1375_v58 = vpop.f32.mrf.mxu1 }
 0x2da   : > { %v3013_v57 = vmul.f32 1.442695, %v2963_v13  ;;  %v2961_v23 = vsub.f32 0.0, %v1373_v49  ;;  %v1384_v37 = vadd.f32 %v3662_v44, %v6285_v19  ;;  %v2722_v9 = vsub.f32 1.0, %v6248_v39 }
 0x2db   : > { %v2680_v31 = vmin.f32 %v2632_v0, 1.0  ;;  %v2631_v4 = vmax.f32 %v2583_v18, 0.0  ;;  %v2588_v41 = vsel %vm2384_vm3, %v2431_v22, %v6114_v32  ;;  %v1376_v10 = vadd.f32 %v6285_v19, %v1375_v58 }
 0x2dc   : > { %3844 = vpow2.f32 %v3013_v57  ;;  %v3009_v5 = vmul.f32 1.442695, %v2961_v23  ;;  %v2964_v35 = vsub.f32 0.0, %v1384_v37  ;;  %v2726_v34 = vsub.f32 1.0, %v2678_v59  ;;  %v2439_v23 = vpop.permute.xlu0 %2438 }
 0x2dd   : > { %v2677_v52 = vmin.f32 %v2629_v55, 1.0  ;;  %v2682_v53 = vmin.f32 %v2634_v40, 1.0  ;;  %v2585_v44 = vsel %vm2384_vm3, %v2419_v12, %v6072_v3  ;;  %v2636_v39 = vmax.f32 %v2588_v41, 0.0  ;;  %v7450_v40 = vld [vmem:[#allocation159_spill] sm:$0xff] }
 0x2de   : > { %3846 = vpow2.f32 %v3009_v5  ;;  %v3015_v0 = vmul.f32 1.442695, %v2964_v35  ;;  %v2962_v7 = vsub.f32 0.0, %v1376_v10  ;;  %v2822_v18 = vmax.f32 %v2678_v59, 0.001  ;;  %v2427_v59 = vpop.permute.xlu1 %2426 }
 0x2df   : > { %v2723_v32 = vsub.f32 1.0, %v6234_v11  ;;  %v2728_v22 = vsub.f32 1.0, %v2680_v31  ;;  %v6338_v13 = vmin.f32 %v2631_v4, 1.0  ;;  %v2824_v49 = vmax.f32 %v2680_v31, 0.001 }
 0x2e0   : > { %v2633_v57 = vmax.f32 %v2585_v44, 0.0  ;;  %3848 = vpow2.f32 %v3015_v0  ;;  %v3011_v55 = vmul.f32 1.442695, %v2962_v7  ;;  %v6344_v3 = vsel %vm2143_vm2, %v7450_v40, %v5974_v24 }
 0x2e1   : > { %7451 = vst [vmem:[#allocation22_spill] sm:$0xff] %v6344_v3  ;;  %v2770_v12 = vmax.f32 %v2722_v9, 0.001  ;;  %v2725_v37 = vsub.f32 1.0, %v2677_v52  ;;  %v2821_v41 = vmax.f32 %v2677_v52, 0.001  ;;  %v2590_v4 = vsel %vm2384_vm3, %v2439_v23, %v6134_v26  ;;  %v2447_v23 = vpop.permute.xlu0 %2446 }
 0x2e2   : > { %v3837_v58 = vpop.eup %3836  ;;  %v2826_v11 = vmax.f32 %v2682_v53, 0.001  ;;  %v6346_v5 = vmin.f32 %v2636_v39, 1.0  ;;  %3850 = vpow2.f32 %v3011_v55  ;;  %v6351_v35 = vmax.f32 %v2726_v34, 0.001 }
 0x2e3   : > { %v3839_v31 = vpop.eup %3838  ;;  %3852 = vrcp.f32 %v2822_v18  ;;  %v2730_v10 = vsub.f32 1.0, %v2682_v53  ;;  %v2823_v24 = vmax.f32 %v6338_v13, 0.001  ;;  %v2771_v9 = vmax.f32 %v2723_v32, 0.001  ;;  %v3665_v32 = vpop.f32.mrf.mxu1 }
 0x2e4   : > { %v6354_v44 = vmax.f32 %v2728_v22, 0.001  ;;  %3854 = vrcp.f32 %v2824_v49  ;;  %v6356_v52 = vmin.f32 %v2633_v57, 1.0  ;;  %v3841_v39 = vpop.eup %3840  ;;  %v2913_v0 = vmul.f32 %v3837_v58, %v6322_v33  ;;  %v2435_v49 = vpop.permute.xlu1 %2434 }
 0x2e5   : > { %v6359_v7 = vmax.f32 %v2725_v37, 0.001  ;;  %3856 = vrcp.f32 %v2821_v41  ;;  %v2638_v26 = vmax.f32 %v2590_v4, 0.0  ;;  %v2916_v55 = vmul.f32 %v3839_v31, %v2772_v20  ;;  %v1388_v41 = vpop.f32.mrf.mxu1 }
 0x2e6   : > { %v3843_v34 = vpop.eup %3842  ;;  %3858 = vrcp.f32 %v2826_v11  ;;  %v2727_v53 = vsub.f32 1.0, %v6338_v13  ;;  %v2828_v18 = vmax.f32 %v6346_v5, 0.001  ;;  %v6363_v22 = vmax.f32 %v2730_v10, 0.001 }
 0x2e7   : > { %3860 = vrcp.f32 %v2823_v24  ;;  %v2587_v33 = vsel %vm2384_vm3, %v2427_v59, %v6088_v62  ;;  %v1397_v57 = vadd.f32 %v3665_v32, %v6285_v19  ;;  %v2915_v40 = vmul.f32 %v3841_v39, %v2771_v9 }
 0x2e8   : > { %v2732_v37 = vsub.f32 1.0, %v6346_v5  ;;  %v2825_v20 = vmax.f32 %v6356_v52, 0.001  ;;  %v2592_v13 = vsel %vm2384_vm3, %v2447_v23, %v6150_v45  ;;  %v2914_v11 = vmul.f32 %v3843_v34, %v2770_v12  ;;  %v3666_v5 = vpop.f32.mrf.mxu1 }
 0x2e9   : > { %v3845_v58 = vpop.eup %3844  ;;  %v6374_v4 = vmin.f32 %v2638_v26, 1.0  ;;  %v2967_v31 = vsub.f32 0.0, %v1397_v57  ;;  %v1389_v62 = vadd.f32 %v6285_v19, %v1388_v41  ;;  %3862 = vrcp.f32 %v2828_v18  ;;  %v2455_v26 = vpop.permute.xlu0 %2454 }
 0x2ea   : > { %v2729_v59 = vsub.f32 1.0, %v6356_v52  ;;  %v2635_v10 = vmax.f32 %v2587_v33, 0.0  ;;  %v3107_v24 = vmul.f32 %v3845_v58, %v2915_v40  ;;  %v2640_v39 = vmax.f32 %v2592_v13, 0.0  ;;  %v1391_v18 = vpop.f32.mrf.mxu1  ;;  %v2443_v52 = vpop.permute.xlu1 %2442 }
 0x2eb   : > { %v3847_v9 = vpop.eup %3846  ;;  %v3021_v32 = vmul.f32 1.442695, %v2967_v31  ;;  %v2965_v3 = vsub.f32 0.0, %v1389_v62  ;;  %v1400_v45 = vadd.f32 %v3666_v5, %v6285_v19  ;;  %3864 = vrcp.f32 %v2825_v20 }
 0x2ec   : > { %v2589_v12 = vsel %vm2384_vm3, %v2435_v49, %v6104_v50  ;;  %v3155_v23 = vadd.f32 1.0, %v3107_v24  ;;  %v3105_v34 = vmul.f32 %v3847_v9, %v2913_v0  ;;  %v1392_v13 = vadd.f32 %v6285_v19, %v1391_v18 }
 0x2ed   : > { %v3849_v57 = vpop.eup %3848  ;;  %3866 = vpow2.f32 %v3021_v32  ;;  %v3017_v33 = vmul.f32 1.442695, %v2965_v3  ;;  %v2968_v40 = vsub.f32 0.0, %v1400_v45  ;;  %v2683_v41 = vmin.f32 %v2635_v10, 1.0 }
 0x2ee   : > { %3868 = vrcp.f32 %v3155_v23  ;;  %v3153_v58 = vadd.f32 1.0, %v3105_v34  ;;  %v3108_v31 = vmul.f32 %v3849_v57, %v2916_v55  ;;  %v2637_v62 = vmax.f32 %v2589_v12, 0.0  ;;  %v2463_v12 = vpop.permute.xlu0 %2462 }
 0x2ef   : > { %v3851_v20 = vpop.eup %3850  ;;  %3870 = vpow2.f32 %v3017_v33  ;;  %v3023_v5 = vmul.f32 1.442695, %v2968_v40  ;;  %v2966_v50 = vsub.f32 0.0, %v1392_v13  ;;  %v2688_v24 = vmin.f32 %v2640_v39, 1.0  ;;  %v2451_v33 = vpop.permute.xlu1 %2450 }
 0x2f0   : > { %v3853_v49 = vpop.eup %3852  ;;  %3872 = vrcp.f32 %v3153_v58  ;;  %v3156_v0 = vadd.f32 1.0, %v3108_v31  ;;  %v3106_v9 = vmul.f32 %v3851_v20, %v2914_v11  ;;  %v2734_v3 = vsub.f32 1.0, %v6374_v4 }
 0x2f1   : > { %v3855_v16 = vpop.eup %3854  ;;  %v2830_v32 = vmax.f32 %v6374_v4, 0.001  ;;  %3874 = vpow2.f32 %v3023_v5  ;;  %v3019_v10 = vmul.f32 1.442695, %v2966_v50  ;;  %v2775_v55 = vmax.f32 %v2727_v53, 0.001 }
 0x2f2   : > { %v3857_v45 = vpop.eup %3856  ;;  %v6385_v23 = vmax.f32 %v2732_v37, 0.001  ;;  %3876 = vrcp.f32 %v3156_v0  ;;  %v3154_v34 = vadd.f32 1.0, %v3106_v9  ;;  %v6388_v39 = vmul.f32 %v3853_v49, %v6351_v35  ;;  %v2471_v49 = vpop.permute.xlu0 %2470 }
 0x2f3   : > { %v3859_v18 = vpop.eup %3858  ;;  %v2731_v11 = vsub.f32 1.0, %v2683_v41  ;;  %v2685_v57 = vmin.f32 %v2637_v62, 1.0  ;;  %3878 = vpow2.f32 %v3019_v10  ;;  %v2827_v40 = vmax.f32 %v2683_v41, 0.001 }
 0x2f4   : > { %v3861_v4 = vpop.eup %3860  ;;  %v2736_v13 = vsub.f32 1.0, %v2688_v24  ;;  %v2594_v53 = vsel %vm2384_vm3, %v2455_v26, %v6166_v43  ;;  %3880 = vrcp.f32 %v3154_v34  ;;  %v6394_v37 = vmax.f32 %v2729_v59, 0.001 }
 0x2f5   : > { %v6396_v58 = vmax.f32 %v2734_v3, 0.001  ;;  %3882 = vrcp.f32 %v2830_v32  ;;  %v2591_v35 = vsel %vm2384_vm3, %v2443_v52, %v6122_v38  ;;  %v2832_v31 = vmax.f32 %v2688_v24, 0.001  ;;  %v3669_v3 = vpop.f32.mrf.mxu1 }
 0x2f6   : > { %v2733_v20 = vsub.f32 1.0, %v2685_v57  ;;  %v2596_v41 = vsel %vm2384_vm3, %v2463_v12, %v6182_v48  ;;  %v2593_v43 = vsel %vm2384_vm3, %v2451_v33, %v6140_v54  ;;  %v6411_v59 = vpop.eup %3862  ;;  %v2920_v26 = vmul.f32 %v3855_v16, %v6354_v44 }
 0x2f7   : > { %v2917_v62 = vmul.f32 %v3857_v45, %v6359_v7  ;;  %v2829_v38 = vmax.f32 %v2685_v57, 0.001  ;;  %v2642_v52 = vmax.f32 %v2594_v53, 0.0  ;;  %v6415_v5 = vmax.f32 %v2731_v11, 0.001  ;;  %v1404_v34 = vpop.f32.mrf.mxu1 }
 0x2f8   : > { %3884 = vrcp.f32 %v2827_v40  ;;  %v6417_v50 = vmax.f32 %v2736_v13, 0.001  ;;  %v2639_v48 = vmax.f32 %v2591_v35, 0.0  ;;  %v6419_v24 = vpop.eup %3864  ;;  %v2919_v54 = vmul.f32 %v3861_v4, %v2775_v55 }
 0x2f9   : > { %v2644_v0 = vmax.f32 %v2596_v41, 0.0  ;;  %v2641_v9 = vmax.f32 %v2593_v43, 0.0  ;;  %v6423_v44 = vmul.f32 %v3859_v18, %v6363_v22  ;;  %3886 = vrcp.f32 %v2832_v31  ;;  %v2459_v22 = vpop.permute.xlu1 %2458  ;;  %v3670_v31 = vpop.f32.mrf.mxu1 }
 0x2fa   : > { %v3867_v16 = vpop.eup %3866  ;;  %v6425_v7 = vmax.f32 %v2733_v20, 0.001  ;;  %v1413_v32 = vadd.f32 %v3669_v3, %v6285_v19  ;;  %3888 = vrcp.f32 %v2829_v38  ;;  %v6428_v45 = vmin.f32 %v2642_v52, 1.0  ;;  %v7452_v3 = vld [vmem:[#allocation27_spill] sm:$0xff] }
 0x2fb   : > { %v3869_v10 = vpop.eup %3868  ;;  %v2598_v55 = vsel %vm2384_vm3, %v2471_v49, %v6198_v46  ;;  %v3111_v12 = vmul.f32 %v3867_v16, %v2919_v54  ;;  %v6433_v57 = vmin.f32 %v2639_v48, 1.0  ;;  %v1405_v4 = vadd.f32 %v6285_v19, %v1404_v34  ;;  %v2479_v49 = vpop.permute.xlu0 %2478 }
 0x2fc   : > { %v3871_v11 = vpop.eup %3870  ;;  %v3252_v18 = vsel %vm3249_vm4, %v3869_v10, %v5705_v8  ;;  %v2971_v33 = vsub.f32 0.0, %v1413_v32  ;;  %v6439_v13 = vmin.f32 %v2644_v0, 1.0  ;;  %v6441_v53 = vmin.f32 %v2641_v9, 1.0  ;;  %v1407_v9 = vpop.f32.mrf.mxu1 }
 0x2fd   : > { %v3873_v40 = vpop.eup %3872  ;;  %3300 = vst [vmem:[%s6444_s25 + $0x10] sm:$0xff] %v3252_v18  ;;  %v3159_v46 = vadd.f32 1.0, %v3111_v12  ;;  %v3109_v35 = vmul.f32 %v3871_v11, %v2917_v62  ;;  %v2969_v43 = vsub.f32 0.0, %v1405_v4  ;;  %v1416_v38 = vadd.f32 %v3670_v31, %v6285_v19  ;;  %v2467_v18 = vpop.permute.xlu1 %2466 }
 0x2fe   : > { %v3875_v20 = vpop.eup %3874  ;;  %v3250_v8 = vsel %vm3249_vm4, %v3873_v40, %v5673_v15  ;;  %v3029_v41 = vmul.f32 1.442695, %v2971_v33  ;;  %v2646_v48 = vmax.f32 %v2598_v55, 0.0  ;;  %v1408_v34 = vadd.f32 %v6285_v19, %v1407_v9  ;;  %v7453_v33 = vld [vmem:[#allocation26_spill] sm:$0xff] }
 0x2ff   : > { %v3877_v52 = vpop.eup %3876  ;;  %3298 = vst [vmem:[%s6444_s25] sm:$0xff] %v3250_v8  ;;  %3890 = vrcp.f32 %v3159_v46  ;;  %v3157_v54 = vadd.f32 1.0, %v3109_v35  ;;  %v3112_v0 = vmul.f32 %v3875_v20, %v2920_v26  ;;  %v3025_v15 = vmul.f32 1.442695, %v2969_v43  ;;  %v2487_v43 = vpop.permute.xlu0 %2486 }
 0x300   : > { %v3879_v62 = vpop.eup %3878  ;;  %v3253_v16 = vsel %vm3249_vm4, %v3877_v52, %v7452_v3  ;;  %3892 = vpow2.f32 %v3029_v41  ;;  %v2972_v32 = vsub.f32 0.0, %v1416_v38  ;;  %v2595_v26 = vsel %vm2384_vm3, %v2459_v22, %v6156_v61 }
 0x301   : > { %v3881_v10 = vpop.eup %3880  ;;  %3301 = vst [vmem:[%s6444_s25 + $0x18] sm:$0xff] %v3253_v16  ;;  %3894 = vrcp.f32 %v3157_v54  ;;  %v3160_v12 = vadd.f32 1.0, %v3112_v0  ;;  %v3110_v55 = vmul.f32 %v3879_v62, %v6388_v39  ;;  %v2694_v46 = vmin.f32 %v2646_v48, 1.0 }
 0x302   : > { %v3883_v11 = vpop.eup %3882  ;;  %v3251_v4 = vsel %vm3249_vm4, %v3881_v10, %v7453_v33  ;;  %3896 = vpow2.f32 %v3025_v15  ;;  %v3031_v40 = vmul.f32 1.442695, %v2972_v32  ;;  %v2970_v31 = vsub.f32 0.0, %v1408_v34 }
 0x303   : > { %3299 = vst [vmem:[%s6444_s25 + $0x8] sm:$0xff] %v3251_v4  ;;  %3898 = vrcp.f32 %v3160_v12  ;;  %v3158_v35 = vadd.f32 1.0, %v3110_v55  ;;  %v6467_v39 = vmul.f32 %v6411_v59, %v6385_v23  ;;  %v2738_v20 = vsub.f32 1.0, %v6428_v45  ;;  %v2495_v12 = vpop.permute.xlu0 %2494  ;;  %v3673_v55 = vpop.f32.mrf.mxu1 }
 0x304   : > { %v2834_v61 = vmax.f32 %v6428_v45, 0.001  ;;  %3900 = vpow2.f32 %v3031_v40  ;;  %v2831_v8 = vmax.f32 %v6433_v57, 0.001  ;;  %v2643_v41 = vmax.f32 %v2595_v26, 0.0 }
 0x305   : > { %v3885_v22 = vpop.eup %3884  ;;  %3902 = vrcp.f32 %v3158_v35  ;;  %v3027_v38 = vmul.f32 1.442695, %v2970_v31  ;;  %v2735_v52 = vsub.f32 1.0, %v6433_v57  ;;  %v2740_v48 = vsub.f32 1.0, %v6439_v13  ;;  %v1420_v35 = vpop.f32.mrf.mxu1 }
 0x306   : > { %v2836_v54 = vmax.f32 %v6439_v13, 0.001  ;;  %v2600_v23 = vsel %vm2384_vm3, %v2479_v49, %v6214_v42  ;;  %v6478_v59 = vpop.eup %3886  ;;  %v2737_v45 = vsub.f32 1.0, %v6441_v53  ;;  %v2833_v0 = vmax.f32 %v6441_v53, 0.001  ;;  %v2475_v13 = vpop.permute.xlu1 %2474 }
 0x307   : > { %v2742_v9 = vsub.f32 1.0, %v2694_v46  ;;  %3904 = vpow2.f32 %v3027_v38  ;;  %v6482_v62 = vpop.eup %3888  ;;  %v2921_v57 = vmul.f32 %v6419_v24, %v6394_v37  ;;  %v6486_v3 = vmax.f32 %v2738_v20, 0.001 }
 0x308   : > { %3906 = vrcp.f32 %v2834_v61  ;;  %v2597_v42 = vsel %vm2384_vm3, %v2467_v18, %v6172_v27  ;;  %v2838_v49 = vmax.f32 %v2694_v46, 0.001  ;;  %v6491_v16 = vmin.f32 %v2643_v41, 1.0  ;;  %v7454_v46 = vld [vmem:[#allocation30_spill] sm:$0xff] }
 0x309   : > { %3908 = vrcp.f32 %v2831_v8  ;;  %v2648_v53 = vmax.f32 %v2600_v23, 0.0  ;;  %v6494_v15 = vmul.f32 %v3883_v11, %v6396_v58  ;;  %v6496_v32 = vmax.f32 %v2735_v52, 0.001  ;;  %v7455_v52 = vld [vmem:[#allocation28_spill] sm:$0xff] }
 0x30a   : > { %v6498_v10 = vmax.f32 %v2740_v48, 0.001  ;;  %3910 = vrcp.f32 %v2836_v54  ;;  %v6500_v37 = vmax.f32 %v2737_v45, 0.001  ;;  %v6502_v24 = vmax.f32 %v2742_v9, 0.001  ;;  %v3674_v54 = vpop.f32.mrf.mxu1 }
 0x30b   : > { %3912 = vrcp.f32 %v2833_v0  ;;  %v2645_v27 = vmax.f32 %v2597_v42, 0.0  ;;  %v2923_v26 = vmul.f32 %v3885_v22, %v6415_v5  ;;  %v2602_v58 = vsel %vm2384_vm3, %v2487_v43, %v6226_v28 }
 0x30c   : > { %v3891_v34 = vpop.eup %3890  ;;  %v2599_v11 = vsel %vm2384_vm3, %v2475_v13, %v6188_v17  ;;  %v1429_v18 = vadd.f32 %v3673_v55, %v6285_v19  ;;  %3914 = vrcp.f32 %v2838_v49  ;;  %v2835_v4 = vmax.f32 %v6491_v16, 0.001  ;;  %v2483_v17 = vpop.permute.xlu1 %2482 }
 0x30d   : > { %v3893_v33 = vpop.eup %3892  ;;  %v6513_v40 = vmin.f32 %v2648_v53, 1.0  ;;  %v3256_v5 = vsel %vm3249_vm4, %v3891_v34, %v7454_v46  ;;  %v2604_v28 = vsel %vm2384_vm3, %v2495_v12, %v6240_v36  ;;  %v1421_v22 = vadd.f32 %v6285_v19, %v1420_v35  ;;  %v7456_v53 = vld [vmem:[#allocation32_spill] sm:$0xff]  ;;  %v1423_v55 = vpop.f32.mrf.mxu1 }
 0x30e   : > { %v3895_v31 = vpop.eup %3894  ;;  %3304 = vst [vmem:[%s6444_s25 + $0x30] sm:$0xff] %v3256_v5  ;;  %v3115_v20 = vmul.f32 %v3893_v33, %v2923_v26  ;;  %v2975_v61 = vsub.f32 0.0, %v1429_v18  ;;  %v6523_v41 = vmin.f32 %v2645_v27, 1.0  ;;  %v2650_v43 = vmax.f32 %v2602_v58, 0.0 }
 0x30f   : > { %v3897_v8 = vpop.eup %3896  ;;  %v2647_v38 = vmax.f32 %v2599_v11, 0.0  ;;  %v3254_v48 = vsel %vm3249_vm4, %v3895_v31, %v7455_v52  ;;  %v2973_v9 = vsub.f32 0.0, %v1421_v22  ;;  %v2652_v13 = vmax.f32 %v2604_v28, 0.0  ;;  %v7457_v11 = vld [vmem:[#allocation31_spill] sm:$0xff] }
 0x310   : > { %v3899_v23 = vpop.eup %3898  ;;  %3302 = vst [vmem:[%s6444_s25 + $0x20] sm:$0xff] %v3254_v48  ;;  %v3163_v36 = vadd.f32 1.0, %v3115_v20  ;;  %v3113_v45 = vmul.f32 %v3897_v8, %v2921_v57  ;;  %v3037_v0 = vmul.f32 1.442695, %v2975_v61  ;;  %v2601_v49 = vsel %vm2384_vm3, %v2483_v17, %v6204_v30  ;;  %v2503_v48 = vpop.permute.xlu0 %2502 }
 0x311   : > { %v3901_v42 = vpop.eup %3900  ;;  %v3257_v27 = vsel %vm3249_vm4, %v3899_v23, %v7456_v53  ;;  %v1432_v12 = vadd.f32 %v3674_v54, %v6285_v19  ;;  %v3033_v58 = vmul.f32 1.442695, %v2973_v9  ;;  %v1424_v33 = vadd.f32 %v6285_v19, %v1423_v55 }
 0x312   : > { %v3903_v34 = vpop.eup %3902  ;;  %3305 = vst [vmem:[%s6444_s25 + $0x38] sm:$0xff] %v3257_v27  ;;  %3916 = vrcp.f32 %v3163_v36  ;;  %v3161_v57 = vadd.f32 1.0, %v3113_v45  ;;  %v3116_v26 = vmul.f32 %v3901_v42, %v6467_v39  ;;  %v2698_v5 = vmin.f32 %v2650_v43, 1.0  ;;  %v3677_v27 = vpop.f32.mrf.mxu1 }
 0x313   : > { %v3255_v18 = vsel %vm3249_vm4, %v3903_v34, %v7457_v11  ;;  %3918 = vpow2.f32 %v3037_v0  ;;  %v2976_v30 = vsub.f32 0.0, %v1432_v12  ;;  %v2649_v35 = vmax.f32 %v2601_v49, 0.0 }
 0x314   : > { %v3905_v46 = vpop.eup %3904  ;;  %3303 = vst [vmem:[%s6444_s25 + $0x28] sm:$0xff] %v3255_v18  ;;  %3920 = vrcp.f32 %v3161_v57  ;;  %v3164_v31 = vadd.f32 1.0, %v3116_v26  ;;  %v2974_v20 = vsub.f32 0.0, %v1424_v33  ;;  %v2739_v22 = vsub.f32 1.0, %v6491_v16  ;;  %v1436_v26 = vpop.f32.mrf.mxu1 }
 0x315   : > { %v3907_v28 = vpop.eup %3906  ;;  %v3114_v17 = vmul.f32 %v3905_v46, %v6423_v44  ;;  %3922 = vpow2.f32 %v3033_v58  ;;  %v3039_v39 = vmul.f32 1.442695, %v2976_v30  ;;  %v2840_v8 = vmax.f32 %v6513_v40, 0.001 }
 0x316   : > { %v3909_v61 = vpop.eup %3908  ;;  %v6546_v52 = vmin.f32 %v2647_v38, 1.0  ;;  %3924 = vrcp.f32 %v3164_v31  ;;  %v6550_v54 = vmin.f32 %v2652_v13, 1.0  ;;  %v3035_v36 = vmul.f32 1.442695, %v2974_v20  ;;  %v7458_v31 = vld [vmem:[#allocation37_spill] sm:$0xff] }
 0x317   : > { %v6548_v43 = vpop.eup %3910  ;;  %v3162_v23 = vadd.f32 1.0, %v3114_v17  ;;  %3926 = vpow2.f32 %v3039_v39  ;;  %v6556_v45 = vmul.f32 %v6478_v59, %v6417_v50  ;;  %v2744_v38 = vsub.f32 1.0, %v6513_v40 }
 0x318   : > { %v6552_v44 = vpop.eup %3912  ;;  %3928 = vrcp.f32 %v2835_v4  ;;  %v2837_v0 = vmax.f32 %v6523_v41, 0.001  ;;  %v2741_v9 = vsub.f32 1.0, %v6523_v41  ;;  %v2842_v42 = vmax.f32 %v2698_v5, 0.001  ;;  %v2491_v41 = vpop.permute.xlu1 %2490 }
 0x319   : > { %v6563_v13 = vmin.f32 %v2649_v35, 1.0  ;;  %3930 = vrcp.f32 %v3162_v23  ;;  %v6565_v49 = vpop.eup %3914  ;;  %v2925_v53 = vmul.f32 %v6482_v62, %v6425_v7  ;;  %v2839_v50 = vmax.f32 %v6546_v52, 0.001  ;;  %v2511_v7 = vpop.permute.xlu0 %2510  ;;  %v7459_v23 = vld [vmem:[#allocation35_spill] sm:$0xff] }
 0x31a   : > { %v2606_v59 = vsel %vm2384_vm3, %v2503_v48, %v6254_v6  ;;  %3932 = vpow2.f32 %v3035_v36  ;;  %v6573_v16 = vmax.f32 %v2739_v22, 0.001  ;;  %v2746_v4 = vsub.f32 1.0, %v2698_v5  ;;  %v3678_v5 = vpop.f32.mrf.mxu1 }
 0x31b   : > { %3934 = vrcp.f32 %v2840_v8  ;;  %v2844_v40 = vmax.f32 %v6550_v54, 0.001  ;;  %v6577_v12 = vmul.f32 %v3907_v28, %v6486_v3  ;;  %v6579_v55 = vmax.f32 %v2744_v38, 0.001 }
 0x31c   : > { %3936 = vrcp.f32 %v2837_v0  ;;  %v1445_v62 = vadd.f32 %v3677_v27, %v6285_v19  ;;  %v6582_v34 = vmax.f32 %v2741_v9, 0.001  ;;  %v2841_v6 = vmax.f32 %v6563_v13, 0.001  ;;  %v1439_v8 = vpop.f32.mrf.mxu1  ;;  %v2499_v48 = vpop.permute.xlu1 %2498 }
 0x31d   : > { %3938 = vrcp.f32 %v2842_v42  ;;  %v2654_v57 = vmax.f32 %v2606_v59, 0.0  ;;  %v2603_v58 = vsel %vm2384_vm3, %v2491_v41, %v6220_v56  ;;  %v1437_v11 = vadd.f32 %v6285_v19, %v1436_v26 }
 0x31e   : > { %3940 = vrcp.f32 %v2839_v50  ;;  %v2979_v3 = vsub.f32 0.0, %v1445_v62  ;;  %v2927_v30 = vmul.f32 %v3909_v61, %v6496_v32  ;;  %v6590_v33 = vmax.f32 %v2746_v4, 0.001 }
 0x31f   : > { %v3917_v18 = vpop.eup %3916  ;;  %3942 = vrcp.f32 %v2844_v40  ;;  %v2608_v46 = vsel %vm2384_vm3, %v2511_v7, %v6268_v14  ;;  %v2977_v17 = vsub.f32 0.0, %v1437_v11  ;;  %v1448_v39 = vadd.f32 %v3678_v5, %v6285_v19  ;;  %v3681_v40 = vpop.f32.mrf.mxu1 }
 0x320   : > { %v3919_v35 = vpop.eup %3918  ;;  %v3260_v56 = vsel %vm3249_vm4, %v3917_v18, %v7458_v31  ;;  %v3045_v28 = vmul.f32 1.442695, %v2979_v3  ;;  %3944 = vrcp.f32 %v2841_v6  ;;  %v6599_v32 = vmin.f32 %v2654_v57, 1.0 }
 0x321   : > { %v3921_v20 = vpop.eup %3920  ;;  %v2651_v61 = vmax.f32 %v2603_v58, 0.0  ;;  %3308 = vst [vmem:[%s6444_s25 + $0x50] sm:$0xff] %v3260_v56  ;;  %v3119_v22 = vmul.f32 %v3919_v35, %v2927_v30  ;;  %v3041_v38 = vmul.f32 1.442695, %v2977_v17  ;;  %v2980_v0 = vsub.f32 0.0, %v1448_v39  ;;  %v1452_v58 = vpop.f32.mrf.mxu1 }
 0x322   : > { %v3923_v14 = vpop.eup %3922  ;;  %v3258_v36 = vsel %vm3249_vm4, %v3921_v20, %v7459_v23  ;;  %3946 = vpow2.f32 %v3045_v28  ;;  %v2656_v42 = vmax.f32 %v2608_v46, 0.0  ;;  %v1440_v4 = vadd.f32 %v6285_v19, %v1439_v8  ;;  %v7460_v46 = vld [vmem:[#allocation33_spill] sm:$0xff]  ;;  %v2507_v28 = vpop.permute.xlu1 %2506 }
 0x323   : > { %v3925_v9 = vpop.eup %3924  ;;  %3306 = vst [vmem:[%s6444_s25 + $0x40] sm:$0xff] %v3258_v36  ;;  %v3167_v50 = vadd.f32 1.0, %v3119_v22  ;;  %v3117_v59 = vmul.f32 %v3923_v14, %v2925_v53  ;;  %3948 = vpow2.f32 %v3041_v38  ;;  %v3047_v7 = vmul.f32 1.442695, %v2980_v0  ;;  %v3682_v56 = vpop.f32.mrf.mxu1 }
 0x324   : > { %v3927_v41 = vpop.eup %3926  ;;  %v3261_v27 = vsel %vm3249_vm4, %v3925_v9, %v5855_v63  ;;  %v1461_v62 = vadd.f32 %v3681_v40, %v6285_v19  ;;  %v2978_v53 = vsub.f32 0.0, %v1440_v4  ;;  %v6613_v11 = vmin.f32 %v2651_v61, 1.0 }
 0x325   : > { %v3929_v6 = vpop.eup %3928  ;;  %3309 = vst [vmem:[%s6444_s25 + $0x58] sm:$0xff] %v3261_v27  ;;  %3950 = vrcp.f32 %v3167_v50  ;;  %v3165_v57 = vadd.f32 1.0, %v3117_v59  ;;  %v3120_v26 = vmul.f32 %v3927_v41, %v6556_v45  ;;  %v1453_v63 = vadd.f32 %v6285_v19, %v1452_v58  ;;  %v1455_v36 = vpop.f32.mrf.mxu1 }
 0x326   : > { %v3931_v3 = vpop.eup %3930  ;;  %3952 = vpow2.f32 %v3047_v7  ;;  %v2983_v18 = vsub.f32 0.0, %v1461_v62  ;;  %v3043_v31 = vmul.f32 1.442695, %v2978_v53  ;;  %v1464_v61 = vadd.f32 %v3682_v56, %v6285_v19 }
 0x327   : > { %v3933_v30 = vpop.eup %3932  ;;  %v3259_v5 = vsel %vm3249_vm4, %v3931_v3, %v7460_v46  ;;  %3954 = vrcp.f32 %v3165_v57  ;;  %v3168_v35 = vadd.f32 1.0, %v3120_v26  ;;  %v2981_v20 = vsub.f32 0.0, %v1453_v63  ;;  %v3685_v26 = vpop.f32.mrf.mxu1 }
 0x328   : > { %v6619_v45 = vpop.eup %3934  ;;  %3307 = vst [vmem:[%s6444_s25 + $0x48] sm:$0xff] %v3259_v5  ;;  %v3118_v17 = vmul.f32 %v3933_v30, %v6494_v15  ;;  %v3053_v39 = vmul.f32 1.442695, %v2983_v18  ;;  %v2932_v8 = vmul.f32 %v6548_v43, %v6498_v10  ;;  %v6628_v14 = vmin.f32 %v2656_v42, 1.0 }
 0x329   : > { %v6624_v22 = vpop.eup %3936  ;;  %v2605_v23 = vsel %vm2384_vm3, %v2499_v48, %v6232_v29  ;;  %3956 = vrcp.f32 %v3168_v35  ;;  %v3049_v0 = vmul.f32 1.442695, %v2981_v20  ;;  %v2984_v9 = vsub.f32 0.0, %v1464_v61  ;;  %v1468_v63 = vpop.f32.mrf.mxu1 }
 0x32a   : > { %v6633_v38 = vpop.eup %3938  ;;  %v3166_v15 = vadd.f32 1.0, %v3118_v17  ;;  %3958 = vpow2.f32 %v3043_v31  ;;  %v2846_v59 = vmax.f32 %v6599_v32, 0.001  ;;  %v2607_v10 = vsel %vm2384_vm3, %v2507_v28, %v6246_v2 }
 0x32b   : > { %v3941_v50 = vpop.eup %3940  ;;  %3960 = vpow2.f32 %v3053_v39  ;;  %v1456_v43 = vadd.f32 %v6285_v19, %v1455_v36  ;;  %v2843_v29 = vmax.f32 %v6613_v11, 0.001  ;;  %v2653_v48 = vmax.f32 %v2605_v23, 0.0  ;;  %v3686_v28 = vpop.f32.mrf.mxu1 }
 0x32c   : > { %v6640_v42 = vpop.eup %3942  ;;  %3962 = vrcp.f32 %v3166_v15  ;;  %v3055_v4 = vmul.f32 1.442695, %v2984_v9  ;;  %v2929_v40 = vmul.f32 %v6552_v44, %v6500_v37  ;;  %v2743_v41 = vsub.f32 1.0, %v6546_v52 }
 0x32d   : > { %3964 = vpow2.f32 %v3049_v0  ;;  %v2982_v27 = vsub.f32 0.0, %v1456_v43  ;;  %v6646_v7 = vpop.eup %3944  ;;  %v2931_v2 = vmul.f32 %v3929_v6, %v6573_v16  ;;  %v2848_v62 = vmax.f32 %v6628_v14, 0.001 }
 0x32e   : > { %v2655_v57 = vmax.f32 %v2607_v10, 0.0  ;;  %3966 = vpow2.f32 %v3055_v4  ;;  %v2748_v58 = vsub.f32 1.0, %v6550_v54  ;;  %v1477_v37 = vadd.f32 %v3685_v26, %v6285_v19  ;;  %v2519_v10 = vpop.permute.xlu0 %2518  ;;  %v2515_v4 = vpop.permute.xlu1 %2514 }
 0x32f   : > { %v3947_v53 = vpop.eup %3946  ;;  %3968 = vrcp.f32 %v2846_v59  ;;  %v3051_v3 = vmul.f32 1.442695, %v2982_v27  ;;  %v2745_v52 = vsub.f32 1.0, %v6563_v13  ;;  %v6653_v44 = vmin.f32 %v2653_v48, 1.0  ;;  %v1471_v59 = vpop.f32.mrf.mxu1 }
 0x330   : > { %3970 = vrcp.f32 %v2843_v29  ;;  %v3123_v18 = vmul.f32 %v3947_v53, %v2931_v2  ;;  %v3949_v16 = vpop.eup %3948  ;;  %v2791_v6 = vmax.f32 %v2743_v41, 0.001  ;;  %v2987_v30 = vsub.f32 0.0, %v1477_v37  ;;  %v7461_v2 = vld [vmem:[#allocation36_spill] sm:$0xff] }
 0x331   : > { %3972 = vpow2.f32 %v3051_v3  ;;  %v1469_v46 = vadd.f32 %v6285_v19, %v1468_v63  ;;  %v6656_v35 = vmin.f32 %v2655_v57, 1.0  ;;  %v3121_v56 = vmul.f32 %v3949_v16, %v2929_v40 }
 0x332   : > { %v3951_v5 = vpop.eup %3950  ;;  %3974 = vrcp.f32 %v2848_v62  ;;  %v3171_v31 = vadd.f32 1.0, %v3123_v18  ;;  %v3061_v20 = vmul.f32 1.442695, %v2987_v30  ;;  %v1480_v23 = vadd.f32 %v3686_v28, %v6285_v19  ;;  %v7462_v30 = vld [vmem:[#allocation34_spill] sm:$0xff] }
 0x333   : > { %v3953_v17 = vpop.eup %3952  ;;  %v3264_v39 = vsel %vm3249_vm4, %v3951_v5, %v5903_v60  ;;  %v2985_v61 = vsub.f32 0.0, %v1469_v46  ;;  %v2845_v15 = vmax.f32 %v6653_v44, 0.001  ;;  %v3169_v0 = vadd.f32 1.0, %v3121_v56 }
 0x334   : > { %v3955_v36 = vpop.eup %3954  ;;  %3312 = vst [vmem:[%s6444_s25 + $0x70] sm:$0xff] %v3264_v39  ;;  %3976 = vrcp.f32 %v3171_v31  ;;  %v3124_v9 = vmul.f32 %v3953_v17, %v2932_v8  ;;  %v2988_v29 = vsub.f32 0.0, %v1480_v23  ;;  %v2935_v19 = vmul.f32 %v3941_v50, %v2791_v6  ;;  %v6671_v8 = vld [vmem:[%s7094_s7] ss:$0 sm:$0xff]  ;;  %v2527_v31 = vpop.permute.xlu0 %2526 }
 0x335   : > { %v3262_v43 = vsel %vm3249_vm4, %v3955_v36, %v5871_v1  ;;  %3978 = vpow2.f32 %v3061_v20  ;;  %v3057_v60 = vmul.f32 1.442695, %v2985_v61  ;;  %v1472_v41 = vadd.f32 %v6671_v8, %v1471_v59  ;;  %v2523_v17 = vpop.permute.xlu1 %2522 }
 0x336   : > { %v3957_v48 = vpop.eup %3956  ;;  %3310 = vst [vmem:[%s6444_s25 + $0x60] sm:$0xff] %v3262_v43  ;;  %3980 = vrcp.f32 %v3169_v0  ;;  %v3172_v40 = vadd.f32 1.0, %v3124_v9  ;;  %v2847_v1 = vmax.f32 %v6656_v35, 0.001  ;;  %v3063_v50 = vmul.f32 1.442695, %v2988_v29 }
 0x337   : > { %v3959_v27 = vpop.eup %3958  ;;  %v3265_v62 = vsel %vm3249_vm4, %v3957_v48, %v7461_v2  ;;  %3982 = vpow2.f32 %v3057_v60  ;;  %v2936_v26 = vmul.f32 %v6619_v45, %v6579_v55  ;;  %v2986_v3 = vsub.f32 0.0, %v1472_v41  ;;  %v7464_v2 = vld [vmem:[#allocation41_spill] sm:$0xff] }
 0x338   : > { %v3961_v57 = vpop.eup %3960  ;;  %3313 = vst [vmem:[%s6444_s25 + $0x78] sm:$0xff] %v3265_v62  ;;  %3984 = vrcp.f32 %v3172_v40  ;;  %v3122_v53 = vmul.f32 %v3959_v27, %v6577_v12  ;;  %v2933_v18 = vmul.f32 %v6624_v22, %v6582_v34  ;;  %v2747_v63 = vsub.f32 1.0, %v6613_v11 }
 0x339   : > { %v3963_v37 = vpop.eup %3962  ;;  %v3127_v16 = vmul.f32 %v3961_v57, %v2935_v19  ;;  %3986 = vpow2.f32 %v3063_v50  ;;  %v3059_v46 = vmul.f32 1.442695, %v2986_v3  ;;  %v2934_v12 = vmul.f32 %v6565_v49, %v6502_v24 }
 0x33a   : > { %v3965_v6 = vpop.eup %3964  ;;  %3988 = vrcp.f32 %v2845_v15  ;;  %v3263_v55 = vsel %vm3249_vm4, %v3963_v37, %v7462_v30  ;;  %v3170_v45 = vadd.f32 1.0, %v3122_v53  ;;  %v2796_v56 = vmax.f32 %v2748_v58, 0.001  ;;  %v3689_v58 = vpop.f32.mrf.mxu1 }
 0x33b   : > { %v3967_v5 = vpop.eup %3966  ;;  %3990 = vrcp.f32 %v2847_v1  ;;  %3311 = vst [vmem:[%s6444_s25 + $0x68] sm:$0xff] %v3263_v55  ;;  %v3175_v34 = vadd.f32 1.0, %v3127_v16  ;;  %v3125_v22 = vmul.f32 %v3965_v6, %v2933_v18  ;;  %v2793_v28 = vmax.f32 %v2745_v52, 0.001 }
 0x33c   : > { %v6691_v11 = vpop.eup %3968  ;;  %3992 = vrcp.f32 %v3170_v45  ;;  %v3128_v39 = vmul.f32 %v3967_v5, %v2936_v26  ;;  %v2750_v61 = vsub.f32 1.0, %v6599_v32  ;;  %v6701_v24 = vsel %vm2384_vm3, %v2519_v10, %v6280_v51  ;;  %v7463_v10 = vld [vmem:[#allocation81_spill] sm:$0xff]  ;;  %v1484_v43 = vpop.f32.mrf.mxu1 }
 0x33d   : > { %v3971_v20 = vpop.eup %3970  ;;  %3994 = vrcp.f32 %v3175_v34  ;;  %v3173_v49 = vadd.f32 1.0, %v3125_v22  ;;  %v2795_v36 = vmax.f32 %v2747_v63, 0.001  ;;  %v2612_v54 = vsel %vm2384_vm3, %v2527_v31, %v6297_v21  ;;  %v7465_v63 = vld [vmem:[#allocation38_spill] sm:$0xff]  ;;  %v7466_v31 = vld [vmem:[#allocation13_spill] sm:$0xff] }
 0x33e   : > { %v3973_v23 = vpop.eup %3972  ;;  %v3176_v13 = vadd.f32 1.0, %v3128_v39  ;;  %3996 = vpow2.f32 %v3059_v46  ;;  %v2611_v15 = vsel %vm2384_vm3, %v2523_v17, %v6274_v25  ;;  %v1493_v0 = vadd.f32 %v6671_v8, %v3689_v58  ;;  %v3690_v50 = vpop.f32.mrf.mxu1 }
 0x33f   : > { %v6706_v52 = vpop.eup %3974  ;;  %3998 = vrcp.f32 %v3173_v49  ;;  %v3126_v51 = vmul.f32 %v3973_v23, %v2934_v12  ;;  %v2752_v9 = vsub.f32 1.0, %v6628_v14  ;;  %v2658_v59 = vmax.f32 %v6701_v24, 0.0  ;;  %v6739_v39 = vpop.permute.xlu1 %2530  ;;  %v7473_v14 = vld [vmem:[#allocation52_spill] sm:$0xff] }
 0x340   : > { %v2609_v21 = vsel %vm2384_vm3, %v2515_v4, %v7463_v10  ;;  %4000 = vrcp.f32 %v3176_v13  ;;  %v2939_v29 = vmul.f32 %v3971_v20, %v2795_v36  ;;  %v2991_v19 = vsub.f32 0.0, %v1493_v0  ;;  %v1487_v6 = vpop.f32.mrf.mxu1 }
 0x341   : > { %v3977_v60 = vpop.eup %3976  ;;  %v3174_v48 = vadd.f32 1.0, %v3126_v51  ;;  %v1485_v25 = vadd.f32 %v6671_v8, %v1484_v43  ;;  %v2937_v41 = vmul.f32 %v6646_v7, %v2793_v28  ;;  %v2660_v27 = vmax.f32 %v2612_v54, 0.0  ;;  %v2535_v28 = vpop.permute.xlu0 %2534  ;;  %v7467_v43 = vld [vmem:[#allocation39_spill] sm:$0xff] }
 0x342   : > { %v3979_v40 = vpop.eup %3978  ;;  %v2659_v1 = vmax.f32 %v2611_v15, 0.0  ;;  %v3268_v62 = vsel %vm3249_vm4, %v3977_v60, %v7464_v2  ;;  %v3069_v26 = vmul.f32 1.442695, %v2991_v19  ;;  %v2940_v37 = vmul.f32 %v6640_v42, %v2796_v56 }
 0x343   : > { %v3981_v4 = vpop.eup %3980  ;;  %3316 = vst [vmem:[%s6444_s25 + $0x90] sm:$0xff] %v3268_v62  ;;  %4002 = vrcp.f32 %v3174_v48  ;;  %v3131_v57 = vmul.f32 %v3979_v40, %v2939_v29  ;;  %v2989_v53 = vsub.f32 0.0, %v1485_v25  ;;  %v2657_v18 = vmax.f32 %v2609_v21, 0.0  ;;  %v7469_v40 = vld [vmem:[#allocation40_spill] sm:$0xff] }
 0x344   : > { %v3983_v3 = vpop.eup %3982  ;;  %v3266_v7 = vsel %vm3249_vm4, %v3981_v4, %v7465_v63  ;;  %v1496_v16 = vadd.f32 %v6671_v8, %v3690_v50  ;;  %4004 = vpow2.f32 %v3069_v26  ;;  %v6729_v12 = vmin.f32 %v2660_v27, 1.0  ;;  %v2539_v26 = vpop.permute.xlu1 %2538 }
 0x345   : > { %v3985_v30 = vpop.eup %3984  ;;  %3314 = vst [vmem:[%s6444_s25 + $0x80] sm:$0xff] %v3266_v7  ;;  %v3179_v55 = vadd.f32 1.0, %v3131_v57  ;;  %v3129_v45 = vmul.f32 %v3983_v3, %v2937_v41  ;;  %v3065_v46 = vmul.f32 1.442695, %v2989_v53  ;;  %v1488_v22 = vadd.f32 %v6671_v8, %v1487_v6  ;;  %v7470_v41 = vld [vmem:[#allocation131_spill] sm:$0xff]  ;;  %v2543_v57 = vpop.permute.xlu0 %2542  ;;  %v7472_v3 = vld [vmem:[#allocation17_spill] sm:$0xff] }
 0x346   : > { %v3987_v5 = vpop.eup %3986  ;;  %v3269_v42 = vsel %vm3249_vm4, %v3985_v30, %v7466_v31  ;;  %v2992_v34 = vsub.f32 0.0, %v1496_v16  ;;  %v6737_v17 = vmin.f32 %v2659_v1, 1.0  ;;  %v2938_v36 = vmul.f32 %v6633_v38, %v6590_v33  ;;  %v7471_v53 = vld [vmem:[#allocation15_spill] sm:$0xff] }
 0x347   : > { %v6735_v56 = vpop.eup %3988  ;;  %3317 = vst [vmem:[%s6444_s25 + $0x98] sm:$0xff] %v3269_v42  ;;  %4006 = vrcp.f32 %v3179_v55  ;;  %v3177_v20 = vadd.f32 1.0, %v3129_v45  ;;  %v3132_v49 = vmul.f32 %v3987_v5, %v2940_v37  ;;  %v2990_v13 = vsub.f32 0.0, %v1488_v22  ;;  %v7474_v30 = vld [vmem:[#allocation23_spill] sm:$0xff]  ;;  %v7475_v5 = vld [vmem:[#allocation14_spill] sm:$0xff] }
 0x348   : > { %v3991_v23 = vpop.eup %3990  ;;  %4008 = vpow2.f32 %v3065_v46  ;;  %v3071_v54 = vmul.f32 1.442695, %v2992_v34  ;;  %v2749_v15 = vsub.f32 1.0, %v6653_v44  ;;  %v6745_v51 = vmin.f32 %v2657_v18, 1.0  ;;  %v7468_v44 = vld [vmem:[#allocation45_spill] sm:$0xff] }
 0x349   : > { %v3993_v58 = vpop.eup %3992  ;;  %4010 = vrcp.f32 %v3177_v20  ;;  %v3180_v0 = vadd.f32 1.0, %v3132_v49  ;;  %v2852_v21 = vmax.f32 %v6729_v12, 0.001  ;;  %v3067_v33 = vmul.f32 1.442695, %v2990_v13 }
 0x34a   : > { %v3995_v10 = vpop.eup %3994  ;;  %v3267_v60 = vsel %vm3249_vm4, %v3993_v58, %v7467_v43  ;;  %4012 = vpow2.f32 %v3071_v54  ;;  %v2751_v29 = vsub.f32 1.0, %v6656_v35  ;;  %v2851_v48 = vmax.f32 %v6737_v17, 0.001 }
 0x34b   : > { %v3997_v38 = vpop.eup %3996  ;;  %3315 = vst [vmem:[%s6444_s25 + $0x88] sm:$0xff] %v3267_v60  ;;  %v3272_v19 = vsel %vm3249_vm4, %v3995_v10, %v7468_v44  ;;  %4014 = vrcp.f32 %v3180_v0  ;;  %v2375_v27 = vsel %vm2143_vm2, %v7470_v41, %v7469_v40  ;;  %v6763_v1 = vmin.f32 %v2658_v59, 1.0 }
 0x34c   : > { %v3999_v25 = vpop.eup %3998  ;;  %3320 = vst [vmem:[%s6444_s25 + $0xb0] sm:$0xff] %v3272_v19  ;;  %v3130_v35 = vmul.f32 %v3997_v38, %v2938_v36  ;;  %4016 = vpow2.f32 %v3067_v33  ;;  %v2798_v62 = vmax.f32 %v2750_v61, 0.001  ;;  %v2800_v50 = vmax.f32 %v2752_v9, 0.001  ;;  %v3693_v61 = vpop.f32.mrf.mxu1  ;;  %v7477_v38 = vld [vmem:[#allocation73_spill] sm:$0xff] }
 0x34d   : > { %v4001_v2 = vpop.eup %4000  ;;  %v2797_v4 = vmax.f32 %v2749_v15, 0.001  ;;  %v3270_v24 = vsel %vm3249_vm4, %v3999_v25, %v7471_v53  ;;  %4018 = vrcp.f32 %v2852_v21  ;;  %v2849_v59 = vmax.f32 %v6745_v51, 0.001  ;;  %v7476_v21 = vld [vmem:[#allocation51_spill] sm:$0xff]  ;;  %v6806_v25 = vpop.permute.xlu1 %2546 }
 0x34e   : > { %3318 = vst [vmem:[%s6444_s25 + $0xa0] sm:$0xff] %v3270_v24  ;;  %v3273_v32 = vsel %vm3249_vm4, %v4001_v2, %v7472_v3  ;;  %v3178_v37 = vadd.f32 1.0, %v3130_v35  ;;  %v2799_v18 = vmax.f32 %v2751_v29, 0.001  ;;  %v2614_v9 = vsel %vm2384_vm3, %v2535_v28, %v7473_v14  ;;  %v1500_v45 = vpop.f32.mrf.mxu1 }
 0x34f   : > { %4020 = vrcp.f32 %v2851_v48  ;;  %3321 = vst [vmem:[%s6444_s25 + $0xb8] sm:$0xff] %v3273_v32  ;;  %v1509_v63 = vadd.f32 %v6671_v8, %v3693_v61  ;;  %v2754_v16 = vsub.f32 1.0, %v6763_v1  ;;  %v2616_v6 = vsel %vm2384_vm3, %v2543_v57, %v2375_v27 }
 0x350   : > { %v4003_v7 = vpop.eup %4002  ;;  %v2615_v55 = vsel %vm2384_vm3, %v2539_v26, %v7474_v30  ;;  %4022 = vrcp.f32 %v3178_v37  ;;  %v2943_v46 = vmul.f32 %v3991_v23, %v2799_v18  ;;  %v1501_v34 = vadd.f32 %v6671_v8, %v1500_v45  ;;  %v3694_v36 = vpop.f32.mrf.mxu1 }
 0x351   : > { %v3271_v31 = vsel %vm3249_vm4, %v4003_v7, %v7475_v5  ;;  %v2995_v42 = vsub.f32 0.0, %v1509_v63  ;;  %v4005_v22 = vpop.eup %4004  ;;  %v2942_v28 = vmul.f32 %v6691_v11, %v2798_v62  ;;  %v2850_v20 = vmax.f32 %v6763_v1, 0.001  ;;  %v7478_v62 = vld [vmem:[#allocation46_spill] sm:$0xff]  ;;  %v2555_v45 = vpop.permute.xlu1 %2554 }
 0x352   : > { %4024 = vrcp.f32 %v2849_v59  ;;  %v2662_v49 = vmax.f32 %v2614_v9, 0.0  ;;  %3319 = vst [vmem:[%s6444_s25 + $0xa8] sm:$0xff] %v3271_v31  ;;  %v3135_v54 = vmul.f32 %v4005_v22, %v2943_v46  ;;  %v2993_v58 = vsub.f32 0.0, %v1501_v34  ;;  %v1503_v60 = vpop.f32.mrf.mxu1  ;;  %v7479_v59 = vld [vmem:[#allocation47_spill] sm:$0xff]  ;;  %v7480_v31 = vld [vmem:[#allocation65_spill] sm:$0xff] }
 0x353   : > { %v3077_v13 = vmul.f32 1.442695, %v2995_v42  ;;  %v1512_v23 = vadd.f32 %v6671_v8, %v3694_v36  ;;  %v2941_v0 = vmul.f32 %v6735_v56, %v2797_v4  ;;  %v2664_v10 = vmax.f32 %v2616_v6, 0.0  ;;  %v7481_v42 = vld [vmem:[#allocation20_spill] sm:$0xff]  ;;  %v7483_v22 = vld [vmem:[#allocation133_spill] sm:$0xff] }
 0x354   : > { %v4007_v15 = vpop.eup %4006  ;;  %v2613_v11 = vsel %vm2384_vm3, %v6739_v39, %v7476_v21  ;;  %v2663_v43 = vmax.f32 %v2615_v55, 0.0  ;;  %v3183_v48 = vadd.f32 1.0, %v3135_v54  ;;  %v3073_v44 = vmul.f32 1.442695, %v2993_v58  ;;  %v7484_v54 = vld [vmem:[#allocation16_spill] sm:$0xff] }
 0x355   : > { %v4009_v33 = vpop.eup %4008  ;;  %v3276_v29 = vsel %vm3249_vm4, %v4007_v15, %v7477_v38  ;;  %4026 = vpow2.f32 %v3077_v13  ;;  %v2944_v56 = vmul.f32 %v6706_v52, %v2800_v50  ;;  %v2996_v41 = vsub.f32 0.0, %v1512_v23  ;;  %v7485_v15 = vld [vmem:[#allocation43_spill] sm:$0xff] }
 0x356   : > { %v4011_v19 = vpop.eup %4010  ;;  %3324 = vst [vmem:[%s6444_s25 + $0xd0] sm:$0xff] %v3276_v29  ;;  %v3133_v40 = vmul.f32 %v4009_v33, %v2941_v0  ;;  %v1504_v39 = vadd.f32 %v6671_v8, %v1503_v60  ;;  %v6810_v35 = vmin.f32 %v2662_v49, 1.0  ;;  %v2661_v2 = vmax.f32 %v2613_v11, 0.0  ;;  %v7486_v0 = vld [vmem:[#allocation135_spill] sm:$0xff] }
 0x357   : > { %v4013_v27 = vpop.eup %4012  ;;  %v3274_v4 = vsel %vm3249_vm4, %v4011_v19, %v7478_v62  ;;  %4028 = vrcp.f32 %v3183_v48  ;;  %v3079_v26 = vmul.f32 1.442695, %v2996_v41  ;;  %v6816_v24 = vmin.f32 %v2663_v43, 1.0  ;;  %v3697_v58 = vpop.f32.mrf.mxu1 }
 0x358   : > { %v4015_v57 = vpop.eup %4014  ;;  %3322 = vst [vmem:[%s6444_s25 + $0xc0] sm:$0xff] %v3274_v4  ;;  %v3181_v52 = vadd.f32 1.0, %v3133_v40  ;;  %v3136_v50 = vmul.f32 %v4013_v27, %v2944_v56  ;;  %4030 = vpow2.f32 %v3073_v44  ;;  %v2994_v32 = vsub.f32 0.0, %v1504_v39 }
 0x359   : > { %v4017_v53 = vpop.eup %4016  ;;  %4032 = vrcp.f32 %v2850_v20  ;;  %v3277_v3 = vsel %vm3249_vm4, %v4015_v57, %v7479_v59  ;;  %v6821_v37 = vmin.f32 %v2664_v10, 1.0  ;;  %v2756_v9 = vsub.f32 1.0, %v6729_v12  ;;  %v7482_v12 = vld [vmem:[#allocation42_spill] sm:$0xff]  ;;  %v1516_v38 = vpop.f32.mrf.mxu1 }
 0x35a   : > { %3325 = vst [vmem:[%s6444_s25 + $0xd8] sm:$0xff] %v3277_v3  ;;  %4034 = vrcp.f32 %v3181_v52  ;;  %v3184_v61 = vadd.f32 1.0, %v3136_v50  ;;  %v3134_v18 = vmul.f32 %v4017_v53, %v2942_v28  ;;  %v6824_v14 = vpop.eup %4018  ;;  %v2755_v63 = vsub.f32 1.0, %v6737_v17  ;;  %v2551_v28 = vpop.permute.xlu0 %2550  ;;  %v7487_v50 = vld [vmem:[#allocation22_spill] sm:$0xff] }
 0x35b   : > { %4036 = vpow2.f32 %v3079_v26  ;;  %v3075_v7 = vmul.f32 1.442695, %v2994_v32  ;;  %v2854_v30 = vmax.f32 %v6810_v35, 0.001  ;;  %v6829_v55 = vmin.f32 %v2661_v2, 1.0  ;;  %v3698_v39 = vpop.f32.mrf.mxu1  ;;  %v7488_v3 = vld [vmem:[#allocation18_spill] sm:$0xff] }
 0x35c   : > { %v4021_v6 = vpop.eup %4020  ;;  %4038 = vrcp.f32 %v3184_v61  ;;  %v3182_v46 = vadd.f32 1.0, %v3134_v18  ;;  %v2378_v34 = vsel %vm2143_vm2, %v7481_v42, %v7480_v31  ;;  %v2377_v17 = vsel %vm2143_vm2, %v7483_v22, %v7482_v12  ;;  %v6875_v42 = vpop.permute.xlu1 %2562 }
 0x35d   : > { %v4023_v5 = vpop.eup %4022  ;;  %v2855_v20 = vmax.f32 %v6816_v24, 0.001  ;;  %4040 = vpow2.f32 %v3075_v7  ;;  %v2753_v49 = vsub.f32 1.0, %v6745_v51  ;;  %v2856_v36 = vmax.f32 %v6821_v37, 0.001  ;;  %v1519_v53 = vpop.f32.mrf.mxu1 }
 0x35e   : > { %v3275_v13 = vsel %vm3249_vm4, %v4023_v5, %v7484_v54  ;;  %4042 = vrcp.f32 %v3182_v46  ;;  %v2379_v10 = vsel %vm2143_vm2, %v7486_v0, %v7485_v15  ;;  %v2803_v21 = vmax.f32 %v2755_v63, 0.001  ;;  %v2559_v27 = vpop.permute.xlu0 %2558 }
 0x35f   : > { %v4025_v23 = vpop.eup %4024  ;;  %v2619_v11 = vsel %vm2384_vm3, %v2555_v45, %v2378_v34  ;;  %3323 = vst [vmem:[%s6444_s25 + $0xc8] sm:$0xff] %v3275_v13  ;;  %v1525_v51 = vadd.f32 %v6671_v8, %v3697_v58  ;;  %v2802_v43 = vmax.f32 %v2754_v16, 0.001  ;;  %v2804_v60 = vmax.f32 %v2756_v9, 0.001  ;;  %v7489_v34 = vld [vmem:[#allocation19_spill] sm:$0xff] }
 0x360   : > { %4044 = vrcp.f32 %v2854_v30  ;;  %v2853_v33 = vmax.f32 %v6829_v55, 0.001  ;;  %v2947_v29 = vmul.f32 %v4021_v6, %v2803_v21  ;;  %v1517_v44 = vadd.f32 %v6671_v8, %v1516_v38 }
 0x361   : > { %4046 = vrcp.f32 %v2855_v20  ;;  %v2999_v48 = vsub.f32 0.0, %v1525_v51  ;;  %v2801_v56 = vmax.f32 %v2753_v49, 0.001  ;;  %v2758_v40 = vsub.f32 1.0, %v6810_v35 }
 0x362   : > { %v4027_v19 = vpop.eup %4026  ;;  %4048 = vrcp.f32 %v2856_v36  ;;  %v2667_v41 = vmax.f32 %v2619_v11, 0.0  ;;  %v2997_v2 = vsub.f32 0.0, %v1517_v44  ;;  %v1528_v62 = vadd.f32 %v6671_v8, %v3698_v39 }
 0x363   : > { %v3139_v1 = vmul.f32 %v4027_v19, %v2947_v29  ;;  %v3085_v16 = vmul.f32 1.442695, %v2999_v48  ;;  %v2945_v57 = vmul.f32 %v4025_v23, %v2801_v56  ;;  %4050 = vrcp.f32 %v2853_v33  ;;  %v7490_v23 = vld [vmem:[#allocation78_spill] sm:$0xff]  ;;  %v7492_v29 = vld [vmem:[#allocation12_spill] sm:$0xff]  ;;  %v7495_v56 = vld [vmem:[#allocation25_spill] sm:$0xff] }
 0x364   : > { %v4029_v4 = vpop.eup %4028  ;;  %v2618_v52 = vsel %vm2384_vm3, %v2551_v28, %v2377_v17  ;;  %v2617_v26 = vsel %vm2384_vm3, %v6806_v25, %v7487_v50  ;;  %v3081_v18 = vmul.f32 1.442695, %v2997_v2  ;;  %v2620_v63 = vsel %vm2384_vm3, %v2559_v27, %v2379_v10  ;;  %v7493_v48 = vld [vmem:[#allocation114_spill] sm:$0xff]  ;;  %v7494_v19 = vld [vmem:[#allocation44_spill] sm:$0xff]  ;;  %v7497_v50 = vld [vmem:[#allocation29_spill] sm:$0xff] }
 0x365   : > { %v4031_v59 = vpop.eup %4030  ;;  %v3280_v32 = vsel %vm3249_vm4, %v4029_v4, %v7488_v3  ;;  %v3187_v61 = vadd.f32 1.0, %v3139_v1  ;;  %4052 = vpow2.f32 %v3085_v16  ;;  %v3000_v6 = vsub.f32 0.0, %v1528_v62  ;;  %v2571_v62 = vpop.permute.xlu1 %2570 }
 0x366   : > { %v4033_v9 = vpop.eup %4032  ;;  %3328 = vst [vmem:[%s6444_s25 + $0xf0] sm:$0xff] %v3280_v32  ;;  %v3137_v7 = vmul.f32 %v4031_v59, %v2945_v57  ;;  %v1520_v30 = vadd.f32 %v6671_v8, %v1519_v53  ;;  %v2948_v45 = vmul.f32 %v6824_v14, %v2804_v60  ;;  %v2665_v46 = vmax.f32 %v2617_v26, 0.0 }
 0x367   : > { %v4035_v25 = vpop.eup %4034  ;;  %v6873_v5 = vmin.f32 %v2667_v41, 1.0  ;;  %4054 = vrcp.f32 %v3187_v61  ;;  %v3087_v17 = vmul.f32 1.442695, %v3000_v6  ;;  %v2946_v20 = vmul.f32 %v4033_v9, %v2802_v43  ;;  %v3701_v4 = vpop.f32.mrf.mxu1 }
 0x368   : > { %v4037_v31 = vpop.eup %4036  ;;  %v3278_v12 = vsel %vm3249_vm4, %v4035_v25, %v7489_v34  ;;  %v3185_v22 = vadd.f32 1.0, %v3137_v7  ;;  %4056 = vpow2.f32 %v3081_v18  ;;  %v2666_v49 = vmax.f32 %v2618_v52, 0.0  ;;  %v7496_v52 = vld [vmem:[#allocation70_spill] sm:$0xff] }
 0x369   : > { %v4039_v28 = vpop.eup %4038  ;;  %3326 = vst [vmem:[%s6444_s25 + $0xe0] sm:$0xff] %v3278_v12  ;;  %v3140_v14 = vmul.f32 %v4037_v31, %v2948_v45  ;;  %v2998_v36 = vsub.f32 0.0, %v1520_v30  ;;  %v2759_v13 = vsub.f32 1.0, %v6816_v24  ;;  %v2668_v58 = vmax.f32 %v2620_v63, 0.0  ;;  %v7491_v24 = vld [vmem:[#allocation48_spill] sm:$0xff]  ;;  %v1532_v61 = vpop.f32.mrf.mxu1 }
 0x36a   : > { %v4041_v54 = vpop.eup %4040  ;;  %v3281_v15 = vsel %vm3249_vm4, %v4039_v28, %v7490_v23  ;;  %4058 = vrcp.f32 %v3185_v22  ;;  %v2760_v51 = vsub.f32 1.0, %v6821_v37  ;;  %v6887_v43 = vmin.f32 %v2665_v46, 1.0  ;;  %v2567_v37 = vpop.permute.xlu0 %2566 }
 0x36b   : > { %v4043_v0 = vpop.eup %4042  ;;  %3329 = vst [vmem:[%s6444_s25 + $0xf8] sm:$0xff] %v3281_v15  ;;  %v3188_v10 = vadd.f32 1.0, %v3140_v14  ;;  %v3138_v21 = vmul.f32 %v4041_v54, %v2946_v20  ;;  %4060 = vpow2.f32 %v3087_v17  ;;  %v3083_v11 = vmul.f32 1.442695, %v2998_v36  ;;  %v3702_v31 = vpop.f32.mrf.mxu1 }
 0x36c   : > { %v2859_v60 = vmax.f32 %v6873_v5, 0.001  ;;  %v3279_v33 = vsel %vm3249_vm4, %v4043_v0, %v7491_v24  ;;  %v6897_v44 = vadd.f32 %v7493_v48, %v7492_v29  ;;  %v2380_v41 = vsel %vm2143_vm2, %v7495_v56, %v7494_v19  ;;  %v7501_v19 = vld [vmem:[#allocation49_spill] sm:$0xff] }
 0x36d   : > { %v6893_v38 = vpop.eup %4044  ;;  %3327 = vst [vmem:[%s6444_s25 + $0xe8] sm:$0xff] %v3279_v33  ;;  %4062 = vrcp.f32 %v3188_v10  ;;  %v3186_v39 = vadd.f32 1.0, %v3138_v21  ;;  %v2757_v1 = vsub.f32 1.0, %v6829_v55  ;;  %v6905_v16 = vmin.f32 %v2666_v49, 1.0  ;;  %v1535_v54 = vpop.f32.mrf.mxu1 }
 0x36e   : > { %v4047_v27 = vpop.eup %4046  ;;  %v6907_v2 = vmin.f32 %v2668_v58, 1.0  ;;  %4064 = vpow2.f32 %v3083_v11  ;;  %v2382_v26 = vsel %vm2143_vm2, %v7497_v50, %v7496_v52  ;;  %v2807_v53 = vmax.f32 %v2759_v13, 0.001  ;;  %v2575_v49 = vpop.permute.xlu0 %2574  ;;  %v7499_v58 = vld [vmem:[#allocation21_spill] sm:$0xff] }
 0x36f   : > { %v4049_v57 = vpop.eup %4048  ;;  %4066 = vrcp.f32 %v3186_v39  ;;  %v1541_v59 = vadd.f32 %v6671_v8, %v3701_v4  ;;  %v2806_v55 = vmax.f32 %v2758_v40, 0.001  ;;  %v2808_v3 = vmax.f32 %v2760_v51, 0.001  ;;  %v7498_v40 = vld [vmem:[#allocation137_spill] sm:$0xff] }
 0x370   : > { %v2857_v32 = vmax.f32 %v6887_v43, 0.001  ;;  %4068 = vrcp.f32 %v2859_v60  ;;  %v4051_v18 = vpop.eup %4050  ;;  %v2951_v9 = vmul.f32 %v4047_v27, %v2807_v53  ;;  %v2623_v63 = vsel %vm2384_vm3, %v2571_v62, %v2382_v26 }
 0x371   : > { %v3003_v7 = vsub.f32 0.0, %v1541_v59  ;;  %v1533_v6 = vadd.f32 %v6671_v8, %v1532_v61  ;;  %v2805_v25 = vmax.f32 %v2757_v1, 0.001  ;;  %v2858_v45 = vmax.f32 %v6905_v16, 0.001 }
 0x372   : > { %v4053_v30 = vpop.eup %4052  ;;  %v2860_v35 = vmax.f32 %v6907_v2, 0.001  ;;  %v6925_v46 = vsel %vm2384_vm3, %v2567_v37, %v7498_v40  ;;  %v1544_v17 = vadd.f32 %v6671_v8, %v3702_v31  ;;  %4070 = vrcp.f32 %v2857_v32 }
 0x373   : > { %v3143_v34 = vmul.f32 %v4053_v30, %v2951_v9  ;;  %v3093_v12 = vmul.f32 1.442695, %v3003_v7  ;;  %v3001_v22 = vsub.f32 0.0, %v1533_v6  ;;  %v2949_v20 = vmul.f32 %v4051_v18, %v2805_v25  ;;  %v7502_v18 = vld [vmem:[#allocation50_spill] sm:$0xff]  ;;  %v7503_v30 = vld [vmem:[#allocation116_spill] sm:$0xff] }
 0x374   : > { %v4055_v28 = vpop.eup %4054  ;;  %v2621_v14 = vsel %vm2384_vm3, %v6875_v42, %v2380_v41  ;;  %v2671_v36 = vmax.f32 %v2623_v63, 0.0  ;;  %v3004_v21 = vsub.f32 0.0, %v1544_v17  ;;  %v1536_v11 = vadd.f32 %v6671_v8, %v1535_v54  ;;  %v7500_v42 = vld [vmem:[#allocation139_spill] sm:$0xff] }
 0x375   : > { %v4057_v13 = vpop.eup %4056  ;;  %v3284_v23 = vsel %vm3249_vm4, %v4055_v28, %v7499_v58  ;;  %v3191_v15 = vadd.f32 1.0, %v3143_v34  ;;  %4072 = vpow2.f32 %v3093_v12  ;;  %v3089_v0 = vmul.f32 1.442695, %v3001_v22 }
 0x376   : > { %4074 = vrcp.f32 %v2860_v35  ;;  %3332 = vst [vmem:[%s6444_s25 + $0x110] sm:$0xff] %v3284_v23  ;;  %v3141_v10 = vmul.f32 %v4057_v13, %v2949_v20  ;;  %v2952_v60 = vmul.f32 %v4049_v57, %v2808_v3  ;;  %v2624_v24 = vsel %vm2384_vm3, %v2575_v49, %v7500_v42  ;;  %v7504_v20 = vld [vmem:[#allocation122_spill] sm:$0xff] }
 0x377   : > { %v4059_v51 = vpop.eup %4058  ;;  %v2669_v33 = vmax.f32 %v2621_v14, 0.0  ;;  %4076 = vrcp.f32 %v3191_v15  ;;  %v3095_v37 = vmul.f32 1.442695, %v3004_v21  ;;  %v6942_v39 = vmin.f32 %v2671_v36, 1.0  ;;  %v3705_v6 = vpop.f32.mrf.mxu1 }
 0x378   : > { %v4061_v48 = vpop.eup %4060  ;;  %v3282_v56 = vsel %vm3249_vm4, %v4059_v51, %v7501_v19  ;;  %v3189_v41 = vadd.f32 1.0, %v3141_v10  ;;  %4078 = vpow2.f32 %v3089_v0  ;;  %v3002_v1 = vsub.f32 0.0, %v1536_v11 }
 0x379   : > { %4080 = vrcp.f32 %v2858_v45  ;;  %3330 = vst [vmem:[%s6444_s25 + $0x100] sm:$0xff] %v3282_v56  ;;  %v3144_v27 = vmul.f32 %v4061_v48, %v2952_v60  ;;  %v2950_v4 = vmul.f32 %v6893_v38, %v2806_v55  ;;  %v2763_v57 = vsub.f32 1.0, %v6873_v5 }
 0x37a   : > { %v4063_v62 = vpop.eup %4062  ;;  %v2672_v52 = vmax.f32 %v2624_v24, 0.0  ;;  %4082 = vrcp.f32 %v3189_v41  ;;  %v3091_v59 = vmul.f32 1.442695, %v3002_v1  ;;  %v2670_v32 = vmax.f32 %v6925_v46, 0.0 }
 0x37b   : > { %v4065_v50 = vpop.eup %4064  ;;  %v3285_v26 = vsel %vm3249_vm4, %v4063_v62, %v6897_v44  ;;  %v3192_v53 = vadd.f32 1.0, %v3144_v27  ;;  %4084 = vpow2.f32 %v3095_v37  ;;  %v6951_v61 = vmin.f32 %v2669_v33, 1.0 }
 0x37c   : > { %v4067_v3 = vpop.eup %4066  ;;  %3333 = vst [vmem:[%s6444_s25 + $0x118] sm:$0xff] %v3285_v26  ;;  %v3142_v38 = vmul.f32 %v4065_v50, %v2950_v4  ;;  %v2863_v5 = vmax.f32 %v6942_v39, 0.001  ;;  %v2761_v44 = vsub.f32 1.0, %v6887_v43  ;;  %v6959_v63 = vmin.f32 %v2672_v52, 1.0  ;;  %v1548_v43 = vpop.f32.mrf.mxu1  ;;  %v7505_v50 = vld [vmem:[#allocation124_spill] sm:$0xff] }
 0x37d   : > { %v4069_v55 = vpop.eup %4068  ;;  %v3283_v9 = vsel %vm3249_vm4, %v4067_v3, %v7502_v18  ;;  %4086 = vrcp.f32 %v3192_v53  ;;  %v771_v25 = vadd.f32 %v7503_v30, %v7492_v29  ;;  %v2811_v45 = vmax.f32 %v2763_v57, 0.001 }
 0x37e   : > { %3331 = vst [vmem:[%s6444_s25 + $0x108] sm:$0xff] %v3283_v9  ;;  %v3190_v7 = vadd.f32 1.0, %v3142_v38  ;;  %4088 = vpow2.f32 %v3091_v59  ;;  %v1557_v35 = vadd.f32 %v6671_v8, %v3705_v6  ;;  %v2764_v40 = vsub.f32 1.0, %v6907_v2  ;;  %v3706_v54 = vpop.f32.mrf.mxu1  ;;  %v7506_v9 = vld [vmem:[#allocation119_spill] sm:$0xff] }
 0x37f   : > { %v6966_v46 = vmin.f32 %v2670_v32, 1.0  ;;  %v2861_v31 = vmax.f32 %v6951_v61, 0.001  ;;  %v4071_v34 = vpop.eup %4070  ;;  %v2955_v12 = vmul.f32 %v4069_v55, %v2811_v45  ;;  %v1549_v17 = vadd.f32 %v6671_v8, %v1548_v43 }
 0x380   : > { %4090 = vrcp.f32 %v3190_v7  ;;  %v3007_v22 = vsub.f32 0.0, %v1557_v35  ;;  %v781_v49 = vadd.f32 %v7504_v20, %v7492_v29  ;;  %v2762_v14 = vsub.f32 1.0, %v6905_v16  ;;  %v1551_v60 = vpop.f32.mrf.mxu1 }
 0x381   : > { %4092 = vrcp.f32 %v2863_v5  ;;  %v2809_v36 = vmax.f32 %v2761_v44, 0.001  ;;  %v2864_v2 = vmax.f32 %v6959_v63, 0.001  ;;  %v3005_v15 = vsub.f32 0.0, %v1549_v17  ;;  %v7507_v17 = vld [vmem:[#allocation130_spill] sm:$0xff] }
 0x382   : > { %v4073_v28 = vpop.eup %4072  ;;  %v3101_v23 = vmul.f32 1.442695, %v3007_v22  ;;  %v1560_v0 = vadd.f32 %v6671_v8, %v3706_v54  ;;  %v2812_v21 = vmax.f32 %v2764_v40, 0.001  ;;  %v2862_v51 = vmax.f32 %v6966_v46, 0.001 }
 0x383   : > { %v4075_v13 = vpop.eup %4074  ;;  %v3147_v58 = vmul.f32 %v4073_v28, %v2955_v12  ;;  %v2953_v11 = vmul.f32 %v4071_v34, %v2809_v36  ;;  %4094 = vrcp.f32 %v2861_v31  ;;  %v3097_v33 = vmul.f32 1.442695, %v3005_v15 }
 0x384   : > { %v4077_v10 = vpop.eup %4076  ;;  %4096 = vpow2.f32 %v3101_v23  ;;  %v3008_v56 = vsub.f32 0.0, %v1560_v0  ;;  %v1552_v41 = vadd.f32 %v6671_v8, %v1551_v60  ;;  %v2810_v27 = vmax.f32 %v2762_v14, 0.001  ;;  %v7509_v60 = vld [vmem:[#allocation132_spill] sm:$0xff] }
 0x385   : > { %v4079_v42 = vpop.eup %4078  ;;  %v3288_v16 = vsel %vm3249_vm4, %v4077_v10, %v781_v49  ;;  %v3195_v24 = vadd.f32 1.0, %v3147_v58  ;;  %4098 = vrcp.f32 %v2864_v2  ;;  %v2956_v1 = vmul.f32 %v4075_v13, %v2812_v21  ;;  %v7508_v58 = vld [vmem:[#allocation126_spill] sm:$0xff] }
 0x386   : > { %v4081_v48 = vpop.eup %4080  ;;  %3336 = vst [vmem:[%s6444_s25 + $0x130] sm:$0xff] %v3288_v16  ;;  %v3145_v19 = vmul.f32 %v4079_v42, %v2953_v11  ;;  %v3103_v52 = vmul.f32 1.442695, %v3008_v56  ;;  %v785_v26 = vadd.f32 %v7505_v50, %v7492_v29  ;;  %v3006_v59 = vsub.f32 0.0, %v1552_v41  ;;  %v7510_v41 = vld [vmem:[#allocation128_spill] sm:$0xff] }
 0x387   : > { %v4083_v37 = vpop.eup %4082  ;;  %4100 = vrcp.f32 %v3195_v24  ;;  %v2954_v3 = vmul.f32 %v4081_v48, %v2810_v27  ;;  %v2767_v32 = vsub.f32 1.0, %v6942_v39  ;;  %v775_v44 = vadd.f32 %v7506_v9, %v7492_v29 }
 0x388   : > { %v4085_v62 = vpop.eup %4084  ;;  %v3286_v4 = vsel %vm3249_vm4, %v4083_v37, %v771_v25  ;;  %v3193_v57 = vadd.f32 1.0, %v3145_v19  ;;  %4102 = vpow2.f32 %v3097_v33  ;;  %v3099_v18 = vmul.f32 1.442695, %v3006_v59 }
 0x389   : > { %4104 = vrcp.f32 %v2862_v51  ;;  %3334 = vst [vmem:[%s6444_s25 + $0x120] sm:$0xff] %v3286_v4  ;;  %v3148_v53 = vmul.f32 %v4085_v62, %v2956_v1  ;;  %v2765_v25 = vsub.f32 1.0, %v6951_v61  ;;  %v2815_v35 = vmax.f32 %v2767_v32, 0.001 }
 0x38a   : > { %v4087_v8 = vpop.eup %4086  ;;  %4106 = vrcp.f32 %v3193_v57  ;;  %v2768_v31 = vsub.f32 1.0, %v6959_v63  ;;  %v801_v28 = vadd.f32 %v7507_v17, %v7492_v29  ;;  %v2766_v49 = vsub.f32 1.0, %v6966_v46  ;;  %v7511_v57 = vld [vmem:[#allocation138_spill] sm:$0xff] }
 0x38b   : > { %v4089_v38 = vpop.eup %4088  ;;  %v3289_v55 = vsel %vm3249_vm4, %v4087_v8, %v785_v26  ;;  %v3196_v5 = vadd.f32 1.0, %v3148_v53  ;;  %4108 = vpow2.f32 %v3103_v52  ;;  %v2813_v12 = vmax.f32 %v2765_v25, 0.001  ;;  %v7512_v53 = vld [vmem:[#allocation134_spill] sm:$0xff]  ;;  %v824_v8 = vpop.f32.mrf.mxu0 }
 0x38c   : > { %3337 = vst [vmem:[%s6444_s25 + $0x138] sm:$0xff] %v3289_v55  ;;  %v3146_v7 = vmul.f32 %v4089_v38, %v2954_v3  ;;  %v2816_v2 = vmax.f32 %v2768_v31, 0.001  ;;  %v791_v23 = vadd.f32 %v7508_v58, %v7492_v29  ;;  %v2814_v46 = vmax.f32 %v2766_v49, 0.001 }
 0x38d   : > { %v4091_v6 = vpop.eup %4090  ;;  %4110 = vrcp.f32 %v3196_v5  ;;  %v805_v42 = vadd.f32 %v7509_v60, %v7492_v29  ;;  %v795_v37 = vadd.f32 %v7510_v41, %v7492_v29  ;;  %v821_v52 = vadd.f32 %v7511_v57, %v7492_v29 }
 0x38e   : > { %v4093_v30 = vpop.eup %4092  ;;  %v3287_v39 = vsel %vm3249_vm4, %v4091_v6, %v775_v44  ;;  %v3194_v45 = vadd.f32 1.0, %v3146_v7  ;;  %4112 = vpow2.f32 %v3099_v18  ;;  %v811_v59 = vadd.f32 %v7512_v53, %v7492_v29  ;;  %v7513_v18 = vld [vmem:[#allocation136_spill] sm:$0xff] }
 0x38f   : > { %3335 = vst [vmem:[%s6444_s25 + $0x128] sm:$0xff] %v3287_v39  ;;  %v2959_v43 = vmul.f32 %v4093_v30, %v2815_v35  ;;  %v825_v38 = vadd.f32 %v824_v8, %v7492_v29  ;;  %v815_v9 = vadd.f32 %v7513_v18, %v7492_v29 }
 0x390   : > { %4114 = vrcp.f32 %v3194_v45  ;;  %v4095_v40 = vpop.eup %4094 }
 0x391   : > { %v4097_v34 = vpop.eup %4096  ;;  %v2957_v14 = vmul.f32 %v4095_v40, %v2813_v12 }
 0x392   : > { %v4099_v22 = vpop.eup %4098  ;;  %v3151_v61 = vmul.f32 %v4097_v34, %v2959_v43 }
 0x393   : > { %v2960_v10 = vmul.f32 %v4099_v22, %v2816_v2 }
 0x394   : > { %v4101_v20 = vpop.eup %4100  ;;  %v3199_v63 = vadd.f32 1.0, %v3151_v61 }
 0x395   : > { %v4103_v36 = vpop.eup %4102  ;;  %v3292_v54 = vsel %vm3249_vm4, %v4101_v20, %v801_v28 }
 0x396   : > { %v4105_v13 = vpop.eup %4104  ;;  %3340 = vst [vmem:[%s6444_s25 + $0x150] sm:$0xff] %v3292_v54  ;;  %v3149_v15 = vmul.f32 %v4103_v36, %v2957_v14  ;;  %4116 = vrcp.f32 %v3199_v63 }
 0x397   : > { %v4107_v0 = vpop.eup %4106  ;;  %v2958_v33 = vmul.f32 %v4105_v13, %v2814_v46 }
 0x398   : > { %v4109_v21 = vpop.eup %4108  ;;  %v3290_v11 = vsel %vm3249_vm4, %v4107_v0, %v791_v23  ;;  %v3197_v51 = vadd.f32 1.0, %v3149_v15 }
 0x399   : > { %3338 = vst [vmem:[%s6444_s25 + $0x140] sm:$0xff] %v3290_v11  ;;  %v3152_v16 = vmul.f32 %v4109_v21, %v2960_v10 }
 0x39a   : > { %v4111_v24 = vpop.eup %4110  ;;  %4118 = vrcp.f32 %v3197_v51 }
 0x39b   : > { %v4113_v48 = vpop.eup %4112  ;;  %v3293_v19 = vsel %vm3249_vm4, %v4111_v24, %v805_v42  ;;  %v3200_v56 = vadd.f32 1.0, %v3152_v16 }
 0x39c   : > { %3341 = vst [vmem:[%s6444_s25 + $0x158] sm:$0xff] %v3293_v19  ;;  %v3150_v27 = vmul.f32 %v4113_v48, %v2958_v33 }
 0x39d   : > { %v4115_v1 = vpop.eup %4114  ;;  %4120 = vrcp.f32 %v3200_v56 }
 0x39e   : > { %v3291_v62 = vsel %vm3249_vm4, %v4115_v1, %v795_v37  ;;  %v3198_v4 = vadd.f32 1.0, %v3150_v27 }
 0x39f   : > { %3339 = vst [vmem:[%s6444_s25 + $0x148] sm:$0xff] %v3291_v62 }
 0x3a0   : > { %4122 = vrcp.f32 %v3198_v4 }
 0x3a3   : > { %v4117_v50 = vpop.eup %4116 }
 0x3a4   : > { %v3296_v26 = vsel %vm3249_vm4, %v4117_v50, %v821_v52 }
 0x3a5   : > { %3344 = vst [vmem:[%s6444_s25 + $0x170] sm:$0xff] %v3296_v26 }
 0x3a7   : > { %v4119_v3 = vpop.eup %4118 }
 0x3a8   : > { %v3294_v32 = vsel %vm3249_vm4, %v4119_v3, %v811_v59 }
 0x3a9   : > { %3342 = vst [vmem:[%s6444_s25 + $0x160] sm:$0xff] %v3294_v32 }
 0x3aa   : > { %v4121_v55 = vpop.eup %4120 }
 0x3ab   : > { %v3297_v5 = vsel %vm3249_vm4, %v4121_v55, %v825_v38 }
 0x3ac   : > { %3345 = vst [vmem:[%s6444_s25 + $0x178] sm:$0xff] %v3297_v5 }
 0x3ad   : > { %v4123_v44 = vpop.eup %4122 }
 0x3ae   : > { %v3295_v7 = vsel %vm3249_vm4, %v4123_v44, %v815_v9 }
 0x3af   : > { %3343 = vst [vmem:[%s6444_s25 + $0x168] sm:$0xff] %v3295_v7 }
 0x3b0   : > { %4264 = shalt.err (!%p4261_p0)
}
 0x3b1   : > { %s4265_s17 = scalar_lea.hbm %s7038_s10, 6144  ;;  %s4269_s18 = scalar_lea.hbm %s7095_s8, 12288 }
 0x3b2   : > { %p4266_p1 = scmp.ne.s32.totalorder %s7038_s10, %s4265_s17  ;;  %p4270_p4 = scmp.lt.s32.totalorder %s7038_s10, %s7095_s8 }
 0x3b3   : > { %p4271_p10 = scmp.lt.s32.totalorder %s4269_s18, %s4265_s17 }
 0x3b4   : > { %p4267_p2 = pnand %p4266_p1, %p4418_p5 }
 0x3b5   : > { %p4272_p9 = por %p4271_p10, %p4270_p4 }
 0x3b6   : > { %p4268_p3 = pneg %p4267_p2 }
 0x3b8   : > { %p4273_p12 = pnand %p4272_p9, %p4268_p3 }
 0x3ba   : > { %4276 = shalt.err (!%p4273_p12)
}
 0x3bb   : > { %s4333_s26 = smov 128   ;;  %s4334_s22 = smov 8  }
 0x3bc   : > { %3720 = dma.vmem_to_hbm [thread:$0]  (%p4418_p5), %s7040_s23, 6144, %s7038_s10, %s7047_s9, %s4333_s26, %s4333_s26, %s4334_s22  }
 0x3bd PF: > { %p3742_p13 = scmp.ge.s32.totalorder %s4319_s30, 2  ;;  %s3375_s12 = sand.u32 1, %s4307_s27  }
 0x3be   : > { %s3376_s20 = scalar_lea.sflag [#allocation4], %s3375_s12 }
 0x3bf   : > { %p3733_p7 = pnand %p3742_p13, %p4422_p6 }
 0x3c1   : > { %p3734_p8 = pneg %p3733_p7 }
 0x3c3   : > { %4302 = dma.done.wait (%p3734_p8), %s3376_s20, 6144  }
 0x3c4   : > { %4304 = vsyncadd (%p3734_p8), %s3376_s20, 4294961152  ;;  %p20_p11 = scmp.ge.s32.totalorder %s4405_s11, 4   ;;  %s7514_s27 = smov %s4311_s28 }
 0x3c5   : > { %s7515_s28 = smov %s4315_s29  ;;  %s7516_s29 = smov %s4416_s14 }
 0x3c6   : > { %s7517_s30 = smov %s4405_s11  ;;  %22 = sbr.rel (!%p20_p11) target bundleno = 5 (0x5), region = 103 }
 0x3cb   :  { %3381 = vsyncpa [#allocation3], 1 }
 0x3cc   :  { %3383 = vsyncpa [#allocation3 + $0x1], 1 }
 0x3cd   :  { %3384 = vsyncpa [#allocation6], 1 }
 0x3ce   :  { %3385 = vsyncpa [#allocation4], 1 }
 0x3cf   :  { %3387 = vsyncpa [#allocation4 + $0x1], 1 }

</bundles_post_ra>
